<compile_context>
chip_gen: v6e
topology: v6e:2x2x1
jax: 0.10.0
libtpu: 0.0.40
codegen_flags: <defaults>
</compile_context>

<pallas_src>
import numpy as np
import jax
import jax.numpy as jnp
from jax.experimental import pallas as pl
from jax.experimental.pallas import tpu as pltpu

# architecture constants fixed by init_Flow()
HIDDEN = 64
SCALE_HIDDEN = 256
FLOW_LAYERS = 2
N_AFFINE = 2 * FLOW_LAYERS   # 4 masked affine coupling layers
LN_EPS = 1e-5                # torch.nn.LayerNorm default
TANH_EPS = 1e-6


def _round_up(x, m):
    return ((x + m - 1) // m) * m


def _layernorm(h, gamma, beta):
    # E[x^2] - mean^2 (clamped): both reductions are independent -> dual-issue on XLU.
    mu = jnp.mean(h, axis=-1, keepdims=True)
    var = jnp.maximum(jnp.mean(h * h, axis=-1, keepdims=True) - mu * mu, 0.0)
    return (h - mu) * jax.lax.rsqrt(var + LN_EPS) * gamma + beta


def flow_forward_kernel(obs_ref, act_ref, avec_ref, tvec_ref,
                        tW1z_ref, tW1o_ref, tW2_ref, tW3_ref,
                        sW1_ref, sW2_ref, svec_ref, out_ref):
    A = act_ref.shape[1]
    out_w = out_ref.shape[1]

    obs = obs_ref[...]                         # (tb, S) f32
    obs_bf = obs.astype(jnp.bfloat16)          # MXU operand (hoisted, reused)
    z = act_ref[...]                           # (tb, A) f32

    avec = avec_ref[...]                       # (3*N_AFFINE, A)   [mask, 1-mask, tb3]
    tvec = tvec_ref[...]                       # (6*N_AFFINE, 64)  [tb1,g1,be1,tb2,g2,be2]

    # obs-side first-layer matmul hoisted out of the coupling loop:
    # one N = 4*64 = 256 matmul (full MXU width) instead of four N=64 matmuls,
    # and it sits off the serial z-dependency chain.
    obs_h = jnp.dot(obs_bf, tW1o_ref[...],
                    preferred_element_type=jnp.float32)            # (tb, 4*64)

    # ---- 4x MaskedCondAffineFlow (scale net is None -> log_det == 0) ----
    for i in range(N_AFFINE):                  # static unroll
        b   = avec[3 * i + 0: 3 * i + 1, :]    # (1, A)
        omb = avec[3 * i + 1: 3 * i + 2, :]    # (1, A) == 1 - b (precomputed)
        tb3 = avec[3 * i + 2: 3 * i + 3, :]
        tb1 = tvec[6 * i + 0: 6 * i + 1, :]
        g1  = tvec[6 * i + 1: 6 * i + 2, :]
        be1 = tvec[6 * i + 2: 6 * i + 3, :]
        tb2 = tvec[6 * i + 3: 6 * i + 4, :]
        g2  = tvec[6 * i + 4: 6 * i + 5, :]
        be2 = tvec[6 * i + 5: 6 * i + 6, :]

        zm = z * b
        # t_mlp(concat([zm, obs], -1)) as a split matmul; obs-side term precomputed.
        h = (jnp.dot(zm.astype(jnp.bfloat16), tW1z_ref[i],
                     preferred_element_type=jnp.float32)
             + obs_h[:, i * HIDDEN:(i + 1) * HIDDEN]
             + tb1)
        h = jnp.maximum(_layernorm(h, g1, be1), 0.0)
        h = jnp.dot(h.astype(jnp.bfloat16), tW2_ref[i],
                    preferred_element_type=jnp.float32) + tb2
        h = jnp.maximum(_layernorm(h, g2, be2), 0.0)
        t = jnp.dot(h.astype(jnp.bfloat16), tW3_ref[i],
                    preferred_element_type=jnp.float32) + tb3
        z = zm + omb * (z + t)

    # ---- CondScaling: log_det = learnable_scale_1(obs)[:, 0] ----
    svec = svec_ref[...]                       # (4, 256) [sb1, sb2, sW3_row, sb3]
    sb1 = svec[0:1, :]
    sb2 = svec[1:2, :]
    w3  = svec[2:3, :]
    sb3 = svec[3:4, 0:1]
    h = jnp.maximum(
        jnp.dot(obs_bf, sW1_ref[...], preferred_element_type=jnp.float32) + sb1, 0.0)
    h = jnp.maximum(
        jnp.dot(h.astype(jnp.bfloat16), sW2_ref[...],
                preferred_element_type=jnp.float32) + sb2, 0.0)
    # 256 -> 1 projection as a VPU multiply + lane reduce (avoids an N=1 MXU pass)
    s1 = jnp.sum(h * w3, axis=-1, keepdims=True) + sb3            # (tb, 1)

    # ---- Preprocessing: tanh squash ----
    z_t = jnp.tanh(z)
    log_det = jnp.sum(jnp.log(1.0 - z_t * z_t + TANH_EPS), axis=-1, keepdims=True)
    log_q = -s1 - log_det                                          # (tb, 1)

    # lane-dense packed output: lanes [0, A) = z, lane A = log_q, rest = 0.
    # log_q is placed with an iota-compare + VPU select (lane splat + select, no
    # lane rotate to offset A); the z tail-pad is a constant-zero concat.
    tb = z_t.shape[0]
    z_slab = jnp.concatenate(
        [z_t, jnp.zeros((tb, out_w - A), jnp.float32)], axis=-1)
    col = jax.lax.broadcasted_iota(jnp.int32, (tb, out_w), 1)
    out_ref[...] = jnp.where(col == A, log_q, z_slab)


def _choose_tiling(B, block_b):
    """Pick (tile_rows, num_tiles, padded_B) for the 1-D parallel batch grid.

    - tile is a multiple of 8 sublanes
    - v7x has 2 TensorCores: a 1-step grid leaves a core idle, so batches > 8 rows
      are split into >= 2 steps; an even step count is preferred when it does not
      create an all-padding tail tile.
    """
    b8 = _round_up(max(B, 1), 8)
    tb = min(_round_up(block_b, 8), b8)
    nb = pl.cdiv(b8, tb)
    if nb == 1 and b8 > 8:
        nb = 2                                   # use both v7x TensorCores
    if nb > 2 and nb % 2 == 1:
        nb_even = nb + 1
        tb_even = _round_up(pl.cdiv(B, nb_even), 8)
        if tb_even * (nb_even - 1) < B:          # tail tile still has real rows
            nb = nb_even
    tb = _round_up(pl.cdiv(B, nb), 8)            # shrink tile to balance the steps
    return tb, nb, tb * nb


def flow_policy_forward(params, obs, act, *, block_b=2048):
    """Returns (z, log_q) exactly as FlowPolicy.forward: z (B, A), log_q (B,)."""
    (avec, tvec, tW1z, tW1o, tW2, tW3, sW1, sW2, svec) = params
    B, S = obs.shape
    A = act.shape[1]
    out_w = 128 * pl.cdiv(A + 1, 128)          # packed, lane-dense output width

    tb, nb, b_pad = _choose_tiling(B, block_b)
    if b_pad != B:
        obs = jnp.pad(obs, ((0, b_pad - B), (0, 0)))
        act = jnp.pad(act, ((0, b_pad - B), (0, 0)))

    const2 = lambda i: (0, 0)
    const3 = lambda i: (0, 0, 0)

    slab = pl.pallas_call(
        flow_forward_kernel,
        out_shape=jax.ShapeDtypeStruct((b_pad, out_w), jnp.float32),
        grid=(nb,),
        in_specs=[
            pl.BlockSpec((tb, S), lambda i: (i, 0)),   # obs: tiled on batch
            pl.BlockSpec((tb, A), lambda i: (i, 0)),   # act: tiled on batch
            pl.BlockSpec(avec.shape, const2),          # weights: resident in VMEM
            pl.BlockSpec(tvec.shape, const2),
            pl.BlockSpec(tW1z.shape, const3),
            pl.BlockSpec(tW1o.shape, const2),          # packed (S, 4*64) obs weight
            pl.BlockSpec(tW2.shape, const3),
            pl.BlockSpec(tW3.shape, const3),
            pl.BlockSpec(sW1.shape, const2),
            pl.BlockSpec(sW2.shape, const2),
            pl.BlockSpec(svec.shape, const2),
        ],
        out_specs=pl.BlockSpec((tb, out_w), lambda i: (i, 0)),
        compiler_params=pltpu.CompilerParams(
            dimension_semantics=("parallel",)),
    )(obs, act, avec, tvec, tW1z, tW1o, tW2, tW3, sW1, sW2, svec)

    z = slab[:B, :A]
    log_q = slab[:B, A]
    return z, log_q


def init_params(key, A, S):
    """Deterministic synthetic parameters (shapes dictated by init_Flow), packed
    for the kernel: small vectors consolidated, matmul weights stored in bf16,
    the obs-side first-layer weights stacked into one (S, 4*64) matrix."""
    ks = jax.random.split(key, 12)

    def w(k, shape, scale=0.1):
        return (scale * jax.random.normal(k, shape)).astype(jnp.float32)

    mask_b = jnp.array([1.0 if i % 2 == 0 else 0.0 for i in range(A)], jnp.float32)
    mask = jnp.stack([mask_b, 1.0 - mask_b, mask_b, 1.0 - mask_b], axis=0)   # (4, A)

    tW1 = w(ks[0], (N_AFFINE, A + S, HIDDEN))
    tb1 = w(ks[1], (N_AFFINE, HIDDEN), 0.01)
    g1 = jnp.ones((N_AFFINE, HIDDEN), jnp.float32)
    be1 = jnp.zeros((N_AFFINE, HIDDEN), jnp.float32)
    tW2 = w(ks[2], (N_AFFINE, HIDDEN, HIDDEN))
    tb2 = w(ks[3], (N_AFFINE, HIDDEN), 0.01)
    g2 = jnp.ones((N_AFFINE, HIDDEN), jnp.float32)
    be2 = jnp.zeros((N_AFFINE, HIDDEN), jnp.float32)
    tW3 = w(ks[4], (N_AFFINE, HIDDEN, A))
    tb3 = w(ks[5], (N_AFFINE, A), 0.01)

    sW1 = w(ks[6], (S, SCALE_HIDDEN))
    sb1 = w(ks[7], (SCALE_HIDDEN,), 0.01)
    sW2 = w(ks[8], (SCALE_HIDDEN, SCALE_HIDDEN))
    sb2 = w(ks[9], (SCALE_HIDDEN,), 0.01)
    sW3 = w(ks[10], (SCALE_HIDDEN,), 0.1)     # 256 -> 1 projection, stored as a row
    sb3 = w(ks[11], (), 0.01)

    # consolidated per-layer vectors
    avec = jnp.stack([mask, 1.0 - mask, tb3], axis=1).reshape(3 * N_AFFINE, A)
    tvec = jnp.stack([tb1, g1, be1, tb2, g2, be2], axis=1).reshape(6 * N_AFFINE, HIDDEN)
    svec = jnp.stack([sb1, sb2, sW3,
                      jnp.broadcast_to(sb3, (SCALE_HIDDEN,))], axis=0)       # (4, 256)

    # bf16 MXU-operand weights; first layer pre-split (z-part per layer, obs-part
    # stacked along N into one lane-dense matrix to enable a single 256-wide matmul).
    tW1z = tW1[:, :A, :].astype(jnp.bfloat16)                                # (4, A, 64)
    tW1o = jnp.transpose(tW1[:, A:, :], (1, 0, 2)).reshape(
        S, N_AFFINE * HIDDEN).astype(jnp.bfloat16)                           # (S, 256)
    return [avec, tvec, tW1z, tW1o,
            tW2.astype(jnp.bfloat16), tW3.astype(jnp.bfloat16),
            sW1.astype(jnp.bfloat16), sW2.astype(jnp.bfloat16), svec]


def reference_forward(params, obs, act):
    """Pure-JAX reference mirroring the PyTorch flow stack (eval mode, bf16 weights)."""
    avec, tvec, tW1z, tW1o, tW2, tW3, sW1, sW2, svec = params
    obs = obs.astype(jnp.float32)
    obs_bf = obs.astype(jnp.bfloat16)
    z = act.astype(jnp.float32)
    for i in range(N_AFFINE):
        b, omb, tb3 = (avec[3 * i + k][None, :] for k in range(3))
        tb1, g1, be1, tb2, g2, be2 = (tvec[6 * i + k][None, :] for k in range(6))
        zm = z * b
        h = (jnp.dot(zm.astype(jnp.bfloat16), tW1z[i], preferred_element_type=jnp.float32)
             + jnp.dot(obs_bf, tW1o[:, i * HIDDEN:(i + 1) * HIDDEN],
                       preferred_element_type=jnp.float32) + tb1)
        h = jax.nn.relu(_layernorm(h, g1, be1))
        h = jnp.dot(h.astype(jnp.bfloat16), tW2[i], preferred_element_type=jnp.float32) + tb2
        h = jax.nn.relu(_layernorm(h, g2, be2))
        t = jnp.dot(h.astype(jnp.bfloat16), tW3[i], preferred_element_type=jnp.float32) + tb3
        z = zm + omb * (z + t)
        # log_det == 0 for every coupling layer (scale net is None)
    sb1 = svec[0][None, :]
    sb2 = svec[1][None, :]
    w3 = svec[2][None, :]
    sb3 = svec[3, 0]
    h = jax.nn.relu(jnp.dot(obs_bf, sW1, preferred_element_type=jnp.float32) + sb1)
    h = jax.nn.relu(jnp.dot(h.astype(jnp.bfloat16), sW2, preferred_element_type=jnp.float32) + sb2)
    s1 = jnp.sum(h * w3, axis=-1) + sb3
    z_t = jnp.tanh(z)
    log_det = jnp.sum(jnp.log(1.0 - z_t ** 2 + TANH_EPS), axis=-1)
    return z_t, -s1 - log_det


if __name__ == "__main__":
    # Small, module-consistent shapes: batch=64, action_sizes=8, state_sizes=16.
    # block_b=32 -> 2 grid steps, exercising the batch-tiled (parallel) pipeline.
    B, A, S = 64, 8, 16
    key = jax.random.PRNGKey(0)
    k_obs, k_act, k_par = jax.random.split(key, 3)
    obs = jax.random.normal(k_obs, (B, S), jnp.float32)
    act = 0.5 * jax.random.normal(k_act, (B, A), jnp.float32)
    params = init_params(k_par, A, S)

    z, log_q = jax.block_until_ready(flow_policy_forward(params, obs, act, block_b=32))

    z_ref, log_q_ref = reference_forward(params, obs, act)
    np.testing.assert_allclose(np.asarray(z), np.asarray(z_ref), rtol=2e-3, atol=2e-3)
    np.testing.assert_allclose(np.asarray(log_q), np.asarray(log_q_ref), rtol=2e-3, atol=2e-3)

    # TODO(synk): prior (ConditionalDiagLinearGaussian) and sample/log_prob/inverse/get_qv
    # paths are not part of FlowPolicy.forward and are intentionally not implemented.
    print("KERNEL_OK")
</pallas_src>

<mosaic_0001>
module attributes {stable_mosaic.version = 11 : i64} {
  func.func @flow_forward_kernel(%arg0: i32, %arg1: memref<32x16xf32, #tpu.memory_space<vmem>>, %arg2: memref<32x8xf32, #tpu.memory_space<vmem>>, %arg3: memref<12x8xf32, #tpu.memory_space<vmem>>, %arg4: memref<24x64xf32, #tpu.memory_space<vmem>>, %arg5: memref<4x8x64xbf16, #tpu.memory_space<vmem>>, %arg6: memref<16x256xbf16, #tpu.memory_space<vmem>>, %arg7: memref<4x64x64xbf16, #tpu.memory_space<vmem>>, %arg8: memref<4x64x8xbf16, #tpu.memory_space<vmem>>, %arg9: memref<16x256xbf16, #tpu.memory_space<vmem>>, %arg10: memref<256x256xbf16, #tpu.memory_space<vmem>>, %arg11: memref<4x256xf32, #tpu.memory_space<vmem>>, %arg12: memref<32x128xf32, #tpu.memory_space<vmem>>) attributes {dimension_semantics = [#tpu.dimension_semantics<parallel>], iteration_bounds = array<i64: 2>, scalar_prefetch = 0 : i64, scratch_operands = 0 : i64, tpu.core_type = #tpu.core_type<tc>, window_params = [{transform_indices = @transform_0, window_bounds = array<i64: 32, 16>}, {transform_indices = @transform_1, window_bounds = array<i64: 32, 8>}, {pipeline_mode = #tpu.pipeline_mode<synchronous>, transform_indices = @transform_2, window_bounds = array<i64: 12, 8>}, {pipeline_mode = #tpu.pipeline_mode<synchronous>, transform_indices = @transform_3, window_bounds = array<i64: 24, 64>}, {pipeline_mode = #tpu.pipeline_mode<synchronous>, transform_indices = @transform_4, window_bounds = array<i64: 4, 8, 64>}, {pipeline_mode = #tpu.pipeline_mode<synchronous>, transform_indices = @transform_5, window_bounds = array<i64: 16, 256>}, {pipeline_mode = #tpu.pipeline_mode<synchronous>, transform_indices = @transform_6, window_bounds = array<i64: 4, 64, 64>}, {pipeline_mode = #tpu.pipeline_mode<synchronous>, transform_indices = @transform_7, window_bounds = array<i64: 4, 64, 8>}, {pipeline_mode = #tpu.pipeline_mode<synchronous>, transform_indices = @transform_8, window_bounds = array<i64: 16, 256>}, {pipeline_mode = #tpu.pipeline_mode<synchronous>, transform_indices = @transform_9, window_bounds = array<i64: 256, 256>}, {pipeline_mode = #tpu.pipeline_mode<synchronous>, transform_indices = @transform_10, window_bounds = array<i64: 4, 256>}, {transform_indices = @transform_11, window_bounds = array<i64: 32, 128>}]} {
    %c0 = arith.constant 0 : index
    %c0_0 = arith.constant 0 : index
    %0 = vector.load %arg1[%c0, %c0_0] : memref<32x16xf32, #tpu.memory_space<vmem>>, vector<32x16xf32>
    %1 = arith.truncf %0 : vector<32x16xf32> to vector<32x16xbf16>
    %c0_1 = arith.constant 0 : index
    %c0_2 = arith.constant 0 : index
    %2 = vector.load %arg2[%c0_1, %c0_2] : memref<32x8xf32, #tpu.memory_space<vmem>>, vector<32x8xf32>
    %c0_3 = arith.constant 0 : index
    %c0_4 = arith.constant 0 : index
    %3 = vector.load %arg3[%c0_3, %c0_4] : memref<12x8xf32, #tpu.memory_space<vmem>>, vector<12x8xf32>
    %c0_5 = arith.constant 0 : index
    %c0_6 = arith.constant 0 : index
    %4 = vector.load %arg4[%c0_5, %c0_6] : memref<24x64xf32, #tpu.memory_space<vmem>>, vector<24x64xf32>
    %c0_7 = arith.constant 0 : index
    %c0_8 = arith.constant 0 : index
    %5 = vector.load %arg6[%c0_7, %c0_8] : memref<16x256xbf16, #tpu.memory_space<vmem>>, vector<16x256xbf16>
    %cst = arith.constant dense<0.000000e+00> : vector<32x256xf32>
    %6 = tpu.matmul %1, %5, %cst {dimension_numbers = #tpu.dot_dimension_numbers<[1], [0], [0], [1], [0, 0, 1, 1], [], []>} : vector<32x16xbf16>, vector<16x256xbf16>, vector<32x256xf32> -> vector<32x256xf32>
    %7 = vector.extract_strided_slice %3 {offsets = [0, 0], sizes = [1, 8], strides = [1, 1]} : vector<12x8xf32> to vector<1x8xf32>
    %8 = vector.extract_strided_slice %3 {offsets = [1, 0], sizes = [1, 8], strides = [1, 1]} : vector<12x8xf32> to vector<1x8xf32>
    %9 = vector.extract_strided_slice %3 {offsets = [2, 0], sizes = [1, 8], strides = [1, 1]} : vector<12x8xf32> to vector<1x8xf32>
    %10 = vector.extract_strided_slice %4 {offsets = [0, 0], sizes = [1, 64], strides = [1, 1]} : vector<24x64xf32> to vector<1x64xf32>
    %11 = vector.extract_strided_slice %4 {offsets = [1, 0], sizes = [1, 64], strides = [1, 1]} : vector<24x64xf32> to vector<1x64xf32>
    %12 = vector.extract_strided_slice %4 {offsets = [2, 0], sizes = [1, 64], strides = [1, 1]} : vector<24x64xf32> to vector<1x64xf32>
    %13 = vector.extract_strided_slice %4 {offsets = [3, 0], sizes = [1, 64], strides = [1, 1]} : vector<24x64xf32> to vector<1x64xf32>
    %14 = vector.extract_strided_slice %4 {offsets = [4, 0], sizes = [1, 64], strides = [1, 1]} : vector<24x64xf32> to vector<1x64xf32>
    %15 = vector.extract_strided_slice %4 {offsets = [5, 0], sizes = [1, 64], strides = [1, 1]} : vector<24x64xf32> to vector<1x64xf32>
    %16 = vector.broadcast %7 : vector<1x8xf32> to vector<32x8xf32>
    %17 = arith.mulf %2, %16 : vector<32x8xf32>
    %18 = arith.truncf %17 : vector<32x8xf32> to vector<32x8xbf16>
    %c0_9 = arith.constant 0 : index
    %c0_10 = arith.constant 0 : index
    %c0_11 = arith.constant 0 : index
    %19 = vector.load %arg5[%c0_9, %c0_10, %c0_11] : memref<4x8x64xbf16, #tpu.memory_space<vmem>>, vector<1x8x64xbf16>
    %20 = vector.shape_cast %19 : vector<1x8x64xbf16> to vector<8x64xbf16>
    %cst_12 = arith.constant dense<0.000000e+00> : vector<32x64xf32>
    %21 = tpu.matmul %18, %20, %cst_12 {dimension_numbers = #tpu.dot_dimension_numbers<[1], [0], [0], [1], [0, 0, 1, 1], [], []>} : vector<32x8xbf16>, vector<8x64xbf16>, vector<32x64xf32> -> vector<32x64xf32>
    %22 = vector.extract_strided_slice %6 {offsets = [0, 0], sizes = [32, 64], strides = [1, 1]} : vector<32x256xf32> to vector<32x64xf32>
    %23 = arith.addf %21, %22 : vector<32x64xf32>
    %24 = vector.broadcast %10 : vector<1x64xf32> to vector<32x64xf32>
    %25 = arith.addf %23, %24 : vector<32x64xf32>
    %cst_13 = arith.constant dense<0.000000e+00> : vector<32xf32>
    %26 = vector.multi_reduction <add>, %25, %cst_13 [1] : vector<32x64xf32> to vector<32xf32>
    %27 = vector.shape_cast %26 : vector<32xf32> to vector<32x1xf32>
    %cst_14 = arith.constant 6.400000e+01 : f32
    %28 = vector.broadcast %cst_14 : f32 to vector<32x1xf32>
    %29 = arith.divf %27, %28 : vector<32x1xf32>
    %30 = arith.mulf %25, %25 : vector<32x64xf32>
    %cst_15 = arith.constant dense<0.000000e+00> : vector<32xf32>
    %31 = vector.multi_reduction <add>, %30, %cst_15 [1] : vector<32x64xf32> to vector<32xf32>
    %32 = vector.shape_cast %31 : vector<32xf32> to vector<32x1xf32>
    %cst_16 = arith.constant 6.400000e+01 : f32
    %33 = vector.broadcast %cst_16 : f32 to vector<32x1xf32>
    %34 = arith.divf %32, %33 : vector<32x1xf32>
    %35 = arith.mulf %29, %29 : vector<32x1xf32>
    %36 = arith.subf %34, %35 : vector<32x1xf32>
    %cst_17 = arith.constant 0.000000e+00 : f32
    %37 = vector.broadcast %cst_17 : f32 to vector<32x1xf32>
    %38 = arith.maximumf %36, %37 : vector<32x1xf32>
    %39 = vector.broadcast %29 : vector<32x1xf32> to vector<32x64xf32>
    %40 = arith.subf %25, %39 : vector<32x64xf32>
    %cst_18 = arith.constant 9.99999974E-6 : f32
    %41 = vector.broadcast %cst_18 : f32 to vector<32x1xf32>
    %42 = arith.addf %38, %41 : vector<32x1xf32>
    %43 = math.rsqrt %42 : vector<32x1xf32>
    %44 = vector.broadcast %43 : vector<32x1xf32> to vector<32x64xf32>
    %45 = arith.mulf %40, %44 : vector<32x64xf32>
    %46 = vector.broadcast %11 : vector<1x64xf32> to vector<32x64xf32>
    %47 = arith.mulf %45, %46 : vector<32x64xf32>
    %48 = vector.broadcast %12 : vector<1x64xf32> to vector<32x64xf32>
    %49 = arith.addf %47, %48 : vector<32x64xf32>
    %cst_19 = arith.constant 0.000000e+00 : f32
    %50 = vector.broadcast %cst_19 : f32 to vector<32x64xf32>
    %51 = arith.maximumf %49, %50 : vector<32x64xf32>
    %52 = arith.truncf %51 : vector<32x64xf32> to vector<32x64xbf16>
    %c0_20 = arith.constant 0 : index
    %c0_21 = arith.constant 0 : index
    %c0_22 = arith.constant 0 : index
    %53 = vector.load %arg7[%c0_20, %c0_21, %c0_22] : memref<4x64x64xbf16, #tpu.memory_space<vmem>>, vector<1x64x64xbf16>
    %54 = vector.shape_cast %53 : vector<1x64x64xbf16> to vector<64x64xbf16>
    %cst_23 = arith.constant dense<0.000000e+00> : vector<32x64xf32>
    %55 = tpu.matmul %52, %54, %cst_23 {dimension_numbers = #tpu.dot_dimension_numbers<[1], [0], [0], [1], [0, 0, 1, 1], [], []>} : vector<32x64xbf16>, vector<64x64xbf16>, vector<32x64xf32> -> vector<32x64xf32>
    %56 = vector.broadcast %13 : vector<1x64xf32> to vector<32x64xf32>
    %57 = arith.addf %55, %56 : vector<32x64xf32>
    %cst_24 = arith.constant dense<0.000000e+00> : vector<32xf32>
    %58 = vector.multi_reduction <add>, %57, %cst_24 [1] : vector<32x64xf32> to vector<32xf32>
    %59 = vector.shape_cast %58 : vector<32xf32> to vector<32x1xf32>
    %cst_25 = arith.constant 6.400000e+01 : f32
    %60 = vector.broadcast %cst_25 : f32 to vector<32x1xf32>
    %61 = arith.divf %59, %60 : vector<32x1xf32>
    %62 = arith.mulf %57, %57 : vector<32x64xf32>
    %cst_26 = arith.constant dense<0.000000e+00> : vector<32xf32>
    %63 = vector.multi_reduction <add>, %62, %cst_26 [1] : vector<32x64xf32> to vector<32xf32>
    %64 = vector.shape_cast %63 : vector<32xf32> to vector<32x1xf32>
    %cst_27 = arith.constant 6.400000e+01 : f32
    %65 = vector.broadcast %cst_27 : f32 to vector<32x1xf32>
    %66 = arith.divf %64, %65 : vector<32x1xf32>
    %67 = arith.mulf %61, %61 : vector<32x1xf32>
    %68 = arith.subf %66, %67 : vector<32x1xf32>
    %cst_28 = arith.constant 0.000000e+00 : f32
    %69 = vector.broadcast %cst_28 : f32 to vector<32x1xf32>
    %70 = arith.maximumf %68, %69 : vector<32x1xf32>
    %71 = vector.broadcast %61 : vector<32x1xf32> to vector<32x64xf32>
    %72 = arith.subf %57, %71 : vector<32x64xf32>
    %cst_29 = arith.constant 9.99999974E-6 : f32
    %73 = vector.broadcast %cst_29 : f32 to vector<32x1xf32>
    %74 = arith.addf %70, %73 : vector<32x1xf32>
    %75 = math.rsqrt %74 : vector<32x1xf32>
    %76 = vector.broadcast %75 : vector<32x1xf32> to vector<32x64xf32>
    %77 = arith.mulf %72, %76 : vector<32x64xf32>
    %78 = vector.broadcast %14 : vector<1x64xf32> to vector<32x64xf32>
    %79 = arith.mulf %77, %78 : vector<32x64xf32>
    %80 = vector.broadcast %15 : vector<1x64xf32> to vector<32x64xf32>
    %81 = arith.addf %79, %80 : vector<32x64xf32>
    %cst_30 = arith.constant 0.000000e+00 : f32
    %82 = vector.broadcast %cst_30 : f32 to vector<32x64xf32>
    %83 = arith.maximumf %81, %82 : vector<32x64xf32>
    %84 = arith.truncf %83 : vector<32x64xf32> to vector<32x64xbf16>
    %c0_31 = arith.constant 0 : index
    %c0_32 = arith.constant 0 : index
    %c0_33 = arith.constant 0 : index
    %85 = vector.load %arg8[%c0_31, %c0_32, %c0_33] : memref<4x64x8xbf16, #tpu.memory_space<vmem>>, vector<1x64x8xbf16>
    %86 = vector.shape_cast %85 : vector<1x64x8xbf16> to vector<64x8xbf16>
    %cst_34 = arith.constant dense<0.000000e+00> : vector<32x8xf32>
    %87 = tpu.matmul %84, %86, %cst_34 {dimension_numbers = #tpu.dot_dimension_numbers<[1], [0], [0], [1], [0, 0, 1, 1], [], []>} : vector<32x64xbf16>, vector<64x8xbf16>, vector<32x8xf32> -> vector<32x8xf32>
    %88 = vector.broadcast %9 : vector<1x8xf32> to vector<32x8xf32>
    %89 = arith.addf %87, %88 : vector<32x8xf32>
    %90 = arith.addf %2, %89 : vector<32x8xf32>
    %91 = vector.broadcast %8 : vector<1x8xf32> to vector<32x8xf32>
    %92 = arith.mulf %91, %90 : vector<32x8xf32>
    %93 = arith.addf %17, %92 : vector<32x8xf32>
    %94 = vector.extract_strided_slice %3 {offsets = [3, 0], sizes = [1, 8], strides = [1, 1]} : vector<12x8xf32> to vector<1x8xf32>
    %95 = vector.extract_strided_slice %3 {offsets = [4, 0], sizes = [1, 8], strides = [1, 1]} : vector<12x8xf32> to vector<1x8xf32>
    %96 = vector.extract_strided_slice %3 {offsets = [5, 0], sizes = [1, 8], strides = [1, 1]} : vector<12x8xf32> to vector<1x8xf32>
    %97 = vector.extract_strided_slice %4 {offsets = [6, 0], sizes = [1, 64], strides = [1, 1]} : vector<24x64xf32> to vector<1x64xf32>
    %98 = vector.extract_strided_slice %4 {offsets = [7, 0], sizes = [1, 64], strides = [1, 1]} : vector<24x64xf32> to vector<1x64xf32>
    %99 = vector.extract_strided_slice %4 {offsets = [8, 0], sizes = [1, 64], strides = [1, 1]} : vector<24x64xf32> to vector<1x64xf32>
    %100 = vector.extract_strided_slice %4 {offsets = [9, 0], sizes = [1, 64], strides = [1, 1]} : vector<24x64xf32> to vector<1x64xf32>
    %101 = vector.extract_strided_slice %4 {offsets = [10, 0], sizes = [1, 64], strides = [1, 1]} : vector<24x64xf32> to vector<1x64xf32>
    %102 = vector.extract_strided_slice %4 {offsets = [11, 0], sizes = [1, 64], strides = [1, 1]} : vector<24x64xf32> to vector<1x64xf32>
    %103 = vector.broadcast %94 : vector<1x8xf32> to vector<32x8xf32>
    %104 = arith.mulf %93, %103 : vector<32x8xf32>
    %105 = arith.truncf %104 : vector<32x8xf32> to vector<32x8xbf16>
    %c1 = arith.constant 1 : index
    %c0_35 = arith.constant 0 : index
    %c0_36 = arith.constant 0 : index
    %106 = vector.load %arg5[%c1, %c0_35, %c0_36] : memref<4x8x64xbf16, #tpu.memory_space<vmem>>, vector<1x8x64xbf16>
    %107 = vector.shape_cast %106 : vector<1x8x64xbf16> to vector<8x64xbf16>
    %cst_37 = arith.constant dense<0.000000e+00> : vector<32x64xf32>
    %108 = tpu.matmul %105, %107, %cst_37 {dimension_numbers = #tpu.dot_dimension_numbers<[1], [0], [0], [1], [0, 0, 1, 1], [], []>} : vector<32x8xbf16>, vector<8x64xbf16>, vector<32x64xf32> -> vector<32x64xf32>
    %109 = vector.extract_strided_slice %6 {offsets = [0, 64], sizes = [32, 64], strides = [1, 1]} : vector<32x256xf32> to vector<32x64xf32>
    %110 = arith.addf %108, %109 : vector<32x64xf32>
    %111 = vector.broadcast %97 : vector<1x64xf32> to vector<32x64xf32>
    %112 = arith.addf %110, %111 : vector<32x64xf32>
    %cst_38 = arith.constant dense<0.000000e+00> : vector<32xf32>
    %113 = vector.multi_reduction <add>, %112, %cst_38 [1] : vector<32x64xf32> to vector<32xf32>
    %114 = vector.shape_cast %113 : vector<32xf32> to vector<32x1xf32>
    %cst_39 = arith.constant 6.400000e+01 : f32
    %115 = vector.broadcast %cst_39 : f32 to vector<32x1xf32>
    %116 = arith.divf %114, %115 : vector<32x1xf32>
    %117 = arith.mulf %112, %112 : vector<32x64xf32>
    %cst_40 = arith.constant dense<0.000000e+00> : vector<32xf32>
    %118 = vector.multi_reduction <add>, %117, %cst_40 [1] : vector<32x64xf32> to vector<32xf32>
    %119 = vector.shape_cast %118 : vector<32xf32> to vector<32x1xf32>
    %cst_41 = arith.constant 6.400000e+01 : f32
    %120 = vector.broadcast %cst_41 : f32 to vector<32x1xf32>
    %121 = arith.divf %119, %120 : vector<32x1xf32>
    %122 = arith.mulf %116, %116 : vector<32x1xf32>
    %123 = arith.subf %121, %122 : vector<32x1xf32>
    %cst_42 = arith.constant 0.000000e+00 : f32
    %124 = vector.broadcast %cst_42 : f32 to vector<32x1xf32>
    %125 = arith.maximumf %123, %124 : vector<32x1xf32>
    %126 = vector.broadcast %116 : vector<32x1xf32> to vector<32x64xf32>
    %127 = arith.subf %112, %126 : vector<32x64xf32>
    %cst_43 = arith.constant 9.99999974E-6 : f32
    %128 = vector.broadcast %cst_43 : f32 to vector<32x1xf32>
    %129 = arith.addf %125, %128 : vector<32x1xf32>
    %130 = math.rsqrt %129 : vector<32x1xf32>
    %131 = vector.broadcast %130 : vector<32x1xf32> to vector<32x64xf32>
    %132 = arith.mulf %127, %131 : vector<32x64xf32>
    %133 = vector.broadcast %98 : vector<1x64xf32> to vector<32x64xf32>
    %134 = arith.mulf %132, %133 : vector<32x64xf32>
    %135 = vector.broadcast %99 : vector<1x64xf32> to vector<32x64xf32>
    %136 = arith.addf %134, %135 : vector<32x64xf32>
    %cst_44 = arith.constant 0.000000e+00 : f32
    %137 = vector.broadcast %cst_44 : f32 to vector<32x64xf32>
    %138 = arith.maximumf %136, %137 : vector<32x64xf32>
    %139 = arith.truncf %138 : vector<32x64xf32> to vector<32x64xbf16>
    %c1_45 = arith.constant 1 : index
    %c0_46 = arith.constant 0 : index
    %c0_47 = arith.constant 0 : index
    %140 = vector.load %arg7[%c1_45, %c0_46, %c0_47] : memref<4x64x64xbf16, #tpu.memory_space<vmem>>, vector<1x64x64xbf16>
    %141 = vector.shape_cast %140 : vector<1x64x64xbf16> to vector<64x64xbf16>
    %cst_48 = arith.constant dense<0.000000e+00> : vector<32x64xf32>
    %142 = tpu.matmul %139, %141, %cst_48 {dimension_numbers = #tpu.dot_dimension_numbers<[1], [0], [0], [1], [0, 0, 1, 1], [], []>} : vector<32x64xbf16>, vector<64x64xbf16>, vector<32x64xf32> -> vector<32x64xf32>
    %143 = vector.broadcast %100 : vector<1x64xf32> to vector<32x64xf32>
    %144 = arith.addf %142, %143 : vector<32x64xf32>
    %cst_49 = arith.constant dense<0.000000e+00> : vector<32xf32>
    %145 = vector.multi_reduction <add>, %144, %cst_49 [1] : vector<32x64xf32> to vector<32xf32>
    %146 = vector.shape_cast %145 : vector<32xf32> to vector<32x1xf32>
    %cst_50 = arith.constant 6.400000e+01 : f32
    %147 = vector.broadcast %cst_50 : f32 to vector<32x1xf32>
    %148 = arith.divf %146, %147 : vector<32x1xf32>
    %149 = arith.mulf %144, %144 : vector<32x64xf32>
    %cst_51 = arith.constant dense<0.000000e+00> : vector<32xf32>
    %150 = vector.multi_reduction <add>, %149, %cst_51 [1] : vector<32x64xf32> to vector<32xf32>
    %151 = vector.shape_cast %150 : vector<32xf32> to vector<32x1xf32>
    %cst_52 = arith.constant 6.400000e+01 : f32
    %152 = vector.broadcast %cst_52 : f32 to vector<32x1xf32>
    %153 = arith.divf %151, %152 : vector<32x1xf32>
    %154 = arith.mulf %148, %148 : vector<32x1xf32>
    %155 = arith.subf %153, %154 : vector<32x1xf32>
    %cst_53 = arith.constant 0.000000e+00 : f32
    %156 = vector.broadcast %cst_53 : f32 to vector<32x1xf32>
    %157 = arith.maximumf %155, %156 : vector<32x1xf32>
    %158 = vector.broadcast %148 : vector<32x1xf32> to vector<32x64xf32>
    %159 = arith.subf %144, %158 : vector<32x64xf32>
    %cst_54 = arith.constant 9.99999974E-6 : f32
    %160 = vector.broadcast %cst_54 : f32 to vector<32x1xf32>
    %161 = arith.addf %157, %160 : vector<32x1xf32>
    %162 = math.rsqrt %161 : vector<32x1xf32>
    %163 = vector.broadcast %162 : vector<32x1xf32> to vector<32x64xf32>
    %164 = arith.mulf %159, %163 : vector<32x64xf32>
    %165 = vector.broadcast %101 : vector<1x64xf32> to vector<32x64xf32>
    %166 = arith.mulf %164, %165 : vector<32x64xf32>
    %167 = vector.broadcast %102 : vector<1x64xf32> to vector<32x64xf32>
    %168 = arith.addf %166, %167 : vector<32x64xf32>
    %cst_55 = arith.constant 0.000000e+00 : f32
    %169 = vector.broadcast %cst_55 : f32 to vector<32x64xf32>
    %170 = arith.maximumf %168, %169 : vector<32x64xf32>
    %171 = arith.truncf %170 : vector<32x64xf32> to vector<32x64xbf16>
    %c1_56 = arith.constant 1 : index
    %c0_57 = arith.constant 0 : index
    %c0_58 = arith.constant 0 : index
    %172 = vector.load %arg8[%c1_56, %c0_57, %c0_58] : memref<4x64x8xbf16, #tpu.memory_space<vmem>>, vector<1x64x8xbf16>
    %173 = vector.shape_cast %172 : vector<1x64x8xbf16> to vector<64x8xbf16>
    %cst_59 = arith.constant dense<0.000000e+00> : vector<32x8xf32>
    %174 = tpu.matmul %171, %173, %cst_59 {dimension_numbers = #tpu.dot_dimension_numbers<[1], [0], [0], [1], [0, 0, 1, 1], [], []>} : vector<32x64xbf16>, vector<64x8xbf16>, vector<32x8xf32> -> vector<32x8xf32>
    %175 = vector.broadcast %96 : vector<1x8xf32> to vector<32x8xf32>
    %176 = arith.addf %174, %175 : vector<32x8xf32>
    %177 = arith.addf %93, %176 : vector<32x8xf32>
    %178 = vector.broadcast %95 : vector<1x8xf32> to vector<32x8xf32>
    %179 = arith.mulf %178, %177 : vector<32x8xf32>
    %180 = arith.addf %104, %179 : vector<32x8xf32>
    %181 = vector.extract_strided_slice %3 {offsets = [6, 0], sizes = [1, 8], strides = [1, 1]} : vector<12x8xf32> to vector<1x8xf32>
    %182 = vector.extract_strided_slice %3 {offsets = [7, 0], sizes = [1, 8], strides = [1, 1]} : vector<12x8xf32> to vector<1x8xf32>
    %183 = vector.extract_strided_slice %3 {offsets = [8, 0], sizes = [1, 8], strides = [1, 1]} : vector<12x8xf32> to vector<1x8xf32>
    %184 = vector.extract_strided_slice %4 {offsets = [12, 0], sizes = [1, 64], strides = [1, 1]} : vector<24x64xf32> to vector<1x64xf32>
    %185 = vector.extract_strided_slice %4 {offsets = [13, 0], sizes = [1, 64], strides = [1, 1]} : vector<24x64xf32> to vector<1x64xf32>
    %186 = vector.extract_strided_slice %4 {offsets = [14, 0], sizes = [1, 64], strides = [1, 1]} : vector<24x64xf32> to vector<1x64xf32>
    %187 = vector.extract_strided_slice %4 {offsets = [15, 0], sizes = [1, 64], strides = [1, 1]} : vector<24x64xf32> to vector<1x64xf32>
    %188 = vector.extract_strided_slice %4 {offsets = [16, 0], sizes = [1, 64], strides = [1, 1]} : vector<24x64xf32> to vector<1x64xf32>
    %189 = vector.extract_strided_slice %4 {offsets = [17, 0], sizes = [1, 64], strides = [1, 1]} : vector<24x64xf32> to vector<1x64xf32>
    %190 = vector.broadcast %181 : vector<1x8xf32> to vector<32x8xf32>
    %191 = arith.mulf %180, %190 : vector<32x8xf32>
    %192 = arith.truncf %191 : vector<32x8xf32> to vector<32x8xbf16>
    %c2 = arith.constant 2 : index
    %c0_60 = arith.constant 0 : index
    %c0_61 = arith.constant 0 : index
    %193 = vector.load %arg5[%c2, %c0_60, %c0_61] : memref<4x8x64xbf16, #tpu.memory_space<vmem>>, vector<1x8x64xbf16>
    %194 = vector.shape_cast %193 : vector<1x8x64xbf16> to vector<8x64xbf16>
    %cst_62 = arith.constant dense<0.000000e+00> : vector<32x64xf32>
    %195 = tpu.matmul %192, %194, %cst_62 {dimension_numbers = #tpu.dot_dimension_numbers<[1], [0], [0], [1], [0, 0, 1, 1], [], []>} : vector<32x8xbf16>, vector<8x64xbf16>, vector<32x64xf32> -> vector<32x64xf32>
    %196 = vector.extract_strided_slice %6 {offsets = [0, 128], sizes = [32, 64], strides = [1, 1]} : vector<32x256xf32> to vector<32x64xf32>
    %197 = arith.addf %195, %196 : vector<32x64xf32>
    %198 = vector.broadcast %184 : vector<1x64xf32> to vector<32x64xf32>
    %199 = arith.addf %197, %198 : vector<32x64xf32>
    %cst_63 = arith.constant dense<0.000000e+00> : vector<32xf32>
    %200 = vector.multi_reduction <add>, %199, %cst_63 [1] : vector<32x64xf32> to vector<32xf32>
    %201 = vector.shape_cast %200 : vector<32xf32> to vector<32x1xf32>
    %cst_64 = arith.constant 6.400000e+01 : f32
    %202 = vector.broadcast %cst_64 : f32 to vector<32x1xf32>
    %203 = arith.divf %201, %202 : vector<32x1xf32>
    %204 = arith.mulf %199, %199 : vector<32x64xf32>
    %cst_65 = arith.constant dense<0.000000e+00> : vector<32xf32>
    %205 = vector.multi_reduction <add>, %204, %cst_65 [1] : vector<32x64xf32> to vector<32xf32>
    %206 = vector.shape_cast %205 : vector<32xf32> to vector<32x1xf32>
    %cst_66 = arith.constant 6.400000e+01 : f32
    %207 = vector.broadcast %cst_66 : f32 to vector<32x1xf32>
    %208 = arith.divf %206, %207 : vector<32x1xf32>
    %209 = arith.mulf %203, %203 : vector<32x1xf32>
    %210 = arith.subf %208, %209 : vector<32x1xf32>
    %cst_67 = arith.constant 0.000000e+00 : f32
    %211 = vector.broadcast %cst_67 : f32 to vector<32x1xf32>
    %212 = arith.maximumf %210, %211 : vector<32x1xf32>
    %213 = vector.broadcast %203 : vector<32x1xf32> to vector<32x64xf32>
    %214 = arith.subf %199, %213 : vector<32x64xf32>
    %cst_68 = arith.constant 9.99999974E-6 : f32
    %215 = vector.broadcast %cst_68 : f32 to vector<32x1xf32>
    %216 = arith.addf %212, %215 : vector<32x1xf32>
    %217 = math.rsqrt %216 : vector<32x1xf32>
    %218 = vector.broadcast %217 : vector<32x1xf32> to vector<32x64xf32>
    %219 = arith.mulf %214, %218 : vector<32x64xf32>
    %220 = vector.broadcast %185 : vector<1x64xf32> to vector<32x64xf32>
    %221 = arith.mulf %219, %220 : vector<32x64xf32>
    %222 = vector.broadcast %186 : vector<1x64xf32> to vector<32x64xf32>
    %223 = arith.addf %221, %222 : vector<32x64xf32>
    %cst_69 = arith.constant 0.000000e+00 : f32
    %224 = vector.broadcast %cst_69 : f32 to vector<32x64xf32>
    %225 = arith.maximumf %223, %224 : vector<32x64xf32>
    %226 = arith.truncf %225 : vector<32x64xf32> to vector<32x64xbf16>
    %c2_70 = arith.constant 2 : index
    %c0_71 = arith.constant 0 : index
    %c0_72 = arith.constant 0 : index
    %227 = vector.load %arg7[%c2_70, %c0_71, %c0_72] : memref<4x64x64xbf16, #tpu.memory_space<vmem>>, vector<1x64x64xbf16>
    %228 = vector.shape_cast %227 : vector<1x64x64xbf16> to vector<64x64xbf16>
    %cst_73 = arith.constant dense<0.000000e+00> : vector<32x64xf32>
    %229 = tpu.matmul %226, %228, %cst_73 {dimension_numbers = #tpu.dot_dimension_numbers<[1], [0], [0], [1], [0, 0, 1, 1], [], []>} : vector<32x64xbf16>, vector<64x64xbf16>, vector<32x64xf32> -> vector<32x64xf32>
    %230 = vector.broadcast %187 : vector<1x64xf32> to vector<32x64xf32>
    %231 = arith.addf %229, %230 : vector<32x64xf32>
    %cst_74 = arith.constant dense<0.000000e+00> : vector<32xf32>
    %232 = vector.multi_reduction <add>, %231, %cst_74 [1] : vector<32x64xf32> to vector<32xf32>
    %233 = vector.shape_cast %232 : vector<32xf32> to vector<32x1xf32>
    %cst_75 = arith.constant 6.400000e+01 : f32
    %234 = vector.broadcast %cst_75 : f32 to vector<32x1xf32>
    %235 = arith.divf %233, %234 : vector<32x1xf32>
    %236 = arith.mulf %231, %231 : vector<32x64xf32>
    %cst_76 = arith.constant dense<0.000000e+00> : vector<32xf32>
    %237 = vector.multi_reduction <add>, %236, %cst_76 [1] : vector<32x64xf32> to vector<32xf32>
    %238 = vector.shape_cast %237 : vector<32xf32> to vector<32x1xf32>
    %cst_77 = arith.constant 6.400000e+01 : f32
    %239 = vector.broadcast %cst_77 : f32 to vector<32x1xf32>
    %240 = arith.divf %238, %239 : vector<32x1xf32>
    %241 = arith.mulf %235, %235 : vector<32x1xf32>
    %242 = arith.subf %240, %241 : vector<32x1xf32>
    %cst_78 = arith.constant 0.000000e+00 : f32
    %243 = vector.broadcast %cst_78 : f32 to vector<32x1xf32>
    %244 = arith.maximumf %242, %243 : vector<32x1xf32>
    %245 = vector.broadcast %235 : vector<32x1xf32> to vector<32x64xf32>
    %246 = arith.subf %231, %245 : vector<32x64xf32>
    %cst_79 = arith.constant 9.99999974E-6 : f32
    %247 = vector.broadcast %cst_79 : f32 to vector<32x1xf32>
    %248 = arith.addf %244, %247 : vector<32x1xf32>
    %249 = math.rsqrt %248 : vector<32x1xf32>
    %250 = vector.broadcast %249 : vector<32x1xf32> to vector<32x64xf32>
    %251 = arith.mulf %246, %250 : vector<32x64xf32>
    %252 = vector.broadcast %188 : vector<1x64xf32> to vector<32x64xf32>
    %253 = arith.mulf %251, %252 : vector<32x64xf32>
    %254 = vector.broadcast %189 : vector<1x64xf32> to vector<32x64xf32>
    %255 = arith.addf %253, %254 : vector<32x64xf32>
    %cst_80 = arith.constant 0.000000e+00 : f32
    %256 = vector.broadcast %cst_80 : f32 to vector<32x64xf32>
    %257 = arith.maximumf %255, %256 : vector<32x64xf32>
    %258 = arith.truncf %257 : vector<32x64xf32> to vector<32x64xbf16>
    %c2_81 = arith.constant 2 : index
    %c0_82 = arith.constant 0 : index
    %c0_83 = arith.constant 0 : index
    %259 = vector.load %arg8[%c2_81, %c0_82, %c0_83] : memref<4x64x8xbf16, #tpu.memory_space<vmem>>, vector<1x64x8xbf16>
    %260 = vector.shape_cast %259 : vector<1x64x8xbf16> to vector<64x8xbf16>
    %cst_84 = arith.constant dense<0.000000e+00> : vector<32x8xf32>
    %261 = tpu.matmul %258, %260, %cst_84 {dimension_numbers = #tpu.dot_dimension_numbers<[1], [0], [0], [1], [0, 0, 1, 1], [], []>} : vector<32x64xbf16>, vector<64x8xbf16>, vector<32x8xf32> -> vector<32x8xf32>
    %262 = vector.broadcast %183 : vector<1x8xf32> to vector<32x8xf32>
    %263 = arith.addf %261, %262 : vector<32x8xf32>
    %264 = arith.addf %180, %263 : vector<32x8xf32>
    %265 = vector.broadcast %182 : vector<1x8xf32> to vector<32x8xf32>
    %266 = arith.mulf %265, %264 : vector<32x8xf32>
    %267 = arith.addf %191, %266 : vector<32x8xf32>
    %268 = vector.extract_strided_slice %3 {offsets = [9, 0], sizes = [1, 8], strides = [1, 1]} : vector<12x8xf32> to vector<1x8xf32>
    %269 = vector.extract_strided_slice %3 {offsets = [10, 0], sizes = [1, 8], strides = [1, 1]} : vector<12x8xf32> to vector<1x8xf32>
    %270 = vector.extract_strided_slice %3 {offsets = [11, 0], sizes = [1, 8], strides = [1, 1]} : vector<12x8xf32> to vector<1x8xf32>
    %271 = vector.extract_strided_slice %4 {offsets = [18, 0], sizes = [1, 64], strides = [1, 1]} : vector<24x64xf32> to vector<1x64xf32>
    %272 = vector.extract_strided_slice %4 {offsets = [19, 0], sizes = [1, 64], strides = [1, 1]} : vector<24x64xf32> to vector<1x64xf32>
    %273 = vector.extract_strided_slice %4 {offsets = [20, 0], sizes = [1, 64], strides = [1, 1]} : vector<24x64xf32> to vector<1x64xf32>
    %274 = vector.extract_strided_slice %4 {offsets = [21, 0], sizes = [1, 64], strides = [1, 1]} : vector<24x64xf32> to vector<1x64xf32>
    %275 = vector.extract_strided_slice %4 {offsets = [22, 0], sizes = [1, 64], strides = [1, 1]} : vector<24x64xf32> to vector<1x64xf32>
    %276 = vector.extract_strided_slice %4 {offsets = [23, 0], sizes = [1, 64], strides = [1, 1]} : vector<24x64xf32> to vector<1x64xf32>
    %277 = vector.broadcast %268 : vector<1x8xf32> to vector<32x8xf32>
    %278 = arith.mulf %267, %277 : vector<32x8xf32>
    %279 = arith.truncf %278 : vector<32x8xf32> to vector<32x8xbf16>
    %c3 = arith.constant 3 : index
    %c0_85 = arith.constant 0 : index
    %c0_86 = arith.constant 0 : index
    %280 = vector.load %arg5[%c3, %c0_85, %c0_86] : memref<4x8x64xbf16, #tpu.memory_space<vmem>>, vector<1x8x64xbf16>
    %281 = vector.shape_cast %280 : vector<1x8x64xbf16> to vector<8x64xbf16>
    %cst_87 = arith.constant dense<0.000000e+00> : vector<32x64xf32>
    %282 = tpu.matmul %279, %281, %cst_87 {dimension_numbers = #tpu.dot_dimension_numbers<[1], [0], [0], [1], [0, 0, 1, 1], [], []>} : vector<32x8xbf16>, vector<8x64xbf16>, vector<32x64xf32> -> vector<32x64xf32>
    %283 = vector.extract_strided_slice %6 {offsets = [0, 192], sizes = [32, 64], strides = [1, 1]} : vector<32x256xf32> to vector<32x64xf32>
    %284 = arith.addf %282, %283 : vector<32x64xf32>
    %285 = vector.broadcast %271 : vector<1x64xf32> to vector<32x64xf32>
    %286 = arith.addf %284, %285 : vector<32x64xf32>
    %cst_88 = arith.constant dense<0.000000e+00> : vector<32xf32>
    %287 = vector.multi_reduction <add>, %286, %cst_88 [1] : vector<32x64xf32> to vector<32xf32>
    %288 = vector.shape_cast %287 : vector<32xf32> to vector<32x1xf32>
    %cst_89 = arith.constant 6.400000e+01 : f32
    %289 = vector.broadcast %cst_89 : f32 to vector<32x1xf32>
    %290 = arith.divf %288, %289 : vector<32x1xf32>
    %291 = arith.mulf %286, %286 : vector<32x64xf32>
    %cst_90 = arith.constant dense<0.000000e+00> : vector<32xf32>
    %292 = vector.multi_reduction <add>, %291, %cst_90 [1] : vector<32x64xf32> to vector<32xf32>
    %293 = vector.shape_cast %292 : vector<32xf32> to vector<32x1xf32>
    %cst_91 = arith.constant 6.400000e+01 : f32
    %294 = vector.broadcast %cst_91 : f32 to vector<32x1xf32>
    %295 = arith.divf %293, %294 : vector<32x1xf32>
    %296 = arith.mulf %290, %290 : vector<32x1xf32>
    %297 = arith.subf %295, %296 : vector<32x1xf32>
    %cst_92 = arith.constant 0.000000e+00 : f32
    %298 = vector.broadcast %cst_92 : f32 to vector<32x1xf32>
    %299 = arith.maximumf %297, %298 : vector<32x1xf32>
    %300 = vector.broadcast %290 : vector<32x1xf32> to vector<32x64xf32>
    %301 = arith.subf %286, %300 : vector<32x64xf32>
    %cst_93 = arith.constant 9.99999974E-6 : f32
    %302 = vector.broadcast %cst_93 : f32 to vector<32x1xf32>
    %303 = arith.addf %299, %302 : vector<32x1xf32>
    %304 = math.rsqrt %303 : vector<32x1xf32>
    %305 = vector.broadcast %304 : vector<32x1xf32> to vector<32x64xf32>
    %306 = arith.mulf %301, %305 : vector<32x64xf32>
    %307 = vector.broadcast %272 : vector<1x64xf32> to vector<32x64xf32>
    %308 = arith.mulf %306, %307 : vector<32x64xf32>
    %309 = vector.broadcast %273 : vector<1x64xf32> to vector<32x64xf32>
    %310 = arith.addf %308, %309 : vector<32x64xf32>
    %cst_94 = arith.constant 0.000000e+00 : f32
    %311 = vector.broadcast %cst_94 : f32 to vector<32x64xf32>
    %312 = arith.maximumf %310, %311 : vector<32x64xf32>
    %313 = arith.truncf %312 : vector<32x64xf32> to vector<32x64xbf16>
    %c3_95 = arith.constant 3 : index
    %c0_96 = arith.constant 0 : index
    %c0_97 = arith.constant 0 : index
    %314 = vector.load %arg7[%c3_95, %c0_96, %c0_97] : memref<4x64x64xbf16, #tpu.memory_space<vmem>>, vector<1x64x64xbf16>
    %315 = vector.shape_cast %314 : vector<1x64x64xbf16> to vector<64x64xbf16>
    %cst_98 = arith.constant dense<0.000000e+00> : vector<32x64xf32>
    %316 = tpu.matmul %313, %315, %cst_98 {dimension_numbers = #tpu.dot_dimension_numbers<[1], [0], [0], [1], [0, 0, 1, 1], [], []>} : vector<32x64xbf16>, vector<64x64xbf16>, vector<32x64xf32> -> vector<32x64xf32>
    %317 = vector.broadcast %274 : vector<1x64xf32> to vector<32x64xf32>
    %318 = arith.addf %316, %317 : vector<32x64xf32>
    %cst_99 = arith.constant dense<0.000000e+00> : vector<32xf32>
    %319 = vector.multi_reduction <add>, %318, %cst_99 [1] : vector<32x64xf32> to vector<32xf32>
    %320 = vector.shape_cast %319 : vector<32xf32> to vector<32x1xf32>
    %cst_100 = arith.constant 6.400000e+01 : f32
    %321 = vector.broadcast %cst_100 : f32 to vector<32x1xf32>
    %322 = arith.divf %320, %321 : vector<32x1xf32>
    %323 = arith.mulf %318, %318 : vector<32x64xf32>
    %cst_101 = arith.constant dense<0.000000e+00> : vector<32xf32>
    %324 = vector.multi_reduction <add>, %323, %cst_101 [1] : vector<32x64xf32> to vector<32xf32>
    %325 = vector.shape_cast %324 : vector<32xf32> to vector<32x1xf32>
    %cst_102 = arith.constant 6.400000e+01 : f32
    %326 = vector.broadcast %cst_102 : f32 to vector<32x1xf32>
    %327 = arith.divf %325, %326 : vector<32x1xf32>
    %328 = arith.mulf %322, %322 : vector<32x1xf32>
    %329 = arith.subf %327, %328 : vector<32x1xf32>
    %cst_103 = arith.constant 0.000000e+00 : f32
    %330 = vector.broadcast %cst_103 : f32 to vector<32x1xf32>
    %331 = arith.maximumf %329, %330 : vector<32x1xf32>
    %332 = vector.broadcast %322 : vector<32x1xf32> to vector<32x64xf32>
    %333 = arith.subf %318, %332 : vector<32x64xf32>
    %cst_104 = arith.constant 9.99999974E-6 : f32
    %334 = vector.broadcast %cst_104 : f32 to vector<32x1xf32>
    %335 = arith.addf %331, %334 : vector<32x1xf32>
    %336 = math.rsqrt %335 : vector<32x1xf32>
    %337 = vector.broadcast %336 : vector<32x1xf32> to vector<32x64xf32>
    %338 = arith.mulf %333, %337 : vector<32x64xf32>
    %339 = vector.broadcast %275 : vector<1x64xf32> to vector<32x64xf32>
    %340 = arith.mulf %338, %339 : vector<32x64xf32>
    %341 = vector.broadcast %276 : vector<1x64xf32> to vector<32x64xf32>
    %342 = arith.addf %340, %341 : vector<32x64xf32>
    %cst_105 = arith.constant 0.000000e+00 : f32
    %343 = vector.broadcast %cst_105 : f32 to vector<32x64xf32>
    %344 = arith.maximumf %342, %343 : vector<32x64xf32>
    %345 = arith.truncf %344 : vector<32x64xf32> to vector<32x64xbf16>
    %c3_106 = arith.constant 3 : index
    %c0_107 = arith.constant 0 : index
    %c0_108 = arith.constant 0 : index
    %346 = vector.load %arg8[%c3_106, %c0_107, %c0_108] : memref<4x64x8xbf16, #tpu.memory_space<vmem>>, vector<1x64x8xbf16>
    %347 = vector.shape_cast %346 : vector<1x64x8xbf16> to vector<64x8xbf16>
    %cst_109 = arith.constant dense<0.000000e+00> : vector<32x8xf32>
    %348 = tpu.matmul %345, %347, %cst_109 {dimension_numbers = #tpu.dot_dimension_numbers<[1], [0], [0], [1], [0, 0, 1, 1], [], []>} : vector<32x64xbf16>, vector<64x8xbf16>, vector<32x8xf32> -> vector<32x8xf32>
    %349 = vector.broadcast %270 : vector<1x8xf32> to vector<32x8xf32>
    %350 = arith.addf %348, %349 : vector<32x8xf32>
    %351 = arith.addf %267, %350 : vector<32x8xf32>
    %352 = vector.broadcast %269 : vector<1x8xf32> to vector<32x8xf32>
    %353 = arith.mulf %352, %351 : vector<32x8xf32>
    %354 = arith.addf %278, %353 : vector<32x8xf32>
    %c0_110 = arith.constant 0 : index
    %c0_111 = arith.constant 0 : index
    %355 = vector.load %arg11[%c0_110, %c0_111] : memref<4x256xf32, #tpu.memory_space<vmem>>, vector<4x256xf32>
    %356 = vector.extract_strided_slice %355 {offsets = [0, 0], sizes = [1, 256], strides = [1, 1]} : vector<4x256xf32> to vector<1x256xf32>
    %357 = vector.extract_strided_slice %355 {offsets = [1, 0], sizes = [1, 256], strides = [1, 1]} : vector<4x256xf32> to vector<1x256xf32>
    %358 = vector.extract_strided_slice %355 {offsets = [2, 0], sizes = [1, 256], strides = [1, 1]} : vector<4x256xf32> to vector<1x256xf32>
    %359 = vector.extract_strided_slice %355 {offsets = [3, 0], sizes = [1, 1], strides = [1, 1]} : vector<4x256xf32> to vector<1x1xf32>
    %c0_112 = arith.constant 0 : index
    %c0_113 = arith.constant 0 : index
    %360 = vector.load %arg9[%c0_112, %c0_113] : memref<16x256xbf16, #tpu.memory_space<vmem>>, vector<16x256xbf16>
    %cst_114 = arith.constant dense<0.000000e+00> : vector<32x256xf32>
    %361 = tpu.matmul %1, %360, %cst_114 {dimension_numbers = #tpu.dot_dimension_numbers<[1], [0], [0], [1], [0, 0, 1, 1], [], []>} : vector<32x16xbf16>, vector<16x256xbf16>, vector<32x256xf32> -> vector<32x256xf32>
    %362 = vector.broadcast %356 : vector<1x256xf32> to vector<32x256xf32>
    %363 = arith.addf %361, %362 : vector<32x256xf32>
    %cst_115 = arith.constant 0.000000e+00 : f32
    %364 = vector.broadcast %cst_115 : f32 to vector<32x256xf32>
    %365 = arith.maximumf %363, %364 : vector<32x256xf32>
    %366 = arith.truncf %365 : vector<32x256xf32> to vector<32x256xbf16>
    %c0_116 = arith.constant 0 : index
    %c0_117 = arith.constant 0 : index
    %367 = vector.load %arg10[%c0_116, %c0_117] : memref<256x256xbf16, #tpu.memory_space<vmem>>, vector<256x256xbf16>
    %cst_118 = arith.constant dense<0.000000e+00> : vector<32x256xf32>
    %368 = tpu.matmul %366, %367, %cst_118 {dimension_numbers = #tpu.dot_dimension_numbers<[1], [0], [0], [1], [0, 0, 1, 1], [], []>} : vector<32x256xbf16>, vector<256x256xbf16>, vector<32x256xf32> -> vector<32x256xf32>
    %369 = vector.broadcast %357 : vector<1x256xf32> to vector<32x256xf32>
    %370 = arith.addf %368, %369 : vector<32x256xf32>
    %cst_119 = arith.constant 0.000000e+00 : f32
    %371 = vector.broadcast %cst_119 : f32 to vector<32x256xf32>
    %372 = arith.maximumf %370, %371 : vector<32x256xf32>
    %373 = vector.broadcast %358 : vector<1x256xf32> to vector<32x256xf32>
    %374 = arith.mulf %372, %373 : vector<32x256xf32>
    %cst_120 = arith.constant dense<0.000000e+00> : vector<32xf32>
    %375 = vector.multi_reduction <add>, %374, %cst_120 [1] : vector<32x256xf32> to vector<32xf32>
    %376 = vector.shape_cast %375 : vector<32xf32> to vector<32x1xf32>
    %377 = vector.broadcast %359 : vector<1x1xf32> to vector<32x1xf32>
    %378 = arith.addf %376, %377 : vector<32x1xf32>
    %379 = math.tanh %354 : vector<32x8xf32>
    %380 = arith.mulf %379, %379 : vector<32x8xf32>
    %cst_121 = arith.constant 1.000000e+00 : f32
    %381 = vector.broadcast %cst_121 : f32 to vector<32x8xf32>
    %382 = arith.subf %381, %380 : vector<32x8xf32>
    %cst_122 = arith.constant 9.99999997E-7 : f32
    %383 = vector.broadcast %cst_122 : f32 to vector<32x8xf32>
    %384 = arith.addf %382, %383 : vector<32x8xf32>
    %385 = math.log %384 : vector<32x8xf32>
    %cst_123 = arith.constant dense<0.000000e+00> : vector<32xf32>
    %386 = vector.multi_reduction <add>, %385, %cst_123 [1] : vector<32x8xf32> to vector<32xf32>
    %387 = vector.shape_cast %386 : vector<32xf32> to vector<32x1xf32>
    %cst_124 = arith.constant 0.000000e+00 : f32
    %388 = vector.broadcast %cst_124 : f32 to vector<32x1xf32>
    %389 = arith.subf %388, %378 : vector<32x1xf32>
    %390 = arith.subf %389, %387 : vector<32x1xf32>
    %cst_125 = arith.constant 0.000000e+00 : f32
    %391 = vector.broadcast %cst_125 : f32 to vector<32x120xf32>
    %392 = tpu.concatenate %379, %391 in 1 : vector<32x8xf32>, vector<32x120xf32> -> vector<32x128xf32>
    %393 = tpu.iota {dimensions = array<i32: 1>} : vector<32x128xi32>
    %c8_i32 = arith.constant 8 : i32
    %394 = vector.broadcast %c8_i32 : i32 to vector<32x128xi32>
    %395 = arith.cmpi eq, %393, %394 : vector<32x128xi32>
    %396 = vector.shape_cast %390 : vector<32x1xf32> to vector<32x1xf32>
    %397 = vector.broadcast %396 : vector<32x1xf32> to vector<32x128xf32>
    %398 = arith.select %395, %397, %392 : vector<32x128xi1>, vector<32x128xf32>
    %c0_126 = arith.constant 0 : index
    %c0_127 = arith.constant 0 : index
    %399 = vector.load %arg12[%c0_126, %c0_127] : memref<32x128xf32, #tpu.memory_space<vmem>>, vector<32x128xf32>
    tpu.vector_store %arg12[%c0_126, %c0_127], %398 {strides = array<i32>} : memref<32x128xf32, #tpu.memory_space<vmem>>, vector<32x128xf32>,
    return
  }
  func.func @transform_0(%arg0: i32) -> (i32, i32) {
    %c0_i32 = arith.constant 0 : i32
    %c0_i32_0 = arith.constant 0 : i32
    return %arg0, %c0_i32 : i32, i32
  }
  func.func @transform_1(%arg0: i32) -> (i32, i32) {
    %c0_i32 = arith.constant 0 : i32
    %c0_i32_0 = arith.constant 0 : i32
    return %arg0, %c0_i32 : i32, i32
  }
  func.func @transform_2(%arg0: i32) -> (i32, i32) {
    %c0_i32 = arith.constant 0 : i32
    %c0_i32_0 = arith.constant 0 : i32
    %c0_i32_1 = arith.constant 0 : i32
    return %c0_i32, %c0_i32_0 : i32, i32
  }
  func.func @transform_3(%arg0: i32) -> (i32, i32) {
    %c0_i32 = arith.constant 0 : i32
    %c0_i32_0 = arith.constant 0 : i32
    %c0_i32_1 = arith.constant 0 : i32
    return %c0_i32, %c0_i32_0 : i32, i32
  }
  func.func @transform_4(%arg0: i32) -> (i32, i32, i32) {
    %c0_i32 = arith.constant 0 : i32
    %c0_i32_0 = arith.constant 0 : i32
    %c0_i32_1 = arith.constant 0 : i32
    %c0_i32_2 = arith.constant 0 : i32
    return %c0_i32, %c0_i32_0, %c0_i32_1 : i32, i32, i32
  }
  func.func @transform_5(%arg0: i32) -> (i32, i32) {
    %c0_i32 = arith.constant 0 : i32
    %c0_i32_0 = arith.constant 0 : i32
    %c0_i32_1 = arith.constant 0 : i32
    return %c0_i32, %c0_i32_0 : i32, i32
  }
  func.func @transform_6(%arg0: i32) -> (i32, i32, i32) {
    %c0_i32 = arith.constant 0 : i32
    %c0_i32_0 = arith.constant 0 : i32
    %c0_i32_1 = arith.constant 0 : i32
    %c0_i32_2 = arith.constant 0 : i32
    return %c0_i32, %c0_i32_0, %c0_i32_1 : i32, i32, i32
  }
  func.func @transform_7(%arg0: i32) -> (i32, i32, i32) {
    %c0_i32 = arith.constant 0 : i32
    %c0_i32_0 = arith.constant 0 : i32
    %c0_i32_1 = arith.constant 0 : i32
    %c0_i32_2 = arith.constant 0 : i32
    return %c0_i32, %c0_i32_0, %c0_i32_1 : i32, i32, i32
  }
  func.func @transform_8(%arg0: i32) -> (i32, i32) {
    %c0_i32 = arith.constant 0 : i32
    %c0_i32_0 = arith.constant 0 : i32
    %c0_i32_1 = arith.constant 0 : i32
    return %c0_i32, %c0_i32_0 : i32, i32
  }
  func.func @transform_9(%arg0: i32) -> (i32, i32) {
    %c0_i32 = arith.constant 0 : i32
    %c0_i32_0 = arith.constant 0 : i32
    %c0_i32_1 = arith.constant 0 : i32
    return %c0_i32, %c0_i32_0 : i32, i32
  }
  func.func @transform_10(%arg0: i32) -> (i32, i32) {
    %c0_i32 = arith.constant 0 : i32
    %c0_i32_0 = arith.constant 0 : i32
    %c0_i32_1 = arith.constant 0 : i32
    return %c0_i32, %c0_i32_0 : i32, i32
  }
  func.func @transform_11(%arg0: i32) -> (i32, i32) {
    %c0_i32 = arith.constant 0 : i32
    %c0_i32_0 = arith.constant 0 : i32
    return %arg0, %c0_i32 : i32, i32
  }
}

</mosaic_0001>

<bundles_post_ra>
// kernel: tpu_custom_call.1
= control target key start
LH: loop header
LB: loop body
LE: loop exit
PB: predicated region body
PF: predicated region fallthrough
CT: control target
= control target key end

     0   :  { %s4617_s0 = inlined_call_operand.vmem [shape: f32[64,16], index: 0, kind: input, shape index: {}]   ;;  %s4618_s1 = inlined_call_operand.vmem [shape: f32[64,8], index: 1, kind: input, shape index: {}]   ;;  %s4619_s2 = inlined_call_operand.vmem [shape: f32[12,8], index: 2, kind: input, shape index: {}]   ;;  %s4620_s3 = inlined_call_operand.vmem [shape: f32[24,64], index: 3, kind: input, shape index: {}]   ;;  %s4621_s4 = inlined_call_operand.vmem [shape: bf16[4,8,64], index: 4, kind: input, shape index: {}]   ;;  %s4622_s5 = inlined_call_operand.vmem [shape: bf16[16,256], index: 5, kind: input, shape index: {}]   ;;  %s4623_s6 = inlined_call_operand.hbm [shape: bf16[4,64,64], index: 6, kind: input, shape index: {}]   ;;  %s4624_s7 = inlined_call_operand.vmem [shape: bf16[4,64,8], index: 7, kind: input, shape index: {}]   ;;  %s4625_s8 = inlined_call_operand.vmem [shape: bf16[16,256], index: 8, kind: input, shape index: {}]   ;;  %s4626_s9 = inlined_call_operand.vmem [shape: bf16[256,256], index: 9, kind: input, shape index: {}]   ;;  %s4627_s10 = inlined_call_operand.vmem [shape: f32[4,256], index: 10, kind: input, shape index: {}]   ;;  %s4628_s11 = inlined_call_operand.hbm [shape: f32[64,128], index: 11, kind: output, shape index: {}]  }
   0x1   :  { %4630 = sst [smem:[#allocation10_spill]] %s4623_s6 }
   0x2   :  { %16 = vsyncpa [#allocation3], 0 }
   0x3   :  { %17 = vsyncpa [#allocation4], 0 }
   0x4   :  { %19 = vsyncpa [#allocation4 + $0x1], 0  ;;  %s3648_s17 = smov 0   ;;  %s3650_s18 = smov 0  }
   0x5   :  { %s3652_s19 = smov 0   ;;  %s3654_s20 = smov 0  }
   0x6 LB: > { %4631 = sst [smem:[#allocation8_spill]] %s3574_s19  ;;  %s3669_s21 = sadd.s32 4294967295, %s3578_s20   ;;  %s3578_s20 = sphi %s3654_s20, %s4642_s20   ;;  %s3574_s19 = sphi %s3652_s19, %s4639_s19   ;;  %s3570_s18 = sphi %s3650_s18, %s4641_s18   ;;  %s3566_s17 = sphi %s3648_s17, %s4640_s17  }
   0x7   : > { %s2939_s22 = sadd.s32 4294967294, %s3578_s20   ;;  %s3673_s23 = sadd.s32 1, %s3578_s20  }
   0x8   : > { %s273_s24 = sadd.s32 1, %s3574_s19  ;;  %s270_s25 = ssub.s32 %s3578_s20, %s3673_s23 }
   0x9   : > { %p283_p0 = scmp.ne.s32.totalorder %s3574_s19, %s3570_s18  ;;  %p271_p1 = scmp.eq.s32.totalorder %s270_s25, 0 }
   0xa   : > { %p284_p2 = scmp.eq.s32.totalorder %s3669_s21, 1  ;;  %p289_p3 = scmp.ne.s32.totalorder %s3570_s18, %s3566_s17 }
   0xb   : > { %p290_p4 = scmp.eq.s32.totalorder %s2939_s22, 1  ;;  %p2940_p7 = scmp.ge.s32.totalorder %s3578_s20, 1 }
   0xc   : > { %s3684_s26 = scalar_select %p271_p1, %s3574_s19, %s273_s24  }
   0xd   : > { %p3686_p5 = por %p284_p2, %p283_p0  ;;  %p3690_p6 = por %p290_p4, %p289_p3 }
   0xe   : > { %4632 = sst [smem:[#allocation9_spill]] %s3684_s26  ;;  %p297_p8 = scmp.lt.s32.totalorder %s3578_s20, 3 }
   0xf   : > { %s4634_s28 = scalar_select %p3690_p6, 1, 0 }
  0x10   : > { %p3277_p9 = scmp.eq.s32.totalorder %s3669_s21, 0  ;;  %p3697_p10 = pnand %p2940_p7, %p297_p8 }
  0x11   : > { %s3580_s30 = smov [#allocation2]  }
  0x12   : > { %s321_s12 = sshll.u32 %s3580_s30, 4  ;;  %p3269_p11 = pneg %p3697_p10  ;;  %s322_s12 = int_to_ptr.vmem [resolvable:$true] %s321_s12 }
  0x13   : > { %s3499_s13 = scalar_lea.vmem %s322_s12, 2048  ;;  %p3507_p3 = scmp.lt.s32.totalorder %s322_s12, %s322_s12 }
  0x14   : > { %p3270_p12 = pnand %p3277_p9, %p3269_p11  ;;  %p3500_p0 = scmp.ne.s32.totalorder %s322_s12, %s3499_s13 }
  0x15   : > { %p3508_p4 = scmp.lt.s32.totalorder %s3499_s13, %s3499_s13 }
  0x16   : > { %p3490_p13 = pneg %p3270_p12 }
  0x17   : > { %p3509_p6 = por %p3508_p4, %p3507_p3 }
  0x18   : > { %p3502_p1 = pnand %p3500_p0, %p3490_p13 }
  0x1a   : > { %p3503_p2 = pneg %p3502_p1 }
  0x1c   : > { %p3510_p7 = pnand %p3509_p6, %p3503_p2 }
  0x1e   : > { %3513 = shalt.err (!%p3510_p7)
}
  0x1f   : > { %s3581_s14 = smov 64   ;;  %s3582_s15 = smov 4  }
  0x20   : > { %s4636_s6 = sld [smem:[#allocation10_spill]] }
  0x22   : > { %367 = sbr.rel (%p3697_p10) target bundleno = 4315 (0x10db), region = 64 }
  0x26   : > { %3272 = dma.hbm_to_vmem [thread:$0]  (!%p3270_p12), %s4636_s6, 2048, %s322_s12, [#allocation3], %s3581_s14, %s3581_s14, %s3582_s15  }
  0x27   : > { %3557 = dma.done.wait (%p3277_p9), [#allocation3], 2048  }
  0x28   : > { %3559 = vsyncadd (%p3277_p9), [#allocation3], 4294965248  ;;  %s2946_s24 = sshll.u32 %s3669_s21, 2  ;;  %v513_v0 = vlaneseq  ;;  %v3583_v1 = vmov 0   ;;  %vm531_vm0 = vcmask 1043456   ;;  %vm453_vm1 = vcmask 130048  }
  0x29   : > { %492 = vmatprep.mubr.bf16.mxu0 %v3583_v1  ;;  %p413_p6 = scmp.lt.s32.totalorder %s2946_s24, 7  ;;  %3319 = vset.pattern.permute.xlu0 %v3583_v1  ;;  %v3321_v3 = vld [vmem:[%s4622_s5 + $0x4] ss:$8 sps:$4 sm:$0xff]   ;;  %v3323_v5 = vld [vmem:[%s4622_s5] ss:$8 sps:$4 sm:$0xff]   ;;  %vm524_vm2 = vcmask 64512  }
  0x2a   : > { %3320 = vset.pattern.permute.xlu1 %v3583_v1  ;;  %v3719_v2 = vshrl.u32 %v513_v0, 7  ;;  %v523_v6 = vld [vmem:[%s4621_s4] sm:$0xf]  ;;  %474 = vmatprep.subr.bf16.mxu0 %v3321_v3  ;;  %vm592_vm3 = vcmask 523264   ;;  %v3324_v59 = vld [vmem:[#allocation2 + $0x18] sm:$0xff]   ;;  %v3325_v60 = vld [vmem:[#allocation2 + $0x10] sm:$0xff]  }
  0x2b   : > { %s4644_s24 = smov (!%p413_p6, %s2946_s24), 7  ;;  %3259 = vmatprep.subr.msk.bf16.mxu1 %vm531_vm0, %v523_v6  ;;  %v533_v8 = vsel %vm531_vm0, %v523_v6, 0  ;;  %475 = vmatpush1.bf16.msra.mxu0 %v3323_v5  ;;  %v3750_v13 = vld [vmem:[%s4619_s2] sm:$0xff]  ;;  %v3326_v61 = vld [vmem:[#allocation2 + $0x8] sm:$0xff]   ;;  %s3584_s29 = smov 64  }
  0x2c   : > { %s2947_s25 = sshll.u32 %s4644_s24, 3  ;;  %v3731_v4 = vsub.s32 0, %v3719_v2  ;;  %3140 = vmatpush3.bf16.msra.mxu1 %v533_v8  ;;  %v3790_v28 = vld [vmem:[%s4620_s3] sm:$0xff]  ;;  %3145 = vmatprep.subr.bf16.mxu0 %v3324_v59  ;;  %s3078_s16 = sshll.u32 %s3669_s21, 9 }
  0x2d   : > { %s416_s12 = scalar_lea.vmem %s4617_s0, %s2947_s25  ;;  %s422_s15 = scalar_lea.vmem %s4618_s1, %s2947_s25  ;;  %v3327_v62 = vld [vmem:[#allocation2] sm:$0xff]  }
  0x2e   : > { %v426_v7 = vld [vmem:[%s416_s12] sm:$0xff]  ;;  %v427_v9 = vld [vmem:[%s416_s12 + $0x8] sm:$0xff]  ;;  %v3752_v14 = vld [vmem:[%s422_s15 + $0x10] sm:$0xff]  ;;  %v516_v16 = vrot.slane %v3750_v13, %v3731_v4  ;;  %v587_v31 = vrot.slane %v3790_v28, %v3731_v4  ;;  %s3585_s26 = smov [#allocation5]  }
  0x2f   : > { %v3741_v10 = vld [vmem:[%s422_s15] sm:$0xff]  ;;  %v3743_v11 = vld [vmem:[%s422_s15 + $0x8] sm:$0xff]  ;;  %v3745_v12 = vpack.c.bf16 %v427_v9, %v426_v7  ;;  %v3754_v15 = vld [vmem:[%s422_s15 + $0x18] sm:$0xff]  ;;  %s3518_s19 = sshll.u32 %s3585_s26, 4  ;;  %s3519_s19 = int_to_ptr.vmem [resolvable:$false] %s3518_s19 }
  0x30   : > { %v428_v17 = vld [vmem:[%s416_s12 + $0x10] sm:$0xff]  ;;  %v429_v18 = vld [vmem:[%s416_s12 + $0x18] sm:$0xff]  ;;  %v3761_v19 = vmul.f32 %v516_v16, %v3741_v10  ;;  %v3764_v20 = vmul.f32 %v516_v16, %v3743_v11  ;;  %v3767_v21 = vmul.f32 %v516_v16, %v3752_v14  ;;  %v3770_v22 = vmul.f32 %v516_v16, %v3754_v15  ;;  %s409_s12 = sand.u32 1, %s3570_s18   ;;  %s3520_s25 = scalar_lea.vmem %s3519_s19, 1024 }
  0x31   : > { %2952 = vmatmul.mubr.msk.bf16.vlgmr.msra.gmra.mxu0 %vm453_vm1, %v3745_v12  ;;  %v3778_v25 = vpack.c.bf16 %v429_v18, %v428_v17  ;;  %s2945_s13 = sshll.u32 %s409_s12, 5  ;;  %s4577_s6 = scalar_lea.sflag [#allocation4], %s409_s12 }
  0x32   : > { %502 = vmatprep.mubr.bf16.mxu0 %v3583_v1  ;;  %v521_v23 = vpack.c.bf16 %v3764_v20, %v3761_v19  ;;  %v522_v24 = vpack.c.bf16 %v3770_v22, %v3767_v21  ;;  %3146 = vmatpush3.bf16.msra.mxu0 %v3324_v59  ;;  %s411_s14 = scalar_lea.vmem [#allocation5], %s2945_s13 }
  0x33   : > { %3147 = vmatprep.subr.bf16.mxu0 %v3325_v60  ;;  %s2853_s15 = sshll.u32 %s411_s14, 4  ;;  %s4567_s15 = int_to_ptr.vmem [resolvable:$true] %s2853_s15 }
  0x34   : > { %3141 = vmatprep.mubr.msk.bf16.mxu1 %vm524_vm2, %v521_v23  ;;  %s3514_s21 = scalar_lea.vmem %s4567_s15, 512  ;;  %p3521_p11 = scmp.lt.s32.totalorder %s4567_s15, %s3519_s19 }
  0x35   : > { %3142 = vmatmul.mubr.msk.bf16.vlgmr.msra.gmra.mxu1 %vm524_vm2, %v522_v24  ;;  %p3515_p8 = scmp.ne.s32.totalorder %s4567_s15, %s3514_s21  ;;  %p3522_p12 = scmp.lt.s32.totalorder %s3520_s25, %s3514_s21 }
  0x36   : > { %3148 = vmatpush3.bf16.msra.mxu0 %v3325_v60 }
  0x37   : > { %3149 = vmatprep.subr.bf16.mxu0 %v3326_v61  ;;  %p3516_p9 = pnand %p3515_p8, %p3686_p5  ;;  %p3523_p13 = por %p3522_p12, %p3521_p11 }
  0x39   : > { %2953 = vmatmul.mubr.msk.bf16.gmra.mxu0 %vm453_vm1, %v3778_v25  ;;  %p3517_p10 = pneg %p3516_p9 }
  0x3a   : > { %3150 = vmatpush3.bf16.msra.mxu0 %v3326_v61 }
  0x3b   : > { %3151 = vmatprep.subr.bf16.mxu0 %v3327_v62  ;;  %p3524_p0 = pnand %p3523_p13, %p3517_p10 }
  0x3e   : > { %3152 = vmatpush3.bf16.msra.mxu0 %v3327_v62 }
  0xf1   : > { %v3783_v26 = vpop.f32.mrf.mxu0 }
  0xf3   : > { %v3785_v27 = vpop.f32.mrf.mxu0 }
  0xf5   : > { %v3792_v29 = vpop.f32.mrf.mxu0  ;;  %v3143_v30 = vpop.f32.mrf.mxu1 }
  0xf7   : > { %v3796_v32 = vpop.f32.mrf.mxu0  ;;  %v569_v33 = vpop.f32.mrf.mxu1 }
  0xf8   : > { %v570_v34 = vadd.f32 %v569_v33, %v3783_v26 }
  0xf9   : > { %v3799_v35 = vpop.f32.mrf.mxu0  ;;  %v3144_v36 = vpop.f32.mrf.mxu1 }
  0xfa   : > { %v578_v37 = vadd.f32 %v3143_v30, %v3799_v35  ;;  %v3802_v38 = vadd.f32 %v587_v31, %v570_v34 }
  0xfb   : > { %v3804_v39 = vpop.f32.mrf.mxu0  ;;  %v572_v40 = vpop.f32.mrf.mxu1 }
  0xfc   : > { %v3806_v41 = vadd.f32 %v587_v31, %v578_v37  ;;  %v573_v42 = vadd.f32 %v572_v40, %v3792_v29  ;;  %v593_v43 = vsel %vm592_vm3, %v3802_v38, 0.0  ;;  %v610_v45 = vmul.f32 %v3802_v38, %v3802_v38 }
  0xfd   : > { %v3811_v44 = vpop.f32.mrf.mxu0  ;;  %594 = vadd.xlane.f32.xlu0 %v593_v43 }
  0xfe   : > { %v599_v46 = vsel %vm592_vm3, %v3806_v41, 0.0  ;;  %v3817_v47 = vadd.f32 %v587_v31, %v573_v42  ;;  %v581_v48 = vadd.f32 %v3144_v36, %v3811_v44  ;;  %v614_v49 = vsel %vm592_vm3, %v610_v45, 0.0 }
  0xff   : > { %600 = vadd.xlane.f32.xlu1 %v599_v46  ;;  %v612_v54 = vmul.f32 %v3806_v41, %v3806_v41 }
 0x100   : > { %v611_v50 = vmul.f32 %v3817_v47, %v3817_v47  ;;  %v3823_v51 = vadd.f32 %v587_v31, %v581_v48  ;;  %v596_v53 = vsel %vm592_vm3, %v3817_v47, 0.0 }
 0x101   : > { %615 = vadd.xlane.f32.xlu0 %v614_v49  ;;  %v620_v57 = vsel %vm592_vm3, %v612_v54, 0.0 }
 0x102   : > { %v617_v52 = vsel %vm592_vm3, %v611_v50, 0.0  ;;  %v602_v55 = vsel %vm592_vm3, %v3823_v51, 0.0  ;;  %v613_v56 = vmul.f32 %v3823_v51, %v3823_v51 }
 0x103   : > { %618 = vadd.xlane.f32.xlu1 %v617_v52 }
 0x104   : > { %v623_v58 = vsel %vm592_vm3, %v613_v56, 0.0 }
 0x105   : > { %597 = vadd.xlane.f32.xlu0 %v596_v53 }
 0x107   : > { %603 = vadd.xlane.f32.xlu1 %v602_v55 }
 0x109   : > { %621 = vadd.xlane.f32.xlu0 %v620_v57 }
 0x10b   : > { %624 = vadd.xlane.f32.xlu1 %v623_v58  ;;  %v3837_v58 = vsub.s32 1, %v3719_v2 }
 0x10d   : > { %v661_v61 = vrot.slane %v3790_v28, %v3837_v58 }
 0x186   : > { %v595_v63 = vpop.xlane.xlu0 %594 }
 0x187   : > { %v606_v3 = vmul.f32 0.015625, %v595_v63  ;;  %v3843_v63 = vsub.s32 2, %v3719_v2 }
 0x188   : > { %v601_v5 = vpop.xlane.xlu1 %600 }
 0x189   : > { %v630_v7 = vmul.f32 %v606_v3, %v606_v3  ;;  %v608_v23 = vmul.f32 0.015625, %v601_v5  ;;  %v642_v59 = vsub.f32 %v3802_v38, %v606_v3 }
 0x18a   : > { %v616_v6 = vpop.xlane.xlu0 %615 }
 0x18b   : > { %v626_v8 = vmul.f32 0.015625, %v616_v6  ;;  %v632_v40 = vmul.f32 %v608_v23, %v608_v23 }
 0x18c   : > { %v619_v9 = vpop.xlane.xlu1 %618 }
 0x18d   : > { %v634_v16 = vsub.f32 %v626_v8, %v630_v7  ;;  %v627_v34 = vmul.f32 0.015625, %v619_v9  ;;  %v669_v7 = vrot.slane %v3790_v28, %v3843_v63  ;;  %v644_v9 = vsub.f32 %v3806_v41, %v608_v23 }
 0x18e   : > { %v598_v17 = vpop.xlane.xlu0 %597 }
 0x18f   : > { %v638_v18 = vmax.f32 %v634_v16, 0.0  ;;  %v607_v24 = vmul.f32 0.015625, %v598_v17 }
 0x190   : > { %v604_v30 = vpop.xlane.xlu1 %603 }
 0x191   : > { %v646_v31 = vadd.f32 1e-05, %v638_v18  ;;  %v631_v33 = vmul.f32 %v607_v24, %v607_v24  ;;  %v609_v36 = vmul.f32 0.015625, %v604_v30  ;;  %v643_v5 = vsub.f32 %v3817_v47, %v607_v24 }
 0x192   : > { %v622_v37 = vpop.xlane.xlu0 %621 }
 0x193   : > { %3407 = vrsqrt.f32 %v646_v31  ;;  %v635_v42 = vsub.f32 %v627_v34, %v631_v33  ;;  %v628_v43 = vmul.f32 0.015625, %v622_v37  ;;  %v633_v49 = vmul.f32 %v609_v36, %v609_v36 }
 0x194   : > { %v625_v45 = vpop.xlane.xlu1 %624  ;;  %v645_v3 = vsub.f32 %v3823_v51, %v609_v36  ;;  %v3853_v51 = vsub.s32 3, %v3719_v2 }
 0x195   : > { %v639_v46 = vmax.f32 %v635_v42, 0.0  ;;  %v636_v48 = vsub.f32 %v628_v43, %v632_v40  ;;  %v629_v50 = vmul.f32 0.015625, %v625_v45 }
 0x196   : > { %v691_v36 = vrot.slane %v3790_v28, %v3853_v51 }
 0x197   : > { %v647_v52 = vadd.f32 1e-05, %v639_v46  ;;  %v640_v53 = vmax.f32 %v636_v48, 0.0  ;;  %v637_v54 = vsub.f32 %v629_v50, %v633_v49  ;;  %v3857_v48 = vpop.f32.mrf.mxu0 }
 0x199   : > { %3409 = vrsqrt.f32 %v647_v52  ;;  %v648_v55 = vadd.f32 1e-05, %v640_v53  ;;  %v641_v56 = vmax.f32 %v637_v54, 0.0 }
 0x19b   : > { %3411 = vrsqrt.f32 %v648_v55  ;;  %v649_v57 = vadd.f32 1e-05, %v641_v56 }
 0x19d   : > { %3413 = vrsqrt.f32 %v649_v57 }
 0x1a0   : > { %v3408_v60 = vpop.eup %3407 }
 0x1a1   : > { %v654_v62 = vmul.f32 %v3408_v60, %v642_v59 }
 0x1a3   : > { %v662_v6 = vmul.f32 %v661_v61, %v654_v62 }
 0x1a5   : > { %v670_v30 = vadd.f32 %v669_v7, %v662_v6 }
 0x1a6   : > { %v3410_v8 = vpop.eup %3409 }
 0x1a7   : > { %v655_v16 = vmul.f32 %v3410_v8, %v643_v5  ;;  %v674_v47 = vmax.f32 %v670_v30, 0.0 }
 0x1a8   : > { %v3412_v17 = vpop.eup %3411 }
 0x1a9   : > { %v656_v38 = vmul.f32 %v3412_v17, %v644_v9  ;;  %v663_v18 = vmul.f32 %v661_v61, %v655_v16 }
 0x1aa   : > { %v3414_v31 = vpop.eup %3413 }
 0x1ab   : > { %v664_v33 = vmul.f32 %v661_v61, %v656_v38  ;;  %v657_v34 = vmul.f32 %v3414_v31, %v645_v3  ;;  %v671_v37 = vadd.f32 %v669_v7, %v663_v18  ;;  %v3328_v3 = vld [vmem:[%s4624_s7 + $0x18] sm:$0xff]   ;;  %v3329_v18 = vld [vmem:[%s4624_s7 + $0x10] sm:$0xff]  }
 0x1ac   : > { %3157 = vmatprep.subr.bf16.mxu1 %v3328_v3 }
 0x1ad   : > { %v665_v40 = vmul.f32 %v661_v61, %v657_v34  ;;  %v675_v24 = vmax.f32 %v671_v37, 0.0  ;;  %v672_v42 = vadd.f32 %v669_v7, %v664_v33  ;;  %3158 = vmatpush3.bf16.msra.mxu1 %v3328_v3 }
 0x1ae   : > { %3159 = vmatprep.subr.bf16.mxu1 %v3329_v18 }
 0x1af   : > { %v678_v43 = vpack.c.bf16 %v675_v24, %v674_v47  ;;  %v673_v45 = vadd.f32 %v669_v7, %v665_v40  ;;  %v676_v41 = vmax.f32 %v672_v42, 0.0 }
 0x1b1   : > { %3153 = vmatprep.mubr.msk.bf16.mxu0 %vm592_vm3, %v678_v43  ;;  %v677_v23 = vmax.f32 %v673_v45, 0.0  ;;  %3160 = vmatpush3.bf16.msra.mxu1 %v3329_v18 }
 0x1b3   : > { %v679_v46 = vpack.c.bf16 %v677_v23, %v676_v41 }
 0x1b5   : > { %3154 = vmatmul.mubr.msk.bf16.vlgmr.msra.gmra.mxu0 %vm592_vm3, %v679_v46 }
 0x275   : > { %v3155_v49 = vpop.f32.mrf.mxu0 }
 0x276   : > { %v3859_v50 = vadd.f32 %v3155_v49, %v691_v36 }
 0x277   : > { %v756_v52 = vpop.f32.mrf.mxu0 }
 0x278   : > { %v3861_v53 = vadd.f32 %v756_v52, %v691_v36  ;;  %v777_v54 = vsel %vm592_vm3, %v3859_v50, 0.0  ;;  %v789_v8 = vmul.f32 %v3859_v50, %v3859_v50 }
 0x279   : > { %778 = vadd.xlane.f32.xlu0 %v777_v54  ;;  %v3156_v55 = vpop.f32.mrf.mxu0 }
 0x27a   : > { %v3865_v56 = vadd.f32 %v3156_v55, %v691_v36  ;;  %v771_v61 = vsel %vm592_vm3, %v3861_v53, 0.0  ;;  %v787_v62 = vmul.f32 %v3861_v53, %v3861_v53  ;;  %v797_v16 = vsel %vm592_vm3, %v789_v8, 0.0 }
 0x27b   : > { %v759_v57 = vpop.f32.mrf.mxu0 }
 0x27c   : > { %v3867_v59 = vadd.f32 %v759_v57, %v691_v36  ;;  %v780_v60 = vsel %vm592_vm3, %v3865_v56, 0.0  ;;  %v791_v6 = vsel %vm592_vm3, %v787_v62, 0.0  ;;  %v790_v17 = vmul.f32 %v3865_v56, %v3865_v56 }
 0x27d   : > { %781 = vadd.xlane.f32.xlu1 %v780_v60  ;;  %772 = vadd.xlane.f32.xlu0 %v771_v61 }
 0x27e   : > { %v774_v5 = vsel %vm592_vm3, %v3867_v59, 0.0  ;;  %v788_v7 = vmul.f32 %v3867_v59, %v3867_v59  ;;  %v800_v38 = vsel %vm592_vm3, %v790_v17, 0.0 }
 0x280   : > { %v794_v9 = vsel %vm592_vm3, %v788_v7, 0.0 }
 0x281   : > { %775 = vadd.xlane.f32.xlu1 %v774_v5  ;;  %792 = vadd.xlane.f32.xlu0 %v791_v6 }
 0x285   : > { %795 = vadd.xlane.f32.xlu1 %v794_v9  ;;  %798 = vadd.xlane.f32.xlu0 %v797_v16 }
 0x289   : > { %801 = vadd.xlane.f32.xlu1 %v800_v38  ;;  %v3908_v38 = vsub.s32 4, %v3719_v2 }
 0x28b   : > { %v838_v18 = vrot.slane %v3790_v28, %v3908_v38 }
 0x29a   : > { %982 = vrot.lane.b32.xlu1 %v3792_v29, %s3584_s29  ;;  %v3331_v29 = vld [vmem:[%s4624_s7] sm:$0xff]  }
 0x29b   : > { %980 = vrot.lane.b32.xlu0 %v3783_v26, %s3584_s29  ;;  %v3330_v26 = vld [vmem:[%s4624_s7 + $0x8] sm:$0xff]  }
 0x29c   : > { %3161 = vmatprep.subr.bf16.mxu1 %v3330_v26 }
 0x29d   : > { %3162 = vmatpush3.bf16.msra.mxu1 %v3330_v26  ;;  %v3914_v26 = vsub.s32 5, %v3719_v2 }
 0x29e   : > { %984 = vrot.lane.b32.xlu1 %v3799_v35, %s3584_s29  ;;  %3163 = vmatprep.subr.bf16.mxu1 %v3331_v29 }
 0x2a1   : > { %3164 = vmatpush3.bf16.msra.mxu1 %v3331_v29 }
 0x2a2   : > { %986 = vrot.lane.b32.xlu1 %v3811_v44, %s3584_s29 }
 0x302   : > { %v779_v35 = vpop.xlane.xlu0 %778 }
 0x303   : > { %v785_v33 = vmul.f32 0.015625, %v779_v35 }
 0x305   : > { %v809_v43 = vmul.f32 %v785_v33, %v785_v33 }
 0x306   : > { %v782_v44 = vpop.xlane.xlu1 %781  ;;  %v773_v30 = vpop.xlane.xlu0 %772 }
 0x307   : > { %v783_v31 = vmul.f32 0.015625, %v773_v30  ;;  %v786_v45 = vmul.f32 0.015625, %v782_v44 }
 0x309   : > { %v807_v40 = vmul.f32 %v783_v31, %v783_v31  ;;  %v810_v60 = vmul.f32 %v786_v45, %v786_v45  ;;  %v819_v3 = vsub.f32 %v3861_v53, %v783_v31  ;;  %v822_v31 = vsub.f32 %v3865_v56, %v786_v45  ;;  %v2968_v56 = vld [vmem:[%s4621_s4 + $0x4] sm:$0xf] }
 0x30a   : > { %v776_v34 = vpop.xlane.xlu1 %775  ;;  %v793_v37 = vpop.xlane.xlu0 %792  ;;  %3260 = vmatprep.subr.msk.bf16.mxu0 %vm531_vm0, %v2968_v56  ;;  %v999_v45 = vsel %vm531_vm0, %v2968_v56, 0 }
 0x30b   : > { %v784_v47 = vmul.f32 0.015625, %v776_v34  ;;  %v803_v24 = vmul.f32 0.015625, %v793_v37  ;;  %v846_v34 = vrot.slane %v3790_v28, %v3914_v26  ;;  %3170 = vmatpush3.bf16.msra.mxu0 %v999_v45 }
 0x30d   : > { %v811_v42 = vsub.f32 %v803_v24, %v807_v40  ;;  %v808_v46 = vmul.f32 %v784_v47, %v784_v47  ;;  %v820_v44 = vsub.f32 %v3867_v59, %v784_v47  ;;  %v821_v40 = vsub.f32 %v3859_v50, %v785_v33 }
 0x30e   : > { %v796_v41 = vpop.xlane.xlu1 %795  ;;  %v799_v23 = vpop.xlane.xlu0 %798 }
 0x30f   : > { %v815_v36 = vmax.f32 %v811_v42, 0.0  ;;  %v804_v49 = vmul.f32 0.015625, %v796_v41  ;;  %v805_v52 = vmul.f32 0.015625, %v799_v23 }
 0x311   : > { %v823_v54 = vadd.f32 1e-05, %v815_v36  ;;  %v812_v55 = vsub.f32 %v804_v49, %v808_v46  ;;  %v813_v57 = vsub.f32 %v805_v52, %v809_v43 }
 0x312   : > { %v802_v61 = vpop.xlane.xlu1 %801 }
 0x313   : > { %3415 = vrsqrt.f32 %v823_v54  ;;  %v816_v62 = vmax.f32 %v812_v55, 0.0  ;;  %v817_v5 = vmax.f32 %v813_v57, 0.0  ;;  %v806_v6 = vmul.f32 0.015625, %v802_v61 }
 0x314   : > { %v868_v61 = vrot.slane %v3750_v13, %v3843_v63 }
 0x315   : > { %v824_v7 = vadd.f32 1e-05, %v816_v62  ;;  %v825_v8 = vadd.f32 1e-05, %v817_v5  ;;  %v814_v9 = vsub.f32 %v806_v6, %v810_v60 }
 0x317   : > { %3417 = vrsqrt.f32 %v824_v7  ;;  %v818_v16 = vmax.f32 %v814_v9, 0.0  ;;  %v955_v9 = vrot.slane %v3750_v13, %v3837_v58 }
 0x318   : > { %3419 = vrsqrt.f32 %v825_v8 }
 0x319   : > { %v826_v17 = vadd.f32 1e-05, %v818_v16 }
 0x31b   : > { %3421 = vrsqrt.f32 %v826_v17 }
 0x320   : > { %v3416_v29 = vpop.eup %3415 }
 0x321   : > { %v831_v35 = vmul.f32 %v3416_v29, %v819_v3 }
 0x323   : > { %v839_v30 = vmul.f32 %v838_v18, %v831_v35 }
 0x324   : > { %v3418_v37 = vpop.eup %3417 }
 0x325   : > { %v3420_v24 = vpop.eup %3419  ;;  %v832_v42 = vmul.f32 %v3418_v37, %v820_v44  ;;  %v847_v41 = vadd.f32 %v846_v34, %v839_v30 }
 0x326   : > { %v833_v53 = vmul.f32 %v3420_v24, %v821_v40 }
 0x327   : > { %v840_v43 = vmul.f32 %v838_v18, %v832_v42  ;;  %v851_v52 = vmax.f32 %v847_v41, 0.0 }
 0x328   : > { %v3422_v23 = vpop.eup %3421  ;;  %v841_v46 = vmul.f32 %v838_v18, %v833_v53 }
 0x329   : > { %v834_v36 = vmul.f32 %v3422_v23, %v822_v31  ;;  %v848_v49 = vadd.f32 %v846_v34, %v840_v43  ;;  %v3969_v31 = vsub.s32 6, %v3719_v2 }
 0x32a   : > { %v849_v54 = vadd.f32 %v846_v34, %v841_v46 }
 0x32b   : > { %v852_v59 = vmax.f32 %v848_v49, 0.0  ;;  %v842_v47 = vmul.f32 %v838_v18, %v834_v36  ;;  %v1053_v41 = vrot.slane %v3790_v28, %v3969_v31  ;;  %v981_v36 = vpop.permute.xlu0 %980 }
 0x32c   : > { %v853_v50 = vmax.f32 %v849_v54, 0.0 }
 0x32d   : > { %v855_v55 = vpack.c.bf16 %v852_v59, %v851_v52  ;;  %v850_v57 = vadd.f32 %v846_v34, %v842_v47 }
 0x32f   : > { %3165 = vmatprep.mubr.msk.bf16.mxu1 %vm592_vm3, %v855_v55  ;;  %v854_v33 = vmax.f32 %v850_v57, 0.0 }
 0x331   : > { %v856_v60 = vpack.c.bf16 %v854_v33, %v853_v50 }
 0x333   : > { %3166 = vmatmul.mubr.msk.bf16.vlgmr.msra.gmra.mxu1 %vm592_vm3, %v856_v60 }
 0x3f3   : > { %v3167_v62 = vpop.f32.mrf.mxu1 }
 0x3f4   : > { %v942_v5 = vadd.f32 %v3167_v62, %v868_v61 }
 0x3f5   : > { %v933_v6 = vpop.f32.mrf.mxu1 }
 0x3f6   : > { %v934_v7 = vadd.f32 %v933_v6, %v868_v61  ;;  %v950_v8 = vadd.f32 %v942_v5, %v3752_v14 }
 0x3f7   : > { %v3168_v16 = vpop.f32.mrf.mxu1 }
 0x3f8   : > { %v948_v17 = vadd.f32 %v934_v7, %v3741_v10  ;;  %v945_v3 = vadd.f32 %v3168_v16, %v868_v61  ;;  %v958_v30 = vmul.f32 %v955_v9, %v950_v8  ;;  %v967_v10 = vrot.slane %v3750_v13, %v3853_v51 }
 0x3f9   : > { %v936_v18 = vpop.f32.mrf.mxu1 }
 0x3fa   : > { %v956_v29 = vmul.f32 %v955_v9, %v948_v17  ;;  %v951_v35 = vadd.f32 %v945_v3, %v3754_v15  ;;  %v937_v44 = vadd.f32 %v936_v18, %v868_v61  ;;  %v3943_v42 = vadd.f32 %v958_v30, %v3767_v21  ;;  %v3335_v30 = vld [vmem:[#allocation2 + $0x20] sm:$0xff]  }
 0x3fc   : > { %v959_v34 = vmul.f32 %v955_v9, %v951_v35  ;;  %v949_v37 = vadd.f32 %v937_v44, %v3743_v11  ;;  %v3937_v40 = vadd.f32 %v956_v29, %v3761_v19  ;;  %v3332_v29 = vld [vmem:[#allocation2 + $0x38] sm:$0xff]   ;;  %v3333_v35 = vld [vmem:[#allocation2 + $0x30] sm:$0xff]   ;;  %v3334_v44 = vld [vmem:[#allocation2 + $0x28] sm:$0xff]  }
 0x3fd   : > { %3175 = vmatprep.subr.bf16.mxu1 %v3332_v29 }
 0x3fe   : > { %v3940_v14 = vadd.f32 %v959_v34, %v3770_v22  ;;  %v957_v24 = vmul.f32 %v955_v9, %v949_v37  ;;  %v3954_v11 = vmul.f32 %v967_v10, %v3937_v40  ;;  %v3960_v22 = vmul.f32 %v967_v10, %v3943_v42  ;;  %3176 = vmatpush3.bf16.msra.mxu1 %v3332_v29 }
 0x3ff   : > { %3177 = vmatprep.subr.bf16.mxu1 %v3333_v35 }
 0x400   : > { %v3948_v15 = vadd.f32 %v957_v24, %v3764_v20  ;;  %v3951_v53 = vmul.f32 %v967_v10, %v3940_v14  ;;  %v983_v20 = vpop.permute.xlu1 %982 }
 0x402   : > { %v3957_v19 = vmul.f32 %v967_v10, %v3948_v15  ;;  %v973_v13 = vpack.c.bf16 %v3951_v53, %v3960_v22  ;;  %3178 = vmatpush3.bf16.msra.mxu1 %v3333_v35  ;;  %v4002_v35 = vsub.s32 7, %v3719_v2 }
 0x403   : > { %3179 = vmatprep.subr.bf16.mxu1 %v3334_v44 }
 0x404   : > { %v972_v21 = vpack.c.bf16 %v3957_v19, %v3954_v11  ;;  %v985_v43 = vpop.permute.xlu1 %984 }
 0x406   : > { %3171 = vmatprep.mubr.msk.bf16.mxu0 %vm524_vm2, %v972_v21  ;;  %3180 = vmatpush3.bf16.msra.mxu1 %v3334_v44  ;;  %v4007_v44 = vld [vmem:[%s4620_s3 + $0x8] sm:$0xff] }
 0x407   : > { %3172 = vmatmul.mubr.msk.bf16.vlgmr.msra.gmra.mxu0 %vm524_vm2, %v973_v13  ;;  %3181 = vmatprep.subr.bf16.mxu1 %v3335_v30 }
 0x408   : > { %v987_v47 = vpop.permute.xlu1 %986 }
 0x40a   : > { %3182 = vmatpush3.bf16.msra.mxu1 %v3335_v30 }
 0x4c7   : > { %v3173_v23 = vpop.f32.mrf.mxu0 }
 0x4c8   : > { %v1044_v46 = vadd.f32 %v3173_v23, %v985_v43 }
 0x4c9   : > { %v1035_v49 = vpop.f32.mrf.mxu0 }
 0x4ca   : > { %v3973_v52 = vadd.f32 %v1053_v41, %v1044_v46  ;;  %v1036_v59 = vadd.f32 %v1035_v49, %v981_v36 }
 0x4cb   : > { %v3174_v54 = vpop.f32.mrf.mxu0 }
 0x4cc   : > { %v3975_v55 = vadd.f32 %v1053_v41, %v1036_v59  ;;  %v1047_v57 = vadd.f32 %v3174_v54, %v987_v47  ;;  %v1064_v50 = vsel %vm592_vm3, %v3973_v52, 0.0  ;;  %v1076_v17 = vmul.f32 %v3973_v52, %v3973_v52 }
 0x4cd   : > { %1065 = vadd.xlane.f32.xlu0 %v1064_v50  ;;  %v1038_v33 = vpop.f32.mrf.mxu0 }
 0x4ce   : > { %v1039_v60 = vadd.f32 %v1038_v33, %v983_v20  ;;  %v3979_v56 = vadd.f32 %v1053_v41, %v1047_v57  ;;  %v1058_v61 = vsel %vm592_vm3, %v3975_v55, 0.0  ;;  %v1074_v7 = vmul.f32 %v3975_v55, %v3975_v55 }
 0x4cf   : > { %v1084_v18 = vsel %vm592_vm3, %v1076_v17, 0.0 }
 0x4d0   : > { %v3981_v45 = vadd.f32 %v1053_v41, %v1039_v60  ;;  %v1067_v6 = vsel %vm592_vm3, %v3979_v56, 0.0  ;;  %v1077_v9 = vmul.f32 %v3979_v56, %v3979_v56  ;;  %v1078_v16 = vsel %vm592_vm3, %v1074_v7, 0.0 }
 0x4d1   : > { %1059 = vadd.xlane.f32.xlu0 %v1058_v61 }
 0x4d2   : > { %v1061_v62 = vsel %vm592_vm3, %v3981_v45, 0.0  ;;  %v1075_v5 = vmul.f32 %v3981_v45, %v3981_v45  ;;  %v1087_v3 = vsel %vm592_vm3, %v1077_v9, 0.0 }
 0x4d3   : > { %1062 = vadd.xlane.f32.xlu1 %v1061_v62 }
 0x4d4   : > { %v1081_v8 = vsel %vm592_vm3, %v1075_v5, 0.0 }
 0x4d5   : > { %1068 = vadd.xlane.f32.xlu0 %v1067_v6 }
 0x4d7   : > { %1082 = vadd.xlane.f32.xlu1 %v1081_v8 }
 0x4d9   : > { %1079 = vadd.xlane.f32.xlu0 %v1078_v16 }
 0x4db   : > { %1088 = vadd.xlane.f32.xlu1 %v1087_v3 }
 0x4dd   : > { %1085 = vadd.xlane.f32.xlu0 %v1084_v18 }
 0x556   : > { %v1066_v34 = vpop.xlane.xlu0 %1065 }
 0x557   : > { %v1072_v46 = vmul.f32 0.015625, %v1066_v34  ;;  %v1125_v34 = vrot.slane %v3790_v28, %v4002_v35 }
 0x559   : > { %v1096_v61 = vmul.f32 %v1072_v46, %v1072_v46 }
 0x55a   : > { %v1060_v37 = vpop.xlane.xlu0 %1059 }
 0x55b   : > { %v1070_v13 = vmul.f32 0.015625, %v1060_v37 }
 0x55c   : > { %v1063_v24 = vpop.xlane.xlu1 %1062 }
 0x55d   : > { %v1071_v10 = vmul.f32 0.015625, %v1063_v24  ;;  %v1094_v49 = vmul.f32 %v1070_v13, %v1070_v13  ;;  %v1106_v24 = vsub.f32 %v3975_v55, %v1070_v13 }
 0x55e   : > { %v1069_v21 = vpop.xlane.xlu0 %1068 }
 0x55f   : > { %v1095_v43 = vmul.f32 %v1071_v10, %v1071_v10  ;;  %v1073_v41 = vmul.f32 0.015625, %v1069_v21  ;;  %v1107_v30 = vsub.f32 %v3981_v45, %v1071_v10 }
 0x560   : > { %v1083_v20 = vpop.xlane.xlu1 %1082 }
 0x561   : > { %v1091_v23 = vmul.f32 0.015625, %v1083_v20  ;;  %v1097_v57 = vmul.f32 %v1073_v41, %v1073_v41  ;;  %v1133_v20 = vrot.slane %v4007_v44, %v3731_v4  ;;  %v1109_v2 = vsub.f32 %v3979_v56, %v1073_v41 }
 0x562   : > { %v1080_v36 = vpop.xlane.xlu0 %1079 }
 0x563   : > { %v1099_v59 = vsub.f32 %v1091_v23, %v1095_v43  ;;  %v1090_v47 = vmul.f32 0.015625, %v1080_v36 }
 0x564   : > { %v1089_v54 = vpop.xlane.xlu1 %1088 }
 0x565   : > { %v1103_v50 = vmax.f32 %v1099_v59, 0.0  ;;  %v1098_v33 = vsub.f32 %v1090_v47, %v1094_v49  ;;  %v1093_v60 = vmul.f32 0.015625, %v1089_v54  ;;  %v1108_v59 = vsub.f32 %v3973_v52, %v1072_v46 }
 0x566   : > { %v1086_v62 = vpop.xlane.xlu0 %1085  ;;  %v1156_v52 = vrot.slane %v4007_v44, %v3837_v58 }
 0x567   : > { %v1111_v5 = vadd.f32 1e-05, %v1103_v50  ;;  %v1102_v6 = vmax.f32 %v1098_v33, 0.0  ;;  %v1101_v7 = vsub.f32 %v1093_v60, %v1097_v57  ;;  %v1092_v8 = vmul.f32 0.015625, %v1086_v62 }
 0x569   : > { %3423 = vrsqrt.f32 %v1111_v5  ;;  %v1110_v9 = vadd.f32 1e-05, %v1102_v6  ;;  %v1105_v16 = vmax.f32 %v1101_v7, 0.0  ;;  %v1100_v17 = vsub.f32 %v1092_v8, %v1096_v61 }
 0x56b   : > { %3425 = vrsqrt.f32 %v1110_v9  ;;  %v1113_v3 = vadd.f32 1e-05, %v1105_v16  ;;  %v1104_v18 = vmax.f32 %v1100_v17, 0.0 }
 0x56d   : > { %3427 = vrsqrt.f32 %v1113_v3  ;;  %v1112_v29 = vadd.f32 1e-05, %v1104_v18 }
 0x56f   : > { %3429 = vrsqrt.f32 %v1112_v29 }
 0x576   : > { %v3424_v37 = vpop.eup %3423 }
 0x577   : > { %v1119_v21 = vmul.f32 %v3424_v37, %v1107_v30 }
 0x578   : > { %v3426_v43 = vpop.eup %3425 }
 0x579   : > { %v1118_v23 = vmul.f32 %v3426_v43, %v1106_v24  ;;  %v1127_v36 = vmul.f32 %v1125_v34, %v1119_v21 }
 0x57a   : > { %v3428_v49 = vpop.eup %3427 }
 0x57b   : > { %v1121_v47 = vmul.f32 %v3428_v49, %v1109_v2  ;;  %v1126_v45 = vmul.f32 %v1125_v34, %v1118_v23  ;;  %v1135_v10 = vadd.f32 %v1133_v20, %v1127_v36  ;;  %v3336_v49 = vld [vmem:[%s4624_s7 + $0x38] sm:$0xff]  }
 0x57c   : > { %v3430_v54 = vpop.eup %3429  ;;  %3187 = vmatprep.subr.bf16.mxu1 %v3336_v49 }
 0x57d   : > { %v1120_v28 = vmul.f32 %v3430_v54, %v1108_v59  ;;  %v1134_v57 = vadd.f32 %v1133_v20, %v1126_v45  ;;  %v1129_v50 = vmul.f32 %v1125_v34, %v1121_v47  ;;  %v1139_v13 = vmax.f32 %v1135_v10, 0.0  ;;  %v3337_v59 = vld [vmem:[%s4624_s7 + $0x30] sm:$0xff]   ;;  %v3338_v47 = vld [vmem:[%s4624_s7 + $0x28] sm:$0xff]   ;;  %v3339_v45 = vld [vmem:[%s4624_s7 + $0x20] sm:$0xff]  }
 0x57f   : > { %v1138_v55 = vmax.f32 %v1134_v57, 0.0  ;;  %v1128_v33 = vmul.f32 %v1125_v34, %v1120_v28  ;;  %v1137_v60 = vadd.f32 %v1133_v20, %v1129_v50 }
 0x581   : > { %v1142_v61 = vpack.c.bf16 %v1139_v13, %v1138_v55  ;;  %v1136_v62 = vadd.f32 %v1133_v20, %v1128_v33  ;;  %v1141_v41 = vmax.f32 %v1137_v60, 0.0 }
 0x583   : > { %3183 = vmatprep.mubr.msk.bf16.mxu1 %vm592_vm3, %v1142_v61  ;;  %v1140_v56 = vmax.f32 %v1136_v62, 0.0 }
 0x585   : > { %v1143_v5 = vpack.c.bf16 %v1141_v41, %v1140_v56 }
 0x587   : > { %3184 = vmatmul.mubr.msk.bf16.vlgmr.msra.gmra.mxu1 %vm592_vm3, %v1143_v5 }
 0x588   : > { %3188 = vmatpush3.bf16.msra.mxu1 %v3336_v49 }
 0x589   : > { %3189 = vmatprep.subr.bf16.mxu1 %v3337_v59 }
 0x58c   : > { %3190 = vmatpush3.bf16.msra.mxu1 %v3337_v59 }
 0x58d   : > { %3191 = vmatprep.subr.bf16.mxu1 %v3338_v47 }
 0x590   : > { %3192 = vmatpush3.bf16.msra.mxu1 %v3338_v47  ;;  %v1303_v47 = vrot.slane %v4007_v44, %v3843_v63 }
 0x591   : > { %3193 = vmatprep.subr.bf16.mxu1 %v3339_v45 }
 0x594   : > { %3194 = vmatpush3.bf16.msra.mxu1 %v3339_v45 }
 0x647   : > { %v3185_v46 = vpop.f32.mrf.mxu1 }
 0x648   : > { %v4021_v6 = vadd.f32 %v3185_v46, %v1156_v52 }
 0x649   : > { %v1221_v7 = vpop.f32.mrf.mxu1 }
 0x64a   : > { %v4023_v8 = vadd.f32 %v1221_v7, %v1156_v52  ;;  %v1242_v9 = vsel %vm592_vm3, %v4021_v6, 0.0  ;;  %v1254_v20 = vmul.f32 %v4021_v6, %v4021_v6 }
 0x64b   : > { %1243 = vadd.xlane.f32.xlu0 %v1242_v9  ;;  %v3186_v16 = vpop.f32.mrf.mxu1 }
 0x64c   : > { %v4027_v17 = vadd.f32 %v3186_v16, %v1156_v52  ;;  %v1236_v30 = vsel %vm592_vm3, %v4023_v8, 0.0  ;;  %v1252_v34 = vmul.f32 %v4023_v8, %v4023_v8  ;;  %v1262_v2 = vsel %vm592_vm3, %v1254_v20, 0.0 }
 0x64d   : > { %v1224_v3 = vpop.f32.mrf.mxu1 }
 0x64e   : > { %v4029_v18 = vadd.f32 %v1224_v3, %v1156_v52  ;;  %v1245_v29 = vsel %vm592_vm3, %v4027_v17, 0.0  ;;  %v1256_v24 = vsel %vm592_vm3, %v1252_v34, 0.0  ;;  %v1255_v23 = vmul.f32 %v4027_v17, %v4027_v17 }
 0x64f   : > { %1246 = vadd.xlane.f32.xlu1 %v1245_v29  ;;  %1237 = vadd.xlane.f32.xlu0 %v1236_v30 }
 0x650   : > { %v1239_v37 = vsel %vm592_vm3, %v4029_v18, 0.0  ;;  %v1253_v21 = vmul.f32 %v4029_v18, %v4029_v18  ;;  %v1265_v36 = vsel %vm592_vm3, %v1255_v23, 0.0 }
 0x652   : > { %v1259_v43 = vsel %vm592_vm3, %v1253_v21, 0.0 }
 0x653   : > { %1240 = vadd.xlane.f32.xlu1 %v1239_v37  ;;  %1257 = vadd.xlane.f32.xlu0 %v1256_v24 }
 0x657   : > { %1260 = vadd.xlane.f32.xlu1 %v1259_v43  ;;  %1263 = vadd.xlane.f32.xlu0 %v1262_v2 }
 0x65b   : > { %1266 = vadd.xlane.f32.xlu1 %v1265_v36 }
 0x6d4   : > { %v1244_v10 = vpop.xlane.xlu0 %1243 }
 0x6d5   : > { %v1250_v50 = vmul.f32 0.015625, %v1244_v10 }
 0x6d7   : > { %v1274_v56 = vmul.f32 %v1250_v50, %v1250_v50 }
 0x6d8   : > { %v1247_v54 = vpop.xlane.xlu1 %1246  ;;  %v1238_v28 = vpop.xlane.xlu0 %1237 }
 0x6d9   : > { %v1248_v57 = vmul.f32 0.015625, %v1238_v28  ;;  %v1251_v41 = vmul.f32 0.015625, %v1247_v54 }
 0x6db   : > { %v1272_v33 = vmul.f32 %v1248_v57, %v1248_v57  ;;  %v1275_v34 = vmul.f32 %v1251_v41, %v1251_v41  ;;  %v1284_v59 = vsub.f32 %v4023_v8, %v1248_v57 }
 0x6dc   : > { %v1241_v55 = vpop.xlane.xlu1 %1240  ;;  %v1258_v13 = vpop.xlane.xlu0 %1257 }
 0x6dd   : > { %v1249_v60 = vmul.f32 0.015625, %v1241_v55  ;;  %v1268_v61 = vmul.f32 0.015625, %v1258_v13  ;;  %v1311_v55 = vrot.slane %v4007_v44, %v3853_v51 }
 0x6df   : > { %v1276_v62 = vsub.f32 %v1268_v61, %v1272_v33  ;;  %v1273_v46 = vmul.f32 %v1249_v60, %v1249_v60  ;;  %v1285_v54 = vsub.f32 %v4029_v18, %v1249_v60  ;;  %v1286_v33 = vsub.f32 %v4021_v6, %v1250_v50 }
 0x6e0   : > { %v1261_v5 = vpop.xlane.xlu1 %1260  ;;  %v1264_v52 = vpop.xlane.xlu0 %1263 }
 0x6e1   : > { %v1280_v7 = vmax.f32 %v1276_v62, 0.0  ;;  %v1269_v9 = vmul.f32 0.015625, %v1261_v5  ;;  %v1270_v16 = vmul.f32 0.015625, %v1264_v52  ;;  %v1287_v5 = vsub.f32 %v4027_v17, %v1251_v41  ;;  %v2991_v17 = vld [vmem:[%s4621_s4 + $0x8] sm:$0xf] }
 0x6e2   : > { %3261 = vmatprep.subr.msk.bf16.mxu1 %vm531_vm0, %v2991_v17  ;;  %v1449_v41 = vsel %vm531_vm0, %v2991_v17, 0 }
 0x6e3   : > { %v1288_v3 = vadd.f32 1e-05, %v1280_v7  ;;  %v1277_v29 = vsub.f32 %v1269_v9, %v1273_v46  ;;  %v1278_v30 = vsub.f32 %v1270_v16, %v1274_v56 }
 0x6e4   : > { %v1267_v37 = vpop.xlane.xlu1 %1266 }
 0x6e5   : > { %3431 = vrsqrt.f32 %v1288_v3  ;;  %v1281_v24 = vmax.f32 %v1277_v29, 0.0  ;;  %v1282_v21 = vmax.f32 %v1278_v30, 0.0  ;;  %v1271_v20 = vmul.f32 0.015625, %v1267_v37  ;;  %v4079_v37 = vld [vmem:[%s4619_s2] sm:$0xff] }
 0x6e7   : > { %v1289_v43 = vadd.f32 1e-05, %v1281_v24  ;;  %v1290_v2 = vadd.f32 1e-05, %v1282_v21  ;;  %v1279_v23 = vsub.f32 %v1271_v20, %v1275_v34  ;;  %v1334_v24 = vrot.slane %v4079_v37, %v3914_v26 }
 0x6e9   : > { %3433 = vrsqrt.f32 %v1289_v43  ;;  %v1283_v36 = vmax.f32 %v1279_v23, 0.0 }
 0x6ea   : > { %3435 = vrsqrt.f32 %v1290_v2 }
 0x6eb   : > { %v1291_v49 = vadd.f32 1e-05, %v1283_v36  ;;  %v1421_v36 = vrot.slane %v4079_v37, %v3908_v38 }
 0x6ed   : > { %3437 = vrsqrt.f32 %v1291_v49 }
 0x6f2   : > { %v3432_v45 = vpop.eup %3431 }
 0x6f3   : > { %v1296_v10 = vmul.f32 %v3432_v45, %v1284_v59 }
 0x6f5   : > { %v1304_v28 = vmul.f32 %v1303_v47, %v1296_v10 }
 0x6f6   : > { %v3434_v13 = vpop.eup %3433 }
 0x6f7   : > { %v3436_v61 = vpop.eup %3435  ;;  %v1297_v62 = vmul.f32 %v3434_v13, %v1285_v54  ;;  %v1312_v57 = vadd.f32 %v1311_v55, %v1304_v28 }
 0x6f8   : > { %v1298_v56 = vmul.f32 %v3436_v61, %v1286_v33 }
 0x6f9   : > { %v1305_v8 = vmul.f32 %v1303_v47, %v1297_v62  ;;  %v1316_v16 = vmax.f32 %v1312_v57, 0.0 }
 0x6fa   : > { %v3438_v52 = vpop.eup %3437  ;;  %v1306_v46 = vmul.f32 %v1303_v47, %v1298_v56 }
 0x6fb   : > { %v1299_v7 = vmul.f32 %v3438_v52, %v1287_v5  ;;  %v1313_v9 = vadd.f32 %v1311_v55, %v1305_v8 }
 0x6fc   : > { %v1314_v3 = vadd.f32 %v1311_v55, %v1306_v46 }
 0x6fd   : > { %v1317_v18 = vmax.f32 %v1313_v9, 0.0  ;;  %v1307_v60 = vmul.f32 %v1303_v47, %v1299_v7 }
 0x6fe   : > { %v1318_v6 = vmax.f32 %v1314_v3, 0.0 }
 0x6ff   : > { %v1320_v29 = vpack.c.bf16 %v1317_v18, %v1316_v16  ;;  %v1315_v30 = vadd.f32 %v1311_v55, %v1307_v60 }
 0x701   : > { %3195 = vmatprep.mubr.msk.bf16.mxu1 %vm592_vm3, %v1320_v29  ;;  %v1319_v50 = vmax.f32 %v1315_v30, 0.0 }
 0x703   : > { %v1321_v34 = vpack.c.bf16 %v1319_v50, %v1318_v6 }
 0x705   : > { %3196 = vmatmul.mubr.msk.bf16.vlgmr.msra.gmra.mxu1 %vm592_vm3, %v1321_v34 }
 0x706   : > { %3200 = vmatpush3.bf16.msra.mxu1 %v1449_v41 }
 0x7c5   : > { %v3197_v21 = vpop.f32.mrf.mxu1 }
 0x7c6   : > { %v1408_v20 = vadd.f32 %v3197_v21, %v1334_v24 }
 0x7c7   : > { %v1399_v43 = vpop.f32.mrf.mxu1 }
 0x7c8   : > { %v1400_v2 = vadd.f32 %v1399_v43, %v1334_v24  ;;  %v1416_v23 = vadd.f32 %v1408_v20, %v3943_v42 }
 0x7c9   : > { %v3198_v49 = vpop.f32.mrf.mxu1 }
 0x7ca   : > { %v1414_v59 = vadd.f32 %v1400_v2, %v3937_v40  ;;  %v1411_v47 = vadd.f32 %v3198_v49, %v1334_v24  ;;  %v1424_v55 = vmul.f32 %v1421_v36, %v1416_v23  ;;  %v1433_v40 = vrot.slane %v4079_v37, %v3969_v31 }
 0x7cb   : > { %v1402_v45 = vpop.f32.mrf.mxu1 }
 0x7cc   : > { %v1422_v10 = vmul.f32 %v1421_v36, %v1414_v59  ;;  %v1417_v54 = vadd.f32 %v1411_v47, %v3940_v14  ;;  %v1403_v28 = vadd.f32 %v1402_v45, %v1334_v24  ;;  %v4096_v56 = vadd.f32 %v1424_v55, %v3960_v22  ;;  %v3340_v59 = vld [vmem:[#allocation2 + $0x58] sm:$0xff]   ;;  %v3341_v47 = vld [vmem:[#allocation2 + $0x50] sm:$0xff]   ;;  %v3342_v45 = vld [vmem:[#allocation2 + $0x48] sm:$0xff]  }
 0x7cd   : > { %3205 = vmatprep.subr.bf16.mxu1 %v3340_v59 }
 0x7ce   : > { %v1425_v13 = vmul.f32 %v1421_v36, %v1417_v54  ;;  %v1415_v33 = vadd.f32 %v1403_v28, %v3948_v15  ;;  %v4090_v61 = vadd.f32 %v1422_v10, %v3954_v11  ;;  %v3343_v10 = vld [vmem:[#allocation2 + $0x40] sm:$0xff]  }
 0x7d0   : > { %v4093_v42 = vadd.f32 %v1425_v13, %v3951_v53  ;;  %v1423_v62 = vmul.f32 %v1421_v36, %v1415_v33  ;;  %v4107_v15 = vmul.f32 %v1433_v40, %v4090_v61  ;;  %v4113_v53 = vmul.f32 %v1433_v40, %v4096_v56 }
 0x7d2   : > { %v4101_v14 = vadd.f32 %v1423_v62, %v3957_v19  ;;  %v4104_v5 = vmul.f32 %v1433_v40, %v4093_v42  ;;  %v1503_v19 = vrot.slane %v4007_v44, %v3908_v38 }
 0x7d4   : > { %v4110_v11 = vmul.f32 %v1433_v40, %v4101_v14  ;;  %v1439_v8 = vpack.c.bf16 %v4104_v5, %v4113_v53 }
 0x7d6   : > { %v1438_v22 = vpack.c.bf16 %v4110_v11, %v4107_v15 }
 0x7d8   : > { %3201 = vmatprep.mubr.msk.bf16.mxu1 %vm524_vm2, %v1438_v22 }
 0x7d9   : > { %3202 = vmatmul.mubr.msk.bf16.vlgmr.msra.gmra.mxu1 %vm524_vm2, %v1439_v8 }
 0x7da   : > { %3206 = vmatpush3.bf16.msra.mxu1 %v3340_v59 }
 0x7db   : > { %3207 = vmatprep.subr.bf16.mxu1 %v3341_v47 }
 0x7de   : > { %3208 = vmatpush3.bf16.msra.mxu1 %v3341_v47 }
 0x7df   : > { %3209 = vmatprep.subr.bf16.mxu1 %v3342_v45 }
 0x7e2   : > { %3210 = vmatpush3.bf16.msra.mxu1 %v3342_v45 }
 0x7e3   : > { %3211 = vmatprep.subr.bf16.mxu1 %v3343_v10 }
 0x7e6   : > { %3212 = vmatpush3.bf16.msra.mxu1 %v3343_v10  ;;  %v1575_v10 = vrot.slane %v4007_v44, %v3914_v26 }
 0x899   : > { %v3203_v57 = vpop.f32.mrf.mxu1 }
 0x89a   : > { %v1494_v52 = vadd.f32 %v3203_v57, %v3804_v39 }
 0x89b   : > { %v1485_v46 = vpop.f32.mrf.mxu1 }
 0x89c   : > { %v4124_v7 = vadd.f32 %v1503_v19, %v1494_v52  ;;  %v1486_v9 = vadd.f32 %v1485_v46, %v3785_v27 }
 0x89d   : > { %v3204_v16 = vpop.f32.mrf.mxu1 }
 0x89e   : > { %v4127_v18 = vadd.f32 %v1503_v19, %v1486_v9  ;;  %v1497_v60 = vadd.f32 %v3204_v16, %v3857_v48  ;;  %v1514_v3 = vsel %vm592_vm3, %v4124_v7, 0.0  ;;  %v1526_v43 = vmul.f32 %v4124_v7, %v4124_v7 }
 0x89f   : > { %1515 = vadd.xlane.f32.xlu0 %v1514_v3  ;;  %v1488_v29 = vpop.f32.mrf.mxu1 }
 0x8a0   : > { %v4132_v30 = vadd.f32 %v1503_v19, %v1497_v60  ;;  %v1489_v6 = vadd.f32 %v1488_v29, %v3796_v32  ;;  %v1508_v17 = vsel %vm592_vm3, %v4127_v18, 0.0  ;;  %v1524_v41 = vmul.f32 %v4127_v18, %v4127_v18 }
 0x8a1   : > { %v1534_v23 = vsel %vm592_vm3, %v1526_v43, 0.0 }
 0x8a2   : > { %v4135_v50 = vadd.f32 %v1503_v19, %v1489_v6  ;;  %v1517_v34 = vsel %vm592_vm3, %v4132_v30, 0.0  ;;  %v1528_v21 = vsel %vm592_vm3, %v1524_v41, 0.0  ;;  %v1527_v36 = vmul.f32 %v4132_v30, %v4132_v30 }
 0x8a3   : > { %1518 = vadd.xlane.f32.xlu1 %v1517_v34  ;;  %1509 = vadd.xlane.f32.xlu0 %v1508_v17 }
 0x8a4   : > { %v1511_v24 = vsel %vm592_vm3, %v4135_v50, 0.0  ;;  %v1525_v20 = vmul.f32 %v4135_v50, %v4135_v50  ;;  %v1537_v49 = vsel %vm592_vm3, %v1527_v36, 0.0 }
 0x8a6   : > { %v1531_v2 = vsel %vm592_vm3, %v1525_v20, 0.0 }
 0x8a7   : > { %1512 = vadd.xlane.f32.xlu1 %v1511_v24  ;;  %1529 = vadd.xlane.f32.xlu0 %v1528_v21 }
 0x8ab   : > { %1532 = vadd.xlane.f32.xlu1 %v1531_v2  ;;  %1535 = vadd.xlane.f32.xlu0 %v1534_v23 }
 0x8af   : > { %1538 = vadd.xlane.f32.xlu1 %v1537_v49 }
 0x928   : > { %v1516_v54 = vpop.xlane.xlu0 %1515 }
 0x929   : > { %v1522_v33 = vmul.f32 0.015625, %v1516_v54 }
 0x92b   : > { %v1546_v52 = vmul.f32 %v1522_v33, %v1522_v33 }
 0x92c   : > { %v1519_v28 = vpop.xlane.xlu1 %1518  ;;  %v1510_v55 = vpop.xlane.xlu0 %1509 }
 0x92d   : > { %v1520_v13 = vmul.f32 0.015625, %v1510_v55  ;;  %v1523_v46 = vmul.f32 0.015625, %v1519_v28 }
 0x92f   : > { %v1544_v22 = vmul.f32 %v1520_v13, %v1520_v13  ;;  %v1547_v24 = vmul.f32 %v1523_v46, %v1523_v46  ;;  %v1556_v45 = vsub.f32 %v4127_v18, %v1520_v13 }
 0x930   : > { %v1513_v62 = vpop.xlane.xlu1 %1512  ;;  %v1530_v40 = vpop.xlane.xlu0 %1529 }
 0x931   : > { %v1521_v8 = vmul.f32 0.015625, %v1513_v62  ;;  %v1540_v19 = vmul.f32 0.015625, %v1530_v40  ;;  %v1583_v40 = vrot.slane %v4007_v44, %v3969_v31 }
 0x933   : > { %v1548_v57 = vsub.f32 %v1540_v19, %v1544_v22  ;;  %v1545_v60 = vmul.f32 %v1521_v8, %v1521_v8  ;;  %v1557_v55 = vsub.f32 %v4135_v50, %v1521_v8  ;;  %v1558_v19 = vsub.f32 %v4124_v7, %v1522_v33 }
 0x934   : > { %v1533_v9 = vpop.xlane.xlu1 %1532  ;;  %v1536_v16 = vpop.xlane.xlu0 %1535 }
 0x935   : > { %v1552_v3 = vmax.f32 %v1548_v57, 0.0  ;;  %v1541_v29 = vmul.f32 0.015625, %v1533_v9  ;;  %v1542_v6 = vmul.f32 0.015625, %v1536_v16  ;;  %v1559_v16 = vsub.f32 %v4132_v30, %v1523_v46 }
 0x936   : > { %v1606_v30 = vrot.slane %v4007_v44, %v4002_v35 }
 0x937   : > { %v1560_v34 = vadd.f32 1e-05, %v1552_v3  ;;  %v1549_v17 = vsub.f32 %v1541_v29, %v1545_v60  ;;  %v1550_v41 = vsub.f32 %v1542_v6, %v1546_v52 }
 0x938   : > { %v1539_v21 = vpop.xlane.xlu1 %1538 }
 0x939   : > { %3439 = vrsqrt.f32 %v1560_v34  ;;  %v1553_v20 = vmax.f32 %v1549_v17, 0.0  ;;  %v1554_v43 = vmax.f32 %v1550_v41, 0.0  ;;  %v1543_v2 = vmul.f32 0.015625, %v1539_v21 }
 0x93b   : > { %v1561_v23 = vadd.f32 1e-05, %v1553_v20  ;;  %v1562_v36 = vadd.f32 1e-05, %v1554_v43  ;;  %v1551_v49 = vsub.f32 %v1543_v2, %v1547_v24 }
 0x93d   : > { %3441 = vrsqrt.f32 %v1561_v23  ;;  %v1555_v59 = vmax.f32 %v1551_v49, 0.0 }
 0x93e   : > { %3443 = vrsqrt.f32 %v1562_v36 }
 0x93f   : > { %v1563_v47 = vadd.f32 1e-05, %v1555_v59 }
 0x941   : > { %3445 = vrsqrt.f32 %v1563_v47 }
 0x946   : > { %v3440_v54 = vpop.eup %3439 }
 0x947   : > { %v1568_v28 = vmul.f32 %v3440_v54, %v1556_v45 }
 0x949   : > { %v1576_v62 = vmul.f32 %v1575_v10, %v1568_v28 }
 0x94a   : > { %v3442_v22 = vpop.eup %3441 }
 0x94b   : > { %v3444_v57 = vpop.eup %3443  ;;  %v1569_v52 = vmul.f32 %v3442_v22, %v1557_v55  ;;  %v1584_v13 = vadd.f32 %v1583_v40, %v1576_v62 }
 0x94c   : > { %v1570_v9 = vmul.f32 %v3444_v57, %v1558_v19 }
 0x94d   : > { %v1577_v18 = vmul.f32 %v1575_v10, %v1569_v52  ;;  %v1588_v34 = vmax.f32 %v1584_v13, 0.0  ;;  %v3344_v52 = vld [vmem:[%s4624_s7 + $0x58] sm:$0xff]  }
 0x94e   : > { %v3446_v60 = vpop.eup %3445  ;;  %v1578_v3 = vmul.f32 %v1575_v10, %v1570_v9  ;;  %3217 = vmatprep.subr.bf16.mxu1 %v3344_v52  ;;  %v3345_v9 = vld [vmem:[%s4624_s7 + $0x50] sm:$0xff]  }
 0x94f   : > { %v1571_v29 = vmul.f32 %v3446_v60, %v1559_v16  ;;  %v1585_v6 = vadd.f32 %v1583_v40, %v1577_v18 }
 0x950   : > { %v1586_v17 = vadd.f32 %v1583_v40, %v1578_v3 }
 0x951   : > { %v1589_v50 = vmax.f32 %v1585_v6, 0.0  ;;  %v1579_v8 = vmul.f32 %v1575_v10, %v1571_v29 }
 0x952   : > { %v1590_v7 = vmax.f32 %v1586_v17, 0.0 }
 0x953   : > { %v1592_v41 = vpack.c.bf16 %v1589_v50, %v1588_v34  ;;  %v1587_v24 = vadd.f32 %v1583_v40, %v1579_v8 }
 0x955   : > { %3213 = vmatprep.mubr.msk.bf16.mxu1 %vm592_vm3, %v1592_v41  ;;  %v1591_v33 = vmax.f32 %v1587_v24, 0.0 }
 0x957   : > { %v1593_v21 = vpack.c.bf16 %v1591_v33, %v1590_v7 }
 0x959   : > { %3214 = vmatmul.mubr.msk.bf16.vlgmr.msra.gmra.mxu1 %vm592_vm3, %v1593_v21 }
 0x95a   : > { %3218 = vmatpush3.bf16.msra.mxu1 %v3344_v52 }
 0x95b   : > { %3219 = vmatprep.subr.bf16.mxu1 %v3345_v9 }
 0x95e   : > { %3220 = vmatpush3.bf16.msra.mxu1 %v3345_v9 }
 0xa19   : > { %v3215_v46 = vpop.f32.mrf.mxu1 }
 0xa1a   : > { %v4167_v20 = vadd.f32 %v3215_v46, %v1606_v30 }
 0xa1b   : > { %v1671_v43 = vpop.f32.mrf.mxu1 }
 0xa1c   : > { %v4169_v2 = vadd.f32 %v1671_v43, %v1606_v30  ;;  %v1692_v23 = vsel %vm592_vm3, %v4167_v20, 0.0  ;;  %v1704_v62 = vmul.f32 %v4167_v20, %v4167_v20 }
 0xa1d   : > { %1693 = vadd.xlane.f32.xlu0 %v1692_v23  ;;  %v3216_v36 = vpop.f32.mrf.mxu1 }
 0xa1e   : > { %v4173_v49 = vadd.f32 %v3216_v36, %v1606_v30  ;;  %v1686_v44 = vsel %vm592_vm3, %v4169_v2, 0.0  ;;  %v1702_v10 = vmul.f32 %v4169_v2, %v4169_v2  ;;  %v1712_v22 = vsel %vm592_vm3, %v1704_v62, 0.0 }
 0xa1f   : > { %v1674_v59 = vpop.f32.mrf.mxu1 }
 0xa20   : > { %v4175_v47 = vadd.f32 %v1674_v59, %v1606_v30  ;;  %v1695_v45 = vsel %vm592_vm3, %v4173_v49, 0.0  ;;  %v1706_v28 = vsel %vm592_vm3, %v1702_v10, 0.0  ;;  %v1705_v19 = vmul.f32 %v4173_v49, %v4173_v49 }
 0xa21   : > { %1696 = vadd.xlane.f32.xlu1 %v1695_v45  ;;  %1687 = vadd.xlane.f32.xlu0 %v1686_v44 }
 0xa22   : > { %v1689_v54 = vsel %vm592_vm3, %v4175_v47, 0.0  ;;  %v1703_v55 = vmul.f32 %v4175_v47, %v4175_v47  ;;  %v1715_v57 = vsel %vm592_vm3, %v1705_v19, 0.0 }
 0xa24   : > { %v1709_v40 = vsel %vm592_vm3, %v1703_v55, 0.0 }
 0xa25   : > { %1690 = vadd.xlane.f32.xlu1 %v1689_v54  ;;  %1707 = vadd.xlane.f32.xlu0 %v1706_v28 }
 0xa29   : > { %1710 = vadd.xlane.f32.xlu1 %v1709_v40  ;;  %1713 = vadd.xlane.f32.xlu0 %v1712_v22  ;;  %v4218_v22 = vld [vmem:[%s4620_s3 + $0x10] sm:$0xff] }
 0xa2d   : > { %1716 = vadd.xlane.f32.xlu1 %v1715_v57  ;;  %v1753_v57 = vrot.slane %v4218_v22, %v3731_v4 }
 0xa3e   : > { %1898 = vrot.lane.b32.xlu1 %v3796_v32, %s3584_s29  ;;  %v3347_v32 = vld [vmem:[%s4624_s7 + $0x40] sm:$0xff]  }
 0xa3f   : > { %1896 = vrot.lane.b32.xlu0 %v3785_v27, %s3584_s29  ;;  %v3346_v27 = vld [vmem:[%s4624_s7 + $0x48] sm:$0xff]  }
 0xa40   : > { %3221 = vmatprep.subr.bf16.mxu1 %v3346_v27 }
 0xa41   : > { %3222 = vmatpush3.bf16.msra.mxu1 %v3346_v27 }
 0xa42   : > { %1900 = vrot.lane.b32.xlu1 %v3804_v39, %s3584_s29  ;;  %3223 = vmatprep.subr.bf16.mxu1 %v3347_v32 }
 0xa45   : > { %3224 = vmatpush3.bf16.msra.mxu1 %v3347_v32 }
 0xa46   : > { %1902 = vrot.lane.b32.xlu1 %v3857_v48, %s3584_s29  ;;  %s4574_s29 = scalar_lea.hbm %s4628_s11, %s3078_s16 }
 0xaa6   : > { %v1694_v39 = vpop.xlane.xlu0 %1693 }
 0xaa7   : > { %v1700_v13 = vmul.f32 0.015625, %v1694_v39  ;;  %v1761_v39 = vrot.slane %v4218_v22, %v3837_v58 }
 0xaa9   : > { %v1724_v8 = vmul.f32 %v1700_v13, %v1700_v13 }
 0xaaa   : > { %v1697_v48 = vpop.xlane.xlu1 %1696  ;;  %v1688_v16 = vpop.xlane.xlu0 %1687 }
 0xaab   : > { %v1698_v18 = vmul.f32 0.015625, %v1688_v16  ;;  %v1701_v17 = vmul.f32 0.015625, %v1697_v48  ;;  %v1736_v16 = vsub.f32 %v4167_v20, %v1700_v13 }
 0xaad   : > { %v1722_v29 = vmul.f32 %v1698_v18, %v1698_v18  ;;  %v1725_v36 = vmul.f32 %v1701_v17, %v1701_v17  ;;  %v1734_v19 = vsub.f32 %v4169_v2, %v1698_v18 }
 0xaae   : > { %v1691_v60 = vpop.xlane.xlu1 %1690  ;;  %v1708_v3 = vpop.xlane.xlu0 %1707 }
 0xaaf   : > { %v1699_v6 = vmul.f32 0.015625, %v1691_v60  ;;  %v1718_v34 = vmul.f32 0.015625, %v1708_v3 }
 0xab1   : > { %v1726_v50 = vsub.f32 %v1718_v34, %v1722_v29  ;;  %v1723_v7 = vmul.f32 %v1699_v6, %v1699_v6  ;;  %v1735_v27 = vsub.f32 %v4175_v47, %v1699_v6  ;;  %v1737_v34 = vsub.f32 %v4173_v49, %v1701_v17  ;;  %v3014_v49 = vld [vmem:[%s4621_s4 + $0xc] sm:$0xf] }
 0xab2   : > { %v1711_v41 = vpop.xlane.xlu1 %1710  ;;  %v1714_v24 = vpop.xlane.xlu0 %1713  ;;  %3262 = vmatprep.subr.msk.bf16.mxu0 %vm531_vm0, %v3014_v49  ;;  %v1915_v17 = vsel %vm531_vm0, %v3014_v49, 0 }
 0xab3   : > { %v1730_v33 = vmax.f32 %v1726_v50, 0.0  ;;  %v1719_v21 = vmul.f32 0.015625, %v1711_v41  ;;  %v1720_v30 = vmul.f32 0.015625, %v1714_v24  ;;  %3230 = vmatpush3.bf16.msra.mxu0 %v1915_v17 }
 0xab5   : > { %v1738_v46 = vadd.f32 1e-05, %v1730_v33  ;;  %v1727_v43 = vsub.f32 %v1719_v21, %v1723_v7  ;;  %v1728_v23 = vsub.f32 %v1720_v30, %v1724_v8 }
 0xab6   : > { %v1717_v59 = vpop.xlane.xlu1 %1716 }
 0xab7   : > { %3447 = vrsqrt.f32 %v1738_v46  ;;  %v1731_v45 = vmax.f32 %v1727_v43, 0.0  ;;  %v1732_v44 = vmax.f32 %v1728_v23, 0.0  ;;  %v1721_v10 = vmul.f32 0.015625, %v1717_v59  ;;  %v4238_v43 = vld [vmem:[%s4619_s2 + $0x8] sm:$0xf] }
 0xab8   : > { %v1784_v23 = vrot.slane %v4238_v43, %v3731_v4 }
 0xab9   : > { %v1739_v54 = vadd.f32 1e-05, %v1731_v45  ;;  %v1740_v28 = vadd.f32 1e-05, %v1732_v44  ;;  %v1729_v55 = vsub.f32 %v1721_v10, %v1725_v36 }
 0xabb   : > { %3449 = vrsqrt.f32 %v1739_v54  ;;  %v1733_v62 = vmax.f32 %v1729_v55, 0.0  ;;  %v1871_v54 = vrot.slane %v4079_v37, %v4002_v35 }
 0xabc   : > { %3451 = vrsqrt.f32 %v1740_v28 }
 0xabd   : > { %v1741_v40 = vadd.f32 1e-05, %v1733_v62 }
 0xabf   : > { %3453 = vrsqrt.f32 %v1741_v40 }
 0xac4   : > { %v3448_v52 = vpop.eup %3447 }
 0xac5   : > { %v1746_v9 = vmul.f32 %v3448_v52, %v1734_v19 }
 0xac7   : > { %v1754_v32 = vmul.f32 %v1753_v57, %v1746_v9 }
 0xac8   : > { %v3450_v48 = vpop.eup %3449 }
 0xac9   : > { %v3452_v60 = vpop.eup %3451  ;;  %v1747_v3 = vmul.f32 %v3450_v48, %v1735_v27  ;;  %v1762_v18 = vadd.f32 %v1761_v39, %v1754_v32 }
 0xaca   : > { %v1748_v29 = vmul.f32 %v3452_v60, %v1736_v16 }
 0xacb   : > { %v1755_v2 = vmul.f32 %v1753_v57, %v1747_v3  ;;  %v1766_v7 = vmax.f32 %v1762_v18, 0.0  ;;  %v1897_v18 = vpop.permute.xlu0 %1896 }
 0xacc   : > { %v3454_v50 = vpop.eup %3453  ;;  %v1756_v8 = vmul.f32 %v1753_v57, %v1748_v29  ;;  %v1969_v29 = vrot.slane %v4218_v22, %v3843_v63 }
 0xacd   : > { %v1749_v41 = vmul.f32 %v3454_v50, %v1737_v34  ;;  %v1763_v24 = vadd.f32 %v1761_v39, %v1755_v2 }
 0xace   : > { %v1764_v33 = vadd.f32 %v1761_v39, %v1756_v8 }
 0xacf   : > { %v1767_v47 = vmax.f32 %v1763_v24, 0.0  ;;  %v1757_v6 = vmul.f32 %v1753_v57, %v1749_v41 }
 0xad0   : > { %v1768_v20 = vmax.f32 %v1764_v33, 0.0 }
 0xad1   : > { %v1770_v21 = vpack.c.bf16 %v1767_v47, %v1766_v7  ;;  %v1765_v30 = vadd.f32 %v1761_v39, %v1757_v6 }
 0xad3   : > { %3225 = vmatprep.mubr.msk.bf16.mxu1 %vm592_vm3, %v1770_v21  ;;  %v1769_v13 = vmax.f32 %v1765_v30, 0.0 }
 0xad5   : > { %v1771_v46 = vpack.c.bf16 %v1769_v13, %v1768_v20 }
 0xad7   : > { %3226 = vmatmul.mubr.msk.bf16.vlgmr.msra.gmra.mxu1 %vm592_vm3, %v1771_v46 }
 0xb97   : > { %v3227_v36 = vpop.f32.mrf.mxu1 }
 0xb98   : > { %v1858_v59 = vadd.f32 %v3227_v36, %v1784_v23 }
 0xb99   : > { %v1849_v45 = vpop.f32.mrf.mxu1 }
 0xb9a   : > { %v1850_v44 = vadd.f32 %v1849_v45, %v1784_v23  ;;  %v1866_v10 = vadd.f32 %v1858_v59, %v4096_v56 }
 0xb9b   : > { %v3228_v28 = vpop.f32.mrf.mxu1 }
 0xb9c   : > { %v1864_v55 = vadd.f32 %v1850_v44, %v4090_v61  ;;  %v1861_v62 = vadd.f32 %v3228_v28, %v1784_v23  ;;  %v1874_v9 = vmul.f32 %v1871_v54, %v1866_v10  ;;  %v1883_v61 = vrot.slane %v4238_v43, %v3837_v58 }
 0xb9d   : > { %v1852_v40 = vpop.f32.mrf.mxu1 }
 0xb9e   : > { %v1872_v19 = vmul.f32 %v1871_v54, %v1864_v55  ;;  %v1867_v57 = vadd.f32 %v1861_v62, %v4093_v42  ;;  %v1853_v52 = vadd.f32 %v1852_v40, %v1784_v23  ;;  %v4255_v48 = vadd.f32 %v1874_v9, %v4113_v53  ;;  %v3348_v55 = vld [vmem:[#allocation2 + $0x78] sm:$0xff]   ;;  %v3349_v62 = vld [vmem:[#allocation2 + $0x70] sm:$0xff]   ;;  %v3350_v40 = vld [vmem:[#allocation2 + $0x68] sm:$0xff]  }
 0xb9f   : > { %3235 = vmatprep.subr.bf16.mxu1 %v3348_v55 }
 0xba0   : > { %v1875_v27 = vmul.f32 %v1871_v54, %v1867_v57  ;;  %v1865_v32 = vadd.f32 %v1853_v52, %v4101_v14  ;;  %v4249_v39 = vadd.f32 %v1872_v19, %v4107_v15  ;;  %3236 = vmatpush3.bf16.msra.mxu1 %v3348_v55  ;;  %v3351_v19 = vld [vmem:[#allocation2 + $0x60] sm:$0xff]  }
 0xba1   : > { %3237 = vmatprep.subr.bf16.mxu1 %v3349_v62 }
 0xba2   : > { %v4252_v56 = vadd.f32 %v1875_v27, %v4104_v5  ;;  %v1873_v37 = vmul.f32 %v1871_v54, %v1865_v32  ;;  %v4266_v14 = vmul.f32 %v1883_v61, %v4249_v39  ;;  %v4272_v5 = vmul.f32 %v1883_v61, %v4255_v48 }
 0xba4   : > { %v4260_v42 = vadd.f32 %v1873_v37, %v4110_v11  ;;  %v4263_v16 = vmul.f32 %v1883_v61, %v4252_v56  ;;  %v1899_v11 = vpop.permute.xlu1 %1898  ;;  %3238 = vmatpush3.bf16.msra.mxu1 %v3349_v62 }
 0xba5   : > { %3239 = vmatprep.subr.bf16.mxu1 %v3350_v40 }
 0xba6   : > { %v4269_v15 = vmul.f32 %v1883_v61, %v4260_v42  ;;  %v1889_v60 = vpack.c.bf16 %v4263_v16, %v4272_v5 }
 0xba8   : > { %v1888_v53 = vpack.c.bf16 %v4269_v15, %v4266_v14  ;;  %v1901_v3 = vpop.permute.xlu1 %1900  ;;  %3240 = vmatpush3.bf16.msra.mxu1 %v3350_v40 }
 0xba9   : > { %3241 = vmatprep.subr.bf16.mxu1 %v3351_v19 }
 0xbaa   : > { %3231 = vmatprep.mubr.msk.bf16.mxu0 %vm524_vm2, %v1888_v53 }
 0xbab   : > { %3232 = vmatmul.mubr.msk.bf16.vlgmr.msra.gmra.mxu0 %vm524_vm2, %v1889_v60 }
 0xbac   : > { %v1903_v24 = vpop.permute.xlu1 %1902  ;;  %3242 = vmatpush3.bf16.msra.mxu1 %v3351_v19  ;;  %v2049_v19 = vrot.slane %v4218_v22, %v3908_v38 }
 0xc6b   : > { %v3233_v34 = vpop.f32.mrf.mxu0 }
 0xc6c   : > { %v1960_v2 = vadd.f32 %v3233_v34, %v1901_v3 }
 0xc6d   : > { %v1951_v50 = vpop.f32.mrf.mxu0 }
 0xc6e   : > { %v4282_v8 = vadd.f32 %v1969_v29, %v1960_v2  ;;  %v1952_v41 = vadd.f32 %v1951_v50, %v1897_v18 }
 0xc6f   : > { %v3234_v7 = vpop.f32.mrf.mxu0 }
 0xc70   : > { %v4284_v47 = vadd.f32 %v1969_v29, %v1952_v41  ;;  %v1963_v6 = vadd.f32 %v3234_v7, %v1903_v24  ;;  %v1980_v33 = vsel %vm592_vm3, %v4282_v8, 0.0  ;;  %v1992_v10 = vmul.f32 %v4282_v8, %v4282_v8 }
 0xc71   : > { %1981 = vadd.xlane.f32.xlu0 %v1980_v33  ;;  %v1954_v21 = vpop.f32.mrf.mxu0 }
 0xc72   : > { %v1955_v30 = vadd.f32 %v1954_v21, %v1899_v11  ;;  %v4288_v20 = vadd.f32 %v1969_v29, %v1963_v6  ;;  %v1974_v46 = vsel %vm592_vm3, %v4284_v47, 0.0  ;;  %v1990_v36 = vmul.f32 %v4284_v47, %v4284_v47 }
 0xc73   : > { %v2000_v28 = vsel %vm592_vm3, %v1992_v10, 0.0 }
 0xc74   : > { %v4290_v13 = vadd.f32 %v1969_v29, %v1955_v30  ;;  %v1983_v23 = vsel %vm592_vm3, %v4288_v20, 0.0  ;;  %v1993_v45 = vmul.f32 %v4288_v20, %v4288_v20  ;;  %v1994_v44 = vsel %vm592_vm3, %v1990_v36, 0.0 }
 0xc75   : > { %1975 = vadd.xlane.f32.xlu0 %v1974_v46 }
 0xc76   : > { %v1977_v49 = vsel %vm592_vm3, %v4290_v13, 0.0  ;;  %v1991_v17 = vmul.f32 %v4290_v13, %v4290_v13  ;;  %v2003_v54 = vsel %vm592_vm3, %v1993_v45, 0.0 }
 0xc77   : > { %1978 = vadd.xlane.f32.xlu1 %v1977_v49 }
 0xc78   : > { %v1997_v59 = vsel %vm592_vm3, %v1991_v17, 0.0 }
 0xc79   : > { %1984 = vadd.xlane.f32.xlu0 %v1983_v23 }
 0xc7b   : > { %1998 = vadd.xlane.f32.xlu1 %v1997_v59 }
 0xc7d   : > { %1995 = vadd.xlane.f32.xlu0 %v1994_v44 }
 0xc7f   : > { %2004 = vadd.xlane.f32.xlu1 %v2003_v54 }
 0xc81   : > { %2001 = vadd.xlane.f32.xlu0 %v2000_v28  ;;  %v2041_v28 = vrot.slane %v4218_v22, %v3853_v51 }
 0xcfa   : > { %v1982_v57 = vpop.xlane.xlu0 %1981 }
 0xcfb   : > { %v1988_v3 = vmul.f32 0.015625, %v1982_v57 }
 0xcfd   : > { %v2012_v33 = vmul.f32 %v1988_v3, %v1988_v3 }
 0xcfe   : > { %v1976_v52 = vpop.xlane.xlu0 %1975 }
 0xcff   : > { %v1986_v37 = vmul.f32 0.015625, %v1976_v52 }
 0xd00   : > { %v1979_v9 = vpop.xlane.xlu1 %1978 }
 0xd01   : > { %v1987_v27 = vmul.f32 0.015625, %v1979_v9  ;;  %v2010_v34 = vmul.f32 %v1986_v37, %v1986_v37  ;;  %v2022_v62 = vsub.f32 %v4284_v47, %v1986_v37 }
 0xd02   : > { %v1985_v32 = vpop.xlane.xlu0 %1984 }
 0xd03   : > { %v2011_v53 = vmul.f32 %v1987_v27, %v1987_v27  ;;  %v1989_v60 = vmul.f32 0.015625, %v1985_v32  ;;  %v2023_v54 = vsub.f32 %v4290_v13, %v1987_v27 }
 0xd04   : > { %v1999_v61 = vpop.xlane.xlu1 %1998 }
 0xd05   : > { %v2007_v11 = vmul.f32 0.015625, %v1999_v61  ;;  %v2013_v41 = vmul.f32 %v1989_v60, %v1989_v60  ;;  %v2025_v52 = vsub.f32 %v4288_v20, %v1989_v60 }
 0xd06   : > { %v1996_v29 = vpop.xlane.xlu0 %1995 }
 0xd07   : > { %v2015_v2 = vsub.f32 %v2007_v11, %v2011_v53  ;;  %v2006_v18 = vmul.f32 0.015625, %v1996_v29  ;;  %v2024_v53 = vsub.f32 %v4282_v8, %v1988_v3  ;;  %v3352_v8 = vld [vmem:[%s4625_s8] ss:$8 sps:$4 sm:$0xff]   ;;  %v3354_v3 = vld [vmem:[%s4625_s8 + $0x4] ss:$8 sps:$4 sm:$0xff]  }
 0xd08   : > { %v2005_v50 = vpop.xlane.xlu1 %2004  ;;  %2392 = vmatprep.subr.bf16.mxu1 %v3354_v3 }
 0xd09   : > { %v2019_v24 = vmax.f32 %v2015_v2, 0.0  ;;  %v2014_v7 = vsub.f32 %v2006_v18, %v2010_v34  ;;  %v2009_v6 = vmul.f32 0.015625, %v2005_v50 }
 0xd0a   : > { %v2002_v21 = vpop.xlane.xlu0 %2001 }
 0xd0b   : > { %v2027_v30 = vadd.f32 1e-05, %v2019_v24  ;;  %v2018_v46 = vmax.f32 %v2014_v7, 0.0  ;;  %v2017_v49 = vsub.f32 %v2009_v6, %v2013_v41  ;;  %v2008_v17 = vmul.f32 0.015625, %v2002_v21 }
 0xd0d   : > { %3455 = vrsqrt.f32 %v2027_v30  ;;  %v2026_v23 = vadd.f32 1e-05, %v2018_v46  ;;  %v2021_v36 = vmax.f32 %v2017_v49, 0.0  ;;  %v2016_v59 = vsub.f32 %v2008_v17, %v2012_v33 }
 0xd0e   : > { %v2072_v33 = vrot.slane %v4218_v22, %v3914_v26 }
 0xd0f   : > { %3457 = vrsqrt.f32 %v2026_v23  ;;  %v2029_v45 = vadd.f32 1e-05, %v2021_v36  ;;  %v2020_v44 = vmax.f32 %v2016_v59, 0.0 }
 0xd11   : > { %3459 = vrsqrt.f32 %v2029_v45  ;;  %v2028_v10 = vadd.f32 1e-05, %v2020_v44 }
 0xd13   : > { %3461 = vrsqrt.f32 %v2028_v10 }
 0xd1a   : > { %v3456_v55 = vpop.eup %3455 }
 0xd1b   : > { %v2035_v40 = vmul.f32 %v3456_v55, %v2023_v54 }
 0xd1c   : > { %v3458_v57 = vpop.eup %3457 }
 0xd1d   : > { %v2034_v9 = vmul.f32 %v3458_v57, %v2022_v62  ;;  %v2043_v32 = vmul.f32 %v2041_v28, %v2035_v40  ;;  %v3355_v57 = vld [vmem:[%s4624_s7 + $0x78] sm:$0xff]  }
 0xd1e   : > { %v3460_v61 = vpop.eup %3459  ;;  %3247 = vmatprep.subr.bf16.mxu0 %v3355_v57 }
 0xd1f   : > { %v2037_v11 = vmul.f32 %v3460_v61, %v2025_v52  ;;  %v2042_v13 = vmul.f32 %v2041_v28, %v2034_v9  ;;  %v2051_v27 = vadd.f32 %v2049_v19, %v2043_v32  ;;  %3248 = vmatpush3.bf16.msra.mxu0 %v3355_v57  ;;  %v3356_v52 = vld [vmem:[%s4624_s7 + $0x70] sm:$0xff]   ;;  %v3357_v9 = vld [vmem:[%s4624_s7 + $0x68] sm:$0xff]   ;;  %v3358_v32 = vld [vmem:[%s4624_s7 + $0x60] sm:$0xff]  }
 0xd20   : > { %v3462_v29 = vpop.eup %3461  ;;  %3249 = vmatprep.subr.bf16.mxu0 %v3356_v52  ;;  %v3361_v61 = vld [vmem:[%s4626_s9 + $0x74] ss:$8 sps:$4 sm:$0xff]  }
 0xd21   : > { %v2036_v34 = vmul.f32 %v3462_v29, %v2024_v53  ;;  %v2050_v2 = vadd.f32 %v2049_v19, %v2042_v13  ;;  %v2045_v18 = vmul.f32 %v2041_v28, %v2037_v11  ;;  %v2055_v37 = vmax.f32 %v2051_v27, 0.0  ;;  %v4380_v53 = vld [vmem:[%s4627_s10] sm:$0xff] }
 0xd22   : > { %v2353_v13 = vrot.slane %v4380_v53, %v3731_v4 }
 0xd23   : > { %v2054_v47 = vmax.f32 %v2050_v2, 0.0  ;;  %v2044_v50 = vmul.f32 %v2041_v28, %v2036_v34  ;;  %v2053_v41 = vadd.f32 %v2049_v19, %v2045_v18  ;;  %3250 = vmatpush3.bf16.msra.mxu0 %v3356_v52 }
 0xd24   : > { %3251 = vmatprep.subr.bf16.mxu0 %v3357_v9  ;;  %v4385_v27 = vrot.slane %v2353_v13, %v3731_v4 }
 0xd25   : > { %v2058_v24 = vpack.c.bf16 %v2055_v37, %v2054_v47  ;;  %v2052_v7 = vadd.f32 %v2049_v19, %v2044_v50  ;;  %v2057_v60 = vmax.f32 %v2053_v41, 0.0 }
 0xd27   : > { %3243 = vmatprep.mubr.msk.bf16.mxu1 %vm592_vm3, %v2058_v24  ;;  %v2056_v20 = vmax.f32 %v2052_v7, 0.0  ;;  %3252 = vmatpush3.bf16.msra.mxu0 %v3357_v9 }
 0xd28   : > { %3253 = vmatprep.subr.bf16.mxu0 %v3358_v32 }
 0xd29   : > { %v2059_v6 = vpack.c.bf16 %v2057_v60, %v2056_v20 }
 0xd2b   : > { %3244 = vmatmul.mubr.msk.bf16.vlgmr.msra.gmra.mxu1 %vm592_vm3, %v2059_v6  ;;  %3254 = vmatpush3.bf16.msra.mxu0 %v3358_v32 }
 0xd2c   : > { %2410 = vmatprep.mubr.bf16.mxu1 %v3583_v1  ;;  %2393 = vmatpush1.bf16.msra.mxu1 %v3352_v8 }
 0xd2d   : > { %2653 = vmatprep.subr.bf16.mxu0 %v3361_v61 }
 0xd33   : > { %3039 = vmatmul.mubr.msk.bf16.vlgmr.msra.gmra.mxu1 %vm453_vm1, %v3745_v12 }
 0xd34   : > { %2420 = vmatprep.mubr.bf16.mxu1 %v3583_v1 }
 0xd3b   : > { %3040 = vmatmul.mubr.msk.bf16.gmra.mxu1 %vm453_vm1, %v3778_v25 }
 0xdeb   : > { %v3245_v21 = vpop.f32.mrf.mxu1 }
 0xdec   : > { %v4334_v30 = vadd.f32 %v3245_v21, %v2072_v33 }
 0xded   : > { %v2137_v46 = vpop.f32.mrf.mxu1 }
 0xdee   : > { %v4336_v49 = vadd.f32 %v2137_v46, %v2072_v33  ;;  %v2158_v17 = vsel %vm592_vm3, %v4334_v30, 0.0  ;;  %v2170_v28 = vmul.f32 %v4334_v30, %v4334_v30 }
 0xdef   : > { %2159 = vadd.xlane.f32.xlu0 %v2158_v17  ;;  %v3246_v23 = vpop.f32.mrf.mxu1 }
 0xdf0   : > { %v4340_v12 = vadd.f32 %v3246_v23, %v2072_v33  ;;  %v2152_v59 = vsel %vm592_vm3, %v4336_v49, 0.0  ;;  %v2168_v45 = vmul.f32 %v4336_v49, %v4336_v49  ;;  %v2178_v62 = vsel %vm592_vm3, %v2170_v28, 0.0 }
 0xdf1   : > { %v2140_v1 = vpop.f32.mrf.mxu1 }
 0xdf2   : > { %v4342_v36 = vadd.f32 %v2140_v1, %v2072_v33  ;;  %v2161_v25 = vsel %vm592_vm3, %v4340_v12, 0.0  ;;  %v2172_v10 = vsel %vm592_vm3, %v2168_v45, 0.0  ;;  %v2171_v40 = vmul.f32 %v4340_v12, %v4340_v12 }
 0xdf3   : > { %2162 = vadd.xlane.f32.xlu1 %v2161_v25  ;;  %2153 = vadd.xlane.f32.xlu0 %v2152_v59  ;;  %v2412_v11 = vpop.f32.mrf.mxu1 }
 0xdf4   : > { %v2155_v44 = vsel %vm592_vm3, %v4342_v36, 0.0  ;;  %v2169_v54 = vmul.f32 %v4342_v36, %v4342_v36  ;;  %v2181_v19 = vsel %vm592_vm3, %v2171_v40, 0.0  ;;  %v2413_v34 = vadd.f32 %v2412_v11, %v4385_v27 }
 0xdf5   : > { %v4387_v29 = vpop.f32.mrf.mxu1 }
 0xdf6   : > { %v2175_v55 = vsel %vm592_vm3, %v2169_v54, 0.0  ;;  %v2431_v18 = vmax.f32 %v2413_v34, 0.0 }
 0xdf7   : > { %2156 = vadd.xlane.f32.xlu1 %v2155_v44  ;;  %2173 = vadd.xlane.f32.xlu0 %v2172_v10  ;;  %v2416_v2 = vpop.f32.mrf.mxu1 }
 0xdf8   : > { %v2417_v47 = vadd.f32 %v2416_v2, %v4385_v27  ;;  %v2219_v2 = vrot.slane %v4218_v22, %v3969_v31 }
 0xdfa   : > { %v2433_v37 = vmax.f32 %v2417_v47, 0.0  ;;  %v2357_v47 = vrot.slane %v4380_v53, %v3908_v38 }
 0xdfb   : > { %2176 = vadd.xlane.f32.xlu1 %v2175_v55  ;;  %2179 = vadd.xlane.f32.xlu0 %v2178_v62 }
 0xdfc   : > { %v4391_v50 = vpack.c.bf16 %v2433_v37, %v2431_v18 }
 0xdff   : > { %2182 = vadd.xlane.f32.xlu1 %v2181_v19 }
 0xe78   : > { %v2160_v41 = vpop.xlane.xlu0 %2159 }
 0xe79   : > { %v2166_v60 = vmul.f32 0.015625, %v2160_v41 }
 0xe7b   : > { %v2190_v17 = vmul.f32 %v2166_v60, %v2166_v60 }
 0xe7c   : > { %v2163_v24 = vpop.xlane.xlu1 %2162  ;;  %v2154_v7 = vpop.xlane.xlu0 %2153 }
 0xe7d   : > { %v2164_v20 = vmul.f32 0.015625, %v2154_v7  ;;  %v2167_v23 = vmul.f32 0.015625, %v2163_v24  ;;  %v2227_v7 = vrot.slane %v4218_v22, %v4002_v35 }
 0xe7f   : > { %v2188_v3 = vmul.f32 %v2164_v20, %v2164_v20  ;;  %v2191_v62 = vmul.f32 %v2167_v23, %v2167_v23  ;;  %v2200_v34 = vsub.f32 %v4336_v49, %v2164_v20 }
 0xe80   : > { %v2157_v6 = vpop.xlane.xlu1 %2156  ;;  %v2174_v8 = vpop.xlane.xlu0 %2173 }
 0xe81   : > { %v2165_v33 = vmul.f32 0.015625, %v2157_v6  ;;  %v2184_v21 = vmul.f32 0.015625, %v2174_v8  ;;  %v2202_v8 = vsub.f32 %v4334_v30, %v2166_v60 }
 0xe83   : > { %v2192_v46 = vsub.f32 %v2184_v21, %v2188_v3  ;;  %v2189_v59 = vmul.f32 %v2165_v33, %v2165_v33  ;;  %v2201_v41 = vsub.f32 %v4342_v36, %v2165_v33  ;;  %v4403_v3 = vrot.slane %v2357_v47, %v3731_v4  ;;  %v2418_v21 = vpop.f32.mrf.mxu1  ;;  %v3382_v47 = vld [vmem:[%s4626_s9 + $0x4] ss:$8 sps:$4 sm:$0xff]  }
 0xe84   : > { %v2177_v1 = vpop.xlane.xlu1 %2176  ;;  %v2180_v25 = vpop.xlane.xlu0 %2179 }
 0xe85   : > { %v2196_v45 = vmax.f32 %v2192_v46, 0.0  ;;  %v2185_v44 = vmul.f32 0.015625, %v2177_v1  ;;  %v2186_v10 = vmul.f32 0.015625, %v2180_v25  ;;  %v2415_v33 = vadd.f32 %v4387_v29, %v4403_v3  ;;  %v3359_v29 = vld [vmem:[%s4626_s9 + $0x70] ss:$8 sps:$4 sm:$0xff]  }
 0xe86   : > { %v2419_v35 = vadd.f32 %v2418_v21, %v4403_v3  ;;  %v2422_v21 = vpop.f32.mrf.mxu1 }
 0xe87   : > { %v2204_v54 = vadd.f32 1e-05, %v2196_v45  ;;  %v2193_v28 = vsub.f32 %v2185_v44, %v2189_v59  ;;  %v2194_v55 = vsub.f32 %v2186_v10, %v2190_v17  ;;  %v2203_v17 = vsub.f32 %v4340_v12, %v2167_v23 }
 0xe88   : > { %v2183_v40 = vpop.xlane.xlu1 %2182  ;;  %v2432_v44 = vmax.f32 %v2415_v33, 0.0  ;;  %v2434_v10 = vmax.f32 %v2419_v35, 0.0  ;;  %v3398_v33 = vld [vmem:[%s4626_s9 + $0xa0] ss:$8 sps:$4 sm:$0xff]   ;;  %v3403_v35 = vld [vmem:[%s4626_s9 + $0x94] ss:$8 sps:$4 sm:$0xff]  }
 0xe89   : > { %3463 = vrsqrt.f32 %v2204_v54  ;;  %v2197_v19 = vmax.f32 %v2193_v28, 0.0  ;;  %v2198_v57 = vmax.f32 %v2194_v55, 0.0  ;;  %v2187_v52 = vmul.f32 0.015625, %v2183_v40  ;;  %v3364_v40 = vld [vmem:[%s4626_s9 + $0x64] ss:$8 sps:$4 sm:$0xff]  }
 0xe8a   : > { %v2440_v55 = vpack.c.bf16 %v2434_v10, %v2432_v44  ;;  %v3404_v10 = vld [vmem:[%s4626_s9 + $0x80] ss:$8 sps:$4 sm:$0xff]  }
 0xe8b   : > { %v2205_v9 = vadd.f32 1e-05, %v2197_v19  ;;  %v2206_v32 = vadd.f32 1e-05, %v2198_v57  ;;  %v2195_v61 = vsub.f32 %v2187_v52, %v2191_v62  ;;  %v3362_v19 = vld [vmem:[%s4626_s9 + $0x60] ss:$8 sps:$4 sm:$0xff]  }
 0xe8c   : > { %v3367_v57 = vld [vmem:[%s4626_s9 + $0x54] ss:$8 sps:$4 sm:$0xff]   ;;  %v3365_v52 = vld [vmem:[%s4626_s9 + $0x50] ss:$8 sps:$4 sm:$0xff]  }
 0xe8d   : > { %3465 = vrsqrt.f32 %v2205_v9  ;;  %v2199_v11 = vmax.f32 %v2195_v61, 0.0  ;;  %v3370_v9 = vld [vmem:[%s4626_s9 + $0x44] ss:$8 sps:$4 sm:$0xff]   ;;  %v3373_v61 = vld [vmem:[%s4626_s9 + $0x34] ss:$8 sps:$4 sm:$0xff]  }
 0xe8e   : > { %3467 = vrsqrt.f32 %v2206_v32  ;;  %v3368_v32 = vld [vmem:[%s4626_s9 + $0x40] ss:$8 sps:$4 sm:$0xff]  }
 0xe8f   : > { %v2207_v13 = vadd.f32 1e-05, %v2199_v11  ;;  %v3371_v11 = vld [vmem:[%s4626_s9 + $0x30] ss:$8 sps:$4 sm:$0xff]  }
 0xe91   : > { %3469 = vrsqrt.f32 %v2207_v13  ;;  %v3376_v13 = vld [vmem:[%s4626_s9 + $0x24] ss:$8 sps:$4 sm:$0xff]  }
 0xe96   : > { %v3464_v18 = vpop.eup %3463 }
 0xe97   : > { %v2212_v37 = vmul.f32 %v3464_v18, %v2200_v34  ;;  %v3374_v34 = vld [vmem:[%s4626_s9 + $0x20] ss:$8 sps:$4 sm:$0xff]   ;;  %v3377_v18 = vld [vmem:[%s4626_s9 + $0x10] ss:$8 sps:$4 sm:$0xff]  }
 0xe99   : > { %v2220_v24 = vmul.f32 %v2219_v2, %v2212_v37  ;;  %v3380_v37 = vld [vmem:[%s4626_s9] ss:$8 sps:$4 sm:$0xff]  }
 0xe9a   : > { %v3466_v6 = vpop.eup %3465 }
 0xe9b   : > { %v3468_v49 = vpop.eup %3467  ;;  %v2213_v20 = vmul.f32 %v3466_v6, %v2201_v41  ;;  %v2228_v1 = vadd.f32 %v2227_v7, %v2220_v24  ;;  %v3385_v41 = vld [vmem:[%s4626_s9 + $0xf4] ss:$8 sps:$4 sm:$0xff]   ;;  %v3383_v24 = vld [vmem:[%s4626_s9 + $0xf0] ss:$8 sps:$4 sm:$0xff]   ;;  %v3386_v6 = vld [vmem:[%s4626_s9 + $0xe0] ss:$8 sps:$4 sm:$0xff]  }
 0xe9c   : > { %v2214_v46 = vmul.f32 %v3468_v49, %v2202_v8  ;;  %v3391_v8 = vld [vmem:[%s4626_s9 + $0xd4] ss:$8 sps:$4 sm:$0xff]   ;;  %v3389_v49 = vld [vmem:[%s4626_s9 + $0xd0] ss:$8 sps:$4 sm:$0xff]  }
 0xe9d   : > { %v2221_v38 = vmul.f32 %v2219_v2, %v2213_v20  ;;  %v2232_v60 = vmax.f32 %v2228_v1, 0.0  ;;  %v3394_v20 = vld [vmem:[%s4626_s9 + $0xc4] ss:$8 sps:$4 sm:$0xff]   ;;  %v3395_v1 = vld [vmem:[%s4626_s9 + $0xb0] ss:$8 sps:$4 sm:$0xff]  }
 0xe9e   : > { %v3470_v25 = vpop.eup %3469  ;;  %v2222_v36 = vmul.f32 %v2219_v2, %v2214_v46  ;;  %v3392_v46 = vld [vmem:[%s4626_s9 + $0xc0] ss:$8 sps:$4 sm:$0xff]  }
 0xe9f   : > { %v2215_v22 = vmul.f32 %v3470_v25, %v2203_v17  ;;  %v2229_v30 = vadd.f32 %v2227_v7, %v2221_v38  ;;  %v3397_v17 = vld [vmem:[%s4626_s9 + $0xb4] ss:$8 sps:$4 sm:$0xff]   ;;  %v2424_v38 = vpop.f32.mrf.mxu1  ;;  %v3400_v25 = vld [vmem:[%s4626_s9 + $0xa4] ss:$8 sps:$4 sm:$0xff]  }
 0xea0   : > { %v2230_v45 = vadd.f32 %v2227_v7, %v2222_v36 }
 0xea1   : > { %v2233_v4 = vmax.f32 %v2229_v30, 0.0  ;;  %v2223_v59 = vmul.f32 %v2219_v2, %v2215_v22  ;;  %v3379_v2 = vld [vmem:[%s4626_s9 + $0x14] ss:$8 sps:$4 sm:$0xff]   ;;  %v2426_v36 = vpop.f32.mrf.mxu1  ;;  %v2425_v30 = vadd.f32 %v2424_v38, %v4403_v3 }
 0xea2   : > { %v2234_v12 = vmax.f32 %v2230_v45, 0.0 }
 0xea3   : > { %v2236_v54 = vpack.c.bf16 %v2233_v4, %v2232_v60  ;;  %v2231_v28 = vadd.f32 %v2227_v7, %v2223_v59  ;;  %v3388_v7 = vld [vmem:[%s4626_s9 + $0xe4] ss:$8 sps:$4 sm:$0xff]   ;;  %v2428_v22 = vpop.f32.mrf.mxu1  ;;  %v3401_v60 = vld [vmem:[%s4626_s9 + $0x90] ss:$8 sps:$4 sm:$0xff]   ;;  %v2436_v45 = vmax.f32 %v2425_v30, 0.0 }
 0xea4   : > { %v2429_v4 = vadd.f32 %v2428_v22, %v4403_v3  ;;  %v3406_v59 = vld [vmem:[%s4626_s9 + $0x84] ss:$8 sps:$4 sm:$0xff]  }
 0xea5   : > { %3255 = vmatprep.mubr.msk.bf16.mxu0 %vm592_vm3, %v2236_v54  ;;  %v2235_v23 = vmax.f32 %v2231_v28, 0.0  ;;  %v2423_v28 = vadd.f32 %v2422_v21, %v4385_v27 }
 0xea6   : > { %v2438_v44 = vmax.f32 %v2429_v4, 0.0  ;;  %v2717_v4 = vrot.slane %v4380_v53, %v3843_v63 }
 0xea7   : > { %v2237_v62 = vpack.c.bf16 %v2235_v23, %v2234_v12  ;;  %v2427_v12 = vadd.f32 %v2426_v36, %v4385_v27  ;;  %v2435_v3 = vmax.f32 %v2423_v28, 0.0 }
 0xea8   : > { %v2442_v54 = vpack.c.bf16 %v2438_v44, %v2436_v45  ;;  %v2721_v45 = vrot.slane %v4380_v53, %v3969_v31 }
 0xea9   : > { %3256 = vmatmul.mubr.msk.bf16.vlgmr.msra.gmra.mxu0 %vm592_vm3, %v2237_v62  ;;  %v2437_v23 = vmax.f32 %v2427_v12, 0.0  ;;  %v2250_v62 = vrot.slane %v4238_v43, %v3853_v51 }
 0xeaa   : > { %2654 = vmatpush1.bf16.msra.mxu0 %v3359_v29  ;;  %2685 = vmatprep.mubr.bf16.mxu0 %v2440_v55 }
 0xeab   : > { %2655 = vmatprep.subr.bf16.mxu0 %v3364_v40  ;;  %v2441_v29 = vpack.c.bf16 %v2437_v23, %v2435_v3  ;;  %v2731_v23 = vrot.slane %v2721_v45, %v3843_v63 }
 0xeae   : > { %2656 = vmatpush1.bf16.msra.mxu0 %v3362_v19 }
 0xeaf   : > { %2657 = vmatprep.subr.bf16.mxu0 %v3367_v57 }
 0xeb2   : > { %2658 = vmatpush1.bf16.msra.mxu0 %v3365_v52  ;;  %v2337_v52 = vrot.slane %v4238_v43, %v3843_v63 }
 0xeb3   : > { %2659 = vmatprep.subr.bf16.mxu0 %v3370_v9 }
 0xeb6   : > { %2660 = vmatpush1.bf16.msra.mxu0 %v3368_v32 }
 0xeb7   : > { %2661 = vmatprep.subr.bf16.mxu0 %v3373_v61 }
 0xeba   : > { %2662 = vmatpush1.bf16.msra.mxu0 %v3371_v11 }
 0xebb   : > { %2663 = vmatprep.subr.bf16.mxu0 %v3376_v13 }
 0xebe   : > { %2664 = vmatpush1.bf16.msra.mxu0 %v3374_v34 }
 0xebf   : > { %2665 = vmatprep.subr.bf16.mxu0 %v3379_v2 }
 0xec2   : > { %2666 = vmatpush1.bf16.msra.mxu0 %v3377_v18 }
 0xec3   : > { %2667 = vmatprep.subr.bf16.mxu0 %v3382_v47 }
 0xec6   : > { %2668 = vmatpush1.bf16.msra.mxu0 %v3380_v37 }
 0xec7   : > { %2669 = vmatprep.subr.bf16.mxu0 %v3385_v41 }
 0xeca   : > { %2670 = vmatpush2.bf16.msra.mxu0 %v3383_v24 }
 0xecb   : > { %2671 = vmatprep.subr.bf16.mxu0 %v3388_v7 }
 0xece   : > { %2672 = vmatpush2.bf16.msra.mxu0 %v3386_v6 }
 0xecf   : > { %2673 = vmatprep.subr.bf16.mxu0 %v3391_v8 }
 0xed2   : > { %2674 = vmatpush2.bf16.msra.mxu0 %v3389_v49 }
 0xed3   : > { %2675 = vmatprep.subr.bf16.mxu0 %v3394_v20 }
 0xed6   : > { %2676 = vmatpush2.bf16.msra.mxu0 %v3392_v46 }
 0xed7   : > { %2677 = vmatprep.subr.bf16.mxu0 %v3397_v17 }
 0xeda   : > { %2678 = vmatpush2.bf16.msra.mxu0 %v3395_v1 }
 0xedb   : > { %2679 = vmatprep.subr.bf16.mxu0 %v3400_v25 }
 0xede   : > { %2680 = vmatpush2.bf16.msra.mxu0 %v3398_v33 }
 0xedf   : > { %2681 = vmatprep.subr.bf16.mxu0 %v3403_v35  ;;  %v2482_v35 = vrot.slane %v4380_v53, %v3914_v26  ;;  %v2727_v26 = vrot.slane %v2717_v4, %v3843_v63 }
 0xee2   : > { %2682 = vmatpush2.bf16.msra.mxu0 %v3401_v60 }
 0xee3   : > { %2683 = vmatprep.subr.bf16.mxu0 %v3406_v59  ;;  %v2492_v59 = vrot.slane %v2482_v35, %v3837_v58 }
 0xee6   : > { %2684 = vmatpush2.bf16.msra.mxu0 %v3404_v10 }
 0xee9   : > { %2686 = vmatmul.mubr.bf16.vlgmr.msra.gmra.mxu0 %v4391_v50 }
 0xeea   : > { %2695 = vmatprep.mubr.bf16.mxu0 %v2442_v54 }
 0xef1   : > { %2696 = vmatmul.mubr.bf16.gmra.mxu0 %v2441_v29 }
 0xf69   : > { %v3257_v55 = vpop.f32.mrf.mxu0 }
 0xf6a   : > { %v2324_v2 = vadd.f32 %v3257_v55, %v2250_v62 }
 0xf6b   : > { %v2315_v40 = vpop.f32.mrf.mxu0 }
 0xf6c   : > { %v2316_v19 = vadd.f32 %v2315_v40, %v2250_v62 }
 0xf6d   : > { %v3258_v57 = vpop.f32.mrf.mxu0 }
 0xf6e   : > { %v2330_v9 = vadd.f32 %v2316_v19, %v4249_v39  ;;  %v2332_v39 = vadd.f32 %v2324_v2, %v4255_v48  ;;  %v2327_v47 = vadd.f32 %v3258_v57, %v2250_v62 }
 0xf6f   : > { %v2318_v27 = vpop.f32.mrf.mxu0 }
 0xf70   : > { %v2338_v32 = vmul.f32 %v2337_v52, %v2330_v9  ;;  %v2319_v50 = vadd.f32 %v2318_v27, %v2250_v62  ;;  %v2340_v24 = vmul.f32 %v2337_v52, %v2332_v39 }
 0xf72   : > { %v2342_v61 = vadd.f32 %v2338_v32, %v4266_v14  ;;  %v2331_v11 = vadd.f32 %v2319_v50, %v4260_v42  ;;  %v2344_v8 = vadd.f32 %v2340_v24, %v4272_v5 }
 0xf74   : > { %3471 = vtanh.f32 %v2342_v61  ;;  %v2339_v13 = vmul.f32 %v2337_v52, %v2331_v11 }
 0xf76   : > { %v2343_v34 = vadd.f32 %v2339_v13, %v4269_v15  ;;  %v2333_v15 = vadd.f32 %v2327_v47, %v4252_v56 }
 0xf78   : > { %3473 = vtanh.f32 %v2343_v34  ;;  %v2341_v49 = vmul.f32 %v2337_v52, %v2333_v15 }
 0xf7a   : > { %v2345_v48 = vadd.f32 %v2341_v49, %v4263_v16  ;;  %v2478_v16 = vrot.slane %v4380_v53, %v3837_v58 }
 0xf7c   : > { %v2488_v22 = vrot.slane %v2478_v16, %v3837_v58 }
 0xf81   : > { %v4517_v18 = vpop.eup %3471 }
 0xf82   : > { %v2764_v43 = vmul.f32 %v4517_v18, %v4517_v18 }
 0xf84   : > { %v2768_v37 = vsub.f32 1.0, %v2764_v43 }
 0xf85   : > { %v4522_v41 = vpop.eup %3473 }
 0xf86   : > { %v2772_v14 = vadd.f32 1e-06, %v2768_v37  ;;  %v2765_v42 = vmul.f32 %v4522_v41, %v4522_v41 }
 0xf88   : > { %3475 = vlog2.f32 %v2772_v14  ;;  %v2769_v7 = vsub.f32 1.0, %v2765_v42 }
 0xf8a   : > { %v2773_v6 = vadd.f32 1e-06, %v2769_v7 }
 0xf8c   : > { %3477 = vlog2.f32 %v2773_v6 }
 0xf8d   : > { %3479 = vtanh.f32 %v2344_v8 }
 0xf8e   : > { %3481 = vtanh.f32 %v2345_v48 }
 0xf95   : > { %v3476_v20 = vpop.eup %3475 }
 0xf96   : > { %v2777_v21 = vmul.f32 0.6931472, %v3476_v20 }
 0xf98   : > { %v2784_v46 = vsel %vm524_vm2, %v2777_v21, 0.0 }
 0xf99   : > { %v3478_v17 = vpop.eup %3477  ;;  %2785 = vadd.xlane.f32.xlu0 %v2784_v46 }
 0xf9a   : > { %v2779_v38 = vmul.f32 0.6931472, %v3478_v17  ;;  %v4530_v1 = vpop.eup %3479 }
 0xf9b   : > { %v2766_v5 = vmul.f32 %v4530_v1, %v4530_v1  ;;  %v4535_v25 = vpop.eup %3481 }
 0xf9c   : > { %v2787_v56 = vsel %vm524_vm2, %v2779_v38, 0.0  ;;  %v2767_v33 = vmul.f32 %v4535_v25, %v4535_v25 }
 0xf9d   : > { %2788 = vadd.xlane.f32.xlu1 %v2787_v56  ;;  %v2770_v36 = vsub.f32 1.0, %v2766_v5  ;;  %v2755_v5 = vrot.slane %v4380_v53, %v3853_v51 }
 0xf9e   : > { %v2771_v60 = vsub.f32 1.0, %v2767_v33 }
 0xf9f   : > { %v2774_v30 = vadd.f32 1e-06, %v2770_v36 }
 0xfa0   : > { %v2775_v28 = vadd.f32 1e-06, %v2771_v60 }
 0xfa1   : > { %3483 = vlog2.f32 %v2774_v30 }
 0xfa2   : > { %3485 = vlog2.f32 %v2775_v28 }
 0xfa9   : > { %v2687_v44 = vpop.f32.mrf.mxu0 }
 0xfaa   : > { %v2688_v10 = vadd.f32 %v2687_v44, %v2488_v22 }
 0xfab   : > { %v2689_v54 = vpop.f32.mrf.mxu0 }
 0xfac   : > { %v2706_v12 = vmax.f32 %v2688_v10, 0.0  ;;  %v2690_v3 = vadd.f32 %v2689_v54, %v2492_v59 }
 0xfad   : > { %v2691_v29 = vpop.f32.mrf.mxu0 }
 0xfae   : > { %v2707_v55 = vmax.f32 %v2690_v3, 0.0  ;;  %v2692_v62 = vadd.f32 %v2691_v29, %v2488_v22  ;;  %v2732_v58 = vmul.f32 %v2727_v26, %v2706_v12  ;;  %v3484_v37 = vpop.eup %3483  ;;  %v2804_v29 = vsel %vm524_vm2, %v4517_v18, 0.0 }
 0xfaf   : > { %v2693_v40 = vpop.f32.mrf.mxu0  ;;  %v2781_v8 = vmul.f32 0.6931472, %v3484_v37  ;;  %v3486_v49 = vpop.eup %3485 }
 0xfb0   : > { %v2733_v19 = vmul.f32 %v2731_v23, %v2707_v55  ;;  %v2708_v57 = vmax.f32 %v2692_v62, 0.0  ;;  %v2694_v31 = vadd.f32 %v2693_v40, %v2492_v59  ;;  %v2783_v17 = vmul.f32 0.6931472, %v3486_v49 }
 0xfb1   : > { %v2697_v52 = vpop.f32.mrf.mxu0  ;;  %v2790_v46 = vsel %vm524_vm2, %v2781_v8, 0.0  ;;  %v2805_v40 = vsel %vm524_vm2, %v4522_v41, 0.0  ;;  %v2807_v41 = vsel %vm524_vm2, %v4535_v25, 0.0 }
 0xfb2   : > { %v2709_v9 = vmax.f32 %v2694_v31, 0.0  ;;  %v2698_v27 = vadd.f32 %v2697_v52, %v2488_v22  ;;  %v2740_v32 = vadd.f32 %v2733_v19, %v2732_v58  ;;  %v2734_v61 = vmul.f32 %v2727_v26, %v2708_v57 }
 0xfb3   : > { %v2699_v50 = vpop.f32.mrf.mxu0  ;;  %v2793_v38 = vsel %vm524_vm2, %v2783_v17, 0.0 }
 0xfb4   : > { %v2735_v11 = vmul.f32 %v2731_v23, %v2709_v9  ;;  %v2710_v13 = vmax.f32 %v2698_v27, 0.0  ;;  %v2700_v34 = vadd.f32 %v2699_v50, %v2492_v59  ;;  %2741 = vadd.xlane.f32.xlu0 %v2740_v32 }
 0xfb5   : > { %v2701_v63 = vpop.f32.mrf.mxu0 }
 0xfb6   : > { %v2711_v2 = vmax.f32 %v2700_v34, 0.0  ;;  %v2702_v43 = vadd.f32 %v2701_v63, %v2488_v22  ;;  %v2743_v39 = vadd.f32 %v2735_v11, %v2734_v61  ;;  %v2736_v14 = vmul.f32 %v2727_v26, %v2710_v13 }
 0xfb7   : > { %v2703_v47 = vpop.f32.mrf.mxu0 }
 0xfb8   : > { %v2737_v42 = vmul.f32 %v2731_v23, %v2711_v2  ;;  %v2712_v24 = vmax.f32 %v2702_v43, 0.0  ;;  %v2704_v15 = vadd.f32 %v2703_v47, %v2492_v59  ;;  %2744 = vadd.xlane.f32.xlu1 %v2743_v39 }
 0xfba   : > { %v2713_v7 = vmax.f32 %v2704_v15, 0.0  ;;  %v2746_v6 = vadd.f32 %v2737_v42, %v2736_v14  ;;  %v2738_v48 = vmul.f32 %v2727_v26, %v2712_v24 }
 0xfbc   : > { %v2739_v20 = vmul.f32 %v2731_v23, %v2713_v7  ;;  %2747 = vadd.xlane.f32.xlu0 %v2746_v6  ;;  %v2809_v23 = vand.u32 127, %v513_v0  ;;  %v2806_v0 = vsel %vm524_vm2, %v4530_v1, 0.0 }
 0xfbe   : > { %v2749_v21 = vadd.f32 %v2739_v20, %v2738_v48  ;;  %vm2810_vm4 = vcmp.eq.s32.totalorder %v2809_v23, 8 }
 0xfc0   : > { %2750 = vadd.xlane.f32.xlu1 %v2749_v21  ;;  %2791 = vadd.xlane.f32.xlu0 %v2790_v46 }
 0xfc4   : > { %2794 = vadd.xlane.f32.xlu1 %v2793_v38 }
0x1022   : > { %v2786_v56 = vpop.xlane.xlu0 %2785 }
0x1026   : > { %v2789_v16 = vpop.xlane.xlu1 %2788 }
0x103d   : > { %v2742_v36 = vpop.xlane.xlu0 %2741 }
0x103e   : > { %v2756_v33 = vadd.f32 %v2755_v5, %v2742_v36 }
0x1040   : > { %v2796_v35 = vsub.f32 0.0, %v2756_v33 }
0x1041   : > { %v2745_v22 = vpop.xlane.xlu1 %2744 }
0x1042   : > { %v2800_v30 = vsub.f32 %v2796_v35, %v2786_v56  ;;  %v2757_v60 = vadd.f32 %v2755_v5, %v2745_v22 }
0x1044   : > { %v2797_v4 = vsub.f32 0.0, %v2757_v60  ;;  %2813 = vperm.xlu0 %3319, %v2800_v30  }
0x1045   : > { %v2748_v59 = vpop.xlane.xlu0 %2747 }
0x1046   : > { %v2801_v45 = vsub.f32 %v2797_v4, %v2789_v16  ;;  %v2758_v44 = vadd.f32 %v2755_v5, %v2748_v59 }
0x1048   : > { %v2798_v10 = vsub.f32 0.0, %v2758_v44  ;;  %2818 = vperm.xlu1 %3320, %v2801_v45  }
0x1049   : > { %v2751_v54 = vpop.xlane.xlu1 %2750  ;;  %v2792_v28 = vpop.xlane.xlu0 %2791 }
0x104a   : > { %v2759_v12 = vadd.f32 %v2755_v5, %v2751_v54  ;;  %v2802_v26 = vsub.f32 %v2798_v10, %v2792_v28 }
0x104c   : > { %v2799_v51 = vsub.f32 0.0, %v2759_v12  ;;  %2823 = vperm.xlu1 %3320, %v2802_v26  }
0x104d   : > { %v2795_v53 = vpop.xlane.xlu1 %2794 }
0x104e   : > { %v2803_v3 = vsub.f32 %v2799_v51, %v2795_v53 }
0x1050   : > { %2828 = vperm.xlu1 %3320, %v2803_v3  }
0x10bf   : > { %v2814_v55 = vpop.permute.xlu0 %2813 }
0x10c0   : > { %v2831_v62 = vsel %vm2810_vm4, %v2814_v55, %v2804_v29 }
0x10c1   : > { %2835 = vst [vmem:[%s411_s14] sm:$0xff] %v2831_v62 }
0x10c3   : > { %v2819_v58 = vpop.permute.xlu1 %2818 }
0x10c4   : > { %v2832_v19 = vsel %vm2810_vm4, %v2819_v58, %v2805_v40 }
0x10c5   : > { %2836 = vst [vmem:[%s411_s14 + $0x8] sm:$0xff] %v2832_v19 }
0x10c7   : > { %v2824_v57 = vpop.permute.xlu1 %2823 }
0x10c8   : > { %v2833_v18 = vsel %vm2810_vm4, %v2824_v57, %v2806_v0 }
0x10c9   : > { %2837 = vst [vmem:[%s411_s14 + $0x10] sm:$0xff] %v2833_v18 }
0x10cb   : > { %v2829_v31 = vpop.permute.xlu1 %2828 }
0x10cc   : > { %v2834_v1 = vsel %vm2810_vm4, %v2829_v31, %v2807_v41 }
0x10cd   : > { %2838 = vst [vmem:[%s411_s14 + $0x18] sm:$0xff] %v2834_v1 }
0x10ce   : > { %3527 = shalt.err (!%p3524_p0)
}
0x10cf   : > { %s3528_s30 = scalar_lea.hbm %s4574_s29, 512  ;;  %s3532_s14 = scalar_lea.hbm %s4628_s11, 1024 }
0x10d0   : > { %p3529_p1 = scmp.ne.s32.totalorder %s4574_s29, %s3528_s30  ;;  %p3533_p4 = scmp.lt.s32.totalorder %s4574_s29, %s4628_s11 }
0x10d1   : > { %p3534_p7 = scmp.lt.s32.totalorder %s3532_s14, %s3528_s30 }
0x10d2   : > { %p3530_p2 = pnand %p3529_p1, %p3686_p5 }
0x10d3   : > { %p3535_p6 = por %p3534_p7, %p3533_p4 }
0x10d4   : > { %p3531_p3 = pneg %p3530_p2 }
0x10d6   : > { %p3536_p8 = pnand %p3535_p6, %p3531_p3 }
0x10d8   : > { %3539 = shalt.err (!%p3536_p8)
}
0x10d9   : > { %s3586_s24 = smov 128   ;;  %s3587_s21 = smov 8  }
0x10da   : > { %3267 = dma.vmem_to_hbm [thread:$0]  (%p3686_p5), %s4567_s15, 512, %s4574_s29, %s4577_s6, %s3586_s24, %s3586_s24, %s3587_s21  }
0x10db PF: > { %p3279_p9 = scmp.ge.s32.totalorder %s3578_s20, 2  ;;  %s2868_s26 = sand.u32 1, %s3566_s17  }
0x10dc   : > { %p4637_p10 = scmp.ne.s32.totalorder %s4634_s28, 0  ;;  %s2869_s19 = scalar_lea.sflag [#allocation4], %s2868_s26 }
0x10de   : > { %p3274_p11 = pnand %p3279_p9, %p4637_p10 }
0x10e0   : > { %p3275_p12 = pneg %p3274_p11 }
0x10e2   : > { %3561 = dma.done.wait (%p3275_p12), %s2869_s19, 512  }
0x10e3   : > { %3563 = vsyncadd (%p3275_p12), %s2869_s19, 4294966784  ;;  %s4638_s25 = sld [smem:[#allocation8_spill]]  ;;  %p22_p13 = scmp.ge.s32.totalorder %s3673_s23, 4  }
0x10e4   : > { %s4639_s19 = sld [smem:[#allocation9_spill]]  ;;  %s4640_s17 = smov %s3570_s18 }
0x10e5   : > { %s4642_s20 = smov %s3673_s23  ;;  %24 = sbr.rel (!%p22_p13) target bundleno = 6 (0x6), region = 116 }
0x10e9   : > { %s4641_s18 = smov %s4638_s25 }
0x10ea   :  { %2874 = vsyncpa [#allocation3], 1 }
0x10eb   :  { %2876 = vsyncpa [#allocation3 + $0x1], 1 }
0x10ec   :  { %2877 = vsyncpa [#allocation4], 1 }
0x10ed   :  { %2879 = vsyncpa [#allocation4 + $0x1], 1 }

</bundles_post_ra>
